<compile_context>
chip_gen: v6e
topology: v6e:2x2x1
jax: 0.10.0
libtpu: 0.0.40
codegen_flags: <defaults>
</compile_context>

<pallas_src>
import functools

import jax
import jax.numpy as jnp
from jax.experimental import pallas as pl
from jax.experimental.pallas import tpu as pltpu  # noqa: F401  (kept for VMEM scratch if shapes grow)

H1 = 8     # rnn1 hidden size
H2 = 128   # rnn2 hidden size
F1 = 64    # fnn1 width (folded into the head weight host-side)


def _lstm_gates(g, hdim, c):
    """PyTorch LSTM cell update from pre-activations g packed [i, f, g, o]."""
    i_g = jax.nn.sigmoid(g[:, 0 * hdim:1 * hdim])
    f_g = jax.nn.sigmoid(g[:, 1 * hdim:2 * hdim])
    g_g = jnp.tanh(g[:, 2 * hdim:3 * hdim])
    o_g = jax.nn.sigmoid(g[:, 3 * hdim:4 * hdim])
    c_new = f_g * c + i_g * g_g
    h_new = o_g * jnp.tanh(c_new)
    return h_new, c_new


def _nnn_kernel(B, T, C,
                x1_ref, wih1_ref, whh1t_ref, b1_ref,
                wih2t_ref, whh2t_ref, b2_ref,
                w_head_ref, b_head_ref,
                out_ref):
    f32 = jnp.float32
    bf16 = jnp.bfloat16
    N1 = B * T

    # ---- rnn1: B*T independent scalar-input sequences of length C.
    # Rows are ordered n = t*B + b (t-major) so the handoff to rnn2 is a
    # plain contiguous slice per timestep.
    x1 = x1_ref[...]                                        # (N1, C) f32
    whh1t = whh1t_ref[...]                                  # (H1, 4*H1)
    # Hoist the broadcast input weight / (folded) bias out of the loop.
    wih1_b = jnp.broadcast_to(wih1_ref[...], (N1, 4 * H1))
    b1_b = jnp.broadcast_to(b1_ref[...], (N1, 4 * H1))

    h1 = jnp.zeros((N1, H1), f32)
    c1 = jnp.zeros((N1, H1), f32)
    for t in range(C):                                      # static lane slices
        g = (x1[:, t:t + 1] * wih1_b + b1_b
             + jnp.dot(h1, whh1t, preferred_element_type=f32))
        h1, c1 = _lstm_gates(g, H1, c1)

    # ---- rnn2 input-side gate slabs for ALL T steps: one bf16 MXU matmul,
    # bias folded in, result kept in vregs (no scratch / scatter).
    gx2 = (jnp.dot(h1.astype(bf16), wih2t_ref[...],
                   preferred_element_type=f32)
           + b2_ref[...])                                   # (N1, 4*H2) f32

    h2 = jnp.zeros((B, H2), f32)
    c2 = jnp.zeros((B, H2), f32)
    for t in range(T):                                      # static sublane slices
        g = (gx2[t * B:(t + 1) * B, :]
             + jnp.dot(h2.astype(bf16), whh2t_ref[...],
                       preferred_element_type=f32))
        h2, c2 = _lstm_gates(g, H2, c2)

    # ---- Folded MLP head (fnn2 o fnn1, no activation): VPU mul + lane reduce.
    out_ref[...] = (jnp.sum(h2 * w_head_ref[...], axis=-1, keepdims=True)
                    + b_head_ref[...])


def nnn_forward(params, x):
    """x: (B, T, C) float32.  Returns (B, 1), matching NNN.forward."""
    B, T, C = x.shape
    f32 = jnp.float32
    bf16 = jnp.bfloat16

    # rnn1 processes B*T independent scalar-input sequences of length C.
    # Row order n = t*B + b so rnn1's final hidden states are already grouped
    # per rnn2 timestep.
    x1 = jnp.transpose(x.astype(f32), (1, 0, 2)).reshape(T * B, C)

    wih1 = jnp.asarray(params["rnn1_w_ih"], f32).reshape(1, 4 * H1)
    whh1t = jnp.asarray(params["rnn1_w_hh"], f32).T                      # (H1, 4H1)
    b1 = (jnp.asarray(params["rnn1_b_ih"], f32)
          + jnp.asarray(params["rnn1_b_hh"], f32)).reshape(1, 4 * H1)

    # bf16 MXU operands for rnn2 (accumulation & gate math stay f32).
    wih2t = jnp.asarray(params["rnn2_w_ih"], f32).T.astype(bf16)         # (H1, 4H2)
    whh2t = jnp.asarray(params["rnn2_w_hh"], f32).T.astype(bf16)         # (H2, 4H2)
    b2 = (jnp.asarray(params["rnn2_b_ih"], f32)
          + jnp.asarray(params["rnn2_b_hh"], f32)).reshape(1, 4 * H2)

    # fnn1 -> fnn2 has no activation: fold into a single 128->1 head.
    w1 = jnp.asarray(params["fnn1_w"], f32)                              # (F1, H2)
    b1f = jnp.asarray(params["fnn1_b"], f32)                             # (F1,)
    w2 = jnp.asarray(params["fnn2_w"], f32)                              # (1, F1)
    b2f = jnp.asarray(params["fnn2_b"], f32)                             # (1,)
    w_head = w2 @ w1                                                     # (1, H2)
    b_head = (b1f @ w2.T + b2f).reshape(1, 1)                            # (1, 1)

    kernel = functools.partial(_nnn_kernel, B, T, C)
    return pl.pallas_call(
        kernel,
        out_shape=jax.ShapeDtypeStruct((B, 1), f32),
        # No grid / no scratch: the whole model (< 200 KiB) is VMEM-resident
        # with default whole-array blocks; both recurrences are fully unrolled
        # static loops inside a single program.
    )(x1, wih1, whh1t, b1, wih2t, whh2t, b2, w_head, b_head)


def init_params(key):
    """Deterministic init matching PyTorch LSTM/Linear parameter shapes."""
    def u(key, shape, bound):
        return jax.random.uniform(key, shape, jnp.float32, -bound, bound)

    ks = jax.random.split(key, 12)
    bd1, bd2 = 1.0 / jnp.sqrt(float(H1)), 1.0 / jnp.sqrt(float(H2))
    return {
        # rnn1: LSTM(input=1, hidden=8)
        "rnn1_w_ih": u(ks[0], (4 * H1, 1), bd1),
        "rnn1_w_hh": u(ks[1], (4 * H1, H1), bd1),
        "rnn1_b_ih": u(ks[2], (4 * H1,), bd1),
        "rnn1_b_hh": u(ks[3], (4 * H1,), bd1),
        # rnn2: LSTM(input=8, hidden=128)
        "rnn2_w_ih": u(ks[4], (4 * H2, H1), bd2),
        "rnn2_w_hh": u(ks[5], (4 * H2, H2), bd2),
        "rnn2_b_ih": u(ks[6], (4 * H2,), bd2),
        "rnn2_b_hh": u(ks[7], (4 * H2,), bd2),
        # fnn1: Linear(128, 64), fnn2: Linear(64, 1)
        "fnn1_w": u(ks[8], (F1, H2), 1.0 / jnp.sqrt(float(H2))),
        "fnn1_b": u(ks[9], (F1,), 1.0 / jnp.sqrt(float(H2))),
        "fnn2_w": u(ks[10], (1, F1), 1.0 / jnp.sqrt(float(F1))),
        "fnn2_b": u(ks[11], (1,), 1.0 / jnp.sqrt(float(F1))),
    }


if __name__ == "__main__":
    key = jax.random.PRNGKey(0)
    k_param, k_x = jax.random.split(key)
    params = init_params(k_param)
    # Small shapes consistent with the module: batch=2, seq=8, features=16.
    x = jax.random.normal(k_x, (2, 8, 16), dtype=jnp.float32)
    out = jax.jit(nnn_forward)(params, x)
    out = jax.block_until_ready(out)
    assert out.shape == (2, 1), out.shape
    print("KERNEL_OK")
</pallas_src>

<mosaic_0001>
module attributes {stable_mosaic.version = 11 : i64} {
  func.func @_nnn_kernel(%arg0: memref<16x16xf32, #tpu.memory_space<vmem>>, %arg1: memref<1x32xf32, #tpu.memory_space<vmem>>, %arg2: memref<8x32xf32, #tpu.memory_space<vmem>>, %arg3: memref<1x32xf32, #tpu.memory_space<vmem>>, %arg4: memref<8x512xbf16, #tpu.memory_space<vmem>>, %arg5: memref<128x512xbf16, #tpu.memory_space<vmem>>, %arg6: memref<1x512xf32, #tpu.memory_space<vmem>>, %arg7: memref<1x128xf32, #tpu.memory_space<vmem>>, %arg8: memref<1x1xf32, #tpu.memory_space<vmem>>, %arg9: memref<2x1xf32, #tpu.memory_space<vmem>>) attributes {dimension_semantics = [], scalar_prefetch = 0 : i64, scratch_operands = 0 : i64, tpu.core_type = #tpu.core_type<tc>} {
    %c0 = arith.constant 0 : index
    %c0_0 = arith.constant 0 : index
    %0 = vector.load %arg0[%c0, %c0_0] : memref<16x16xf32, #tpu.memory_space<vmem>>, vector<16x16xf32>
    %c0_1 = arith.constant 0 : index
    %c0_2 = arith.constant 0 : index
    %1 = vector.load %arg2[%c0_1, %c0_2] : memref<8x32xf32, #tpu.memory_space<vmem>>, vector<8x32xf32>
    %c0_3 = arith.constant 0 : index
    %c0_4 = arith.constant 0 : index
    %2 = vector.load %arg1[%c0_3, %c0_4] : memref<1x32xf32, #tpu.memory_space<vmem>>, vector<1x32xf32>
    %3 = vector.shape_cast %2 : vector<1x32xf32> to vector<1x32xf32>
    %4 = vector.broadcast %3 : vector<1x32xf32> to vector<16x32xf32>
    %c0_5 = arith.constant 0 : index
    %c0_6 = arith.constant 0 : index
    %5 = vector.load %arg3[%c0_5, %c0_6] : memref<1x32xf32, #tpu.memory_space<vmem>>, vector<1x32xf32>
    %6 = vector.shape_cast %5 : vector<1x32xf32> to vector<1x32xf32>
    %7 = vector.broadcast %6 : vector<1x32xf32> to vector<16x32xf32>
    %cst = arith.constant 0.000000e+00 : f32
    %8 = vector.broadcast %cst : f32 to vector<16x8xf32>
    %cst_7 = arith.constant 0.000000e+00 : f32
    %9 = vector.broadcast %cst_7 : f32 to vector<16x8xf32>
    %10 = vector.extract_strided_slice %0 {offsets = [0, 0], sizes = [16, 1], strides = [1, 1]} : vector<16x16xf32> to vector<16x1xf32>
    %11 = vector.broadcast %10 : vector<16x1xf32> to vector<16x32xf32>
    %12 = arith.mulf %11, %4 : vector<16x32xf32>
    %13 = arith.addf %12, %7 : vector<16x32xf32>
    %cst_8 = arith.constant dense<0.000000e+00> : vector<16x32xf32>
    %14 = tpu.matmul %8, %1, %cst_8 {dimension_numbers = #tpu.dot_dimension_numbers<[1], [0], [0], [1], [0, 0, 1, 1], [], []>} : vector<16x8xf32>, vector<8x32xf32>, vector<16x32xf32> -> vector<16x32xf32>
    %15 = arith.addf %13, %14 : vector<16x32xf32>
    %16 = vector.extract_strided_slice %15 {offsets = [0, 0], sizes = [16, 8], strides = [1, 1]} : vector<16x32xf32> to vector<16x8xf32>
    %17 = arith.negf %16 : vector<16x8xf32>
    %18 = math.exp %17 : vector<16x8xf32>
    %cst_9 = arith.constant 1.000000e+00 : f32
    %19 = vector.broadcast %cst_9 : f32 to vector<16x8xf32>
    %20 = arith.addf %19, %18 : vector<16x8xf32>
    %21 = arith.divf %19, %20 : vector<16x8xf32>
    %22 = vector.extract_strided_slice %15 {offsets = [0, 8], sizes = [16, 8], strides = [1, 1]} : vector<16x32xf32> to vector<16x8xf32>
    %23 = arith.negf %22 : vector<16x8xf32>
    %24 = math.exp %23 : vector<16x8xf32>
    %cst_10 = arith.constant 1.000000e+00 : f32
    %25 = vector.broadcast %cst_10 : f32 to vector<16x8xf32>
    %26 = arith.addf %25, %24 : vector<16x8xf32>
    %27 = arith.divf %25, %26 : vector<16x8xf32>
    %28 = vector.extract_strided_slice %15 {offsets = [0, 16], sizes = [16, 8], strides = [1, 1]} : vector<16x32xf32> to vector<16x8xf32>
    %29 = math.tanh %28 : vector<16x8xf32>
    %30 = vector.extract_strided_slice %15 {offsets = [0, 24], sizes = [16, 8], strides = [1, 1]} : vector<16x32xf32> to vector<16x8xf32>
    %31 = arith.negf %30 : vector<16x8xf32>
    %32 = math.exp %31 : vector<16x8xf32>
    %cst_11 = arith.constant 1.000000e+00 : f32
    %33 = vector.broadcast %cst_11 : f32 to vector<16x8xf32>
    %34 = arith.addf %33, %32 : vector<16x8xf32>
    %35 = arith.divf %33, %34 : vector<16x8xf32>
    %36 = arith.mulf %27, %9 : vector<16x8xf32>
    %37 = arith.mulf %21, %29 : vector<16x8xf32>
    %38 = arith.addf %36, %37 : vector<16x8xf32>
    %39 = math.tanh %38 : vector<16x8xf32>
    %40 = arith.mulf %35, %39 : vector<16x8xf32>
    %41 = vector.extract_strided_slice %0 {offsets = [0, 1], sizes = [16, 1], strides = [1, 1]} : vector<16x16xf32> to vector<16x1xf32>
    %42 = vector.broadcast %41 : vector<16x1xf32> to vector<16x32xf32>
    %43 = arith.mulf %42, %4 : vector<16x32xf32>
    %44 = arith.addf %43, %7 : vector<16x32xf32>
    %cst_12 = arith.constant dense<0.000000e+00> : vector<16x32xf32>
    %45 = tpu.matmul %40, %1, %cst_12 {dimension_numbers = #tpu.dot_dimension_numbers<[1], [0], [0], [1], [0, 0, 1, 1], [], []>} : vector<16x8xf32>, vector<8x32xf32>, vector<16x32xf32> -> vector<16x32xf32>
    %46 = arith.addf %44, %45 : vector<16x32xf32>
    %47 = vector.extract_strided_slice %46 {offsets = [0, 0], sizes = [16, 8], strides = [1, 1]} : vector<16x32xf32> to vector<16x8xf32>
    %48 = arith.negf %47 : vector<16x8xf32>
    %49 = math.exp %48 : vector<16x8xf32>
    %cst_13 = arith.constant 1.000000e+00 : f32
    %50 = vector.broadcast %cst_13 : f32 to vector<16x8xf32>
    %51 = arith.addf %50, %49 : vector<16x8xf32>
    %52 = arith.divf %50, %51 : vector<16x8xf32>
    %53 = vector.extract_strided_slice %46 {offsets = [0, 8], sizes = [16, 8], strides = [1, 1]} : vector<16x32xf32> to vector<16x8xf32>
    %54 = arith.negf %53 : vector<16x8xf32>
    %55 = math.exp %54 : vector<16x8xf32>
    %cst_14 = arith.constant 1.000000e+00 : f32
    %56 = vector.broadcast %cst_14 : f32 to vector<16x8xf32>
    %57 = arith.addf %56, %55 : vector<16x8xf32>
    %58 = arith.divf %56, %57 : vector<16x8xf32>
    %59 = vector.extract_strided_slice %46 {offsets = [0, 16], sizes = [16, 8], strides = [1, 1]} : vector<16x32xf32> to vector<16x8xf32>
    %60 = math.tanh %59 : vector<16x8xf32>
    %61 = vector.extract_strided_slice %46 {offsets = [0, 24], sizes = [16, 8], strides = [1, 1]} : vector<16x32xf32> to vector<16x8xf32>
    %62 = arith.negf %61 : vector<16x8xf32>
    %63 = math.exp %62 : vector<16x8xf32>
    %cst_15 = arith.constant 1.000000e+00 : f32
    %64 = vector.broadcast %cst_15 : f32 to vector<16x8xf32>
    %65 = arith.addf %64, %63 : vector<16x8xf32>
    %66 = arith.divf %64, %65 : vector<16x8xf32>
    %67 = arith.mulf %58, %38 : vector<16x8xf32>
    %68 = arith.mulf %52, %60 : vector<16x8xf32>
    %69 = arith.addf %67, %68 : vector<16x8xf32>
    %70 = math.tanh %69 : vector<16x8xf32>
    %71 = arith.mulf %66, %70 : vector<16x8xf32>
    %72 = vector.extract_strided_slice %0 {offsets = [0, 2], sizes = [16, 1], strides = [1, 1]} : vector<16x16xf32> to vector<16x1xf32>
    %73 = vector.broadcast %72 : vector<16x1xf32> to vector<16x32xf32>
    %74 = arith.mulf %73, %4 : vector<16x32xf32>
    %75 = arith.addf %74, %7 : vector<16x32xf32>
    %cst_16 = arith.constant dense<0.000000e+00> : vector<16x32xf32>
    %76 = tpu.matmul %71, %1, %cst_16 {dimension_numbers = #tpu.dot_dimension_numbers<[1], [0], [0], [1], [0, 0, 1, 1], [], []>} : vector<16x8xf32>, vector<8x32xf32>, vector<16x32xf32> -> vector<16x32xf32>
    %77 = arith.addf %75, %76 : vector<16x32xf32>
    %78 = vector.extract_strided_slice %77 {offsets = [0, 0], sizes = [16, 8], strides = [1, 1]} : vector<16x32xf32> to vector<16x8xf32>
    %79 = arith.negf %78 : vector<16x8xf32>
    %80 = math.exp %79 : vector<16x8xf32>
    %cst_17 = arith.constant 1.000000e+00 : f32
    %81 = vector.broadcast %cst_17 : f32 to vector<16x8xf32>
    %82 = arith.addf %81, %80 : vector<16x8xf32>
    %83 = arith.divf %81, %82 : vector<16x8xf32>
    %84 = vector.extract_strided_slice %77 {offsets = [0, 8], sizes = [16, 8], strides = [1, 1]} : vector<16x32xf32> to vector<16x8xf32>
    %85 = arith.negf %84 : vector<16x8xf32>
    %86 = math.exp %85 : vector<16x8xf32>
    %cst_18 = arith.constant 1.000000e+00 : f32
    %87 = vector.broadcast %cst_18 : f32 to vector<16x8xf32>
    %88 = arith.addf %87, %86 : vector<16x8xf32>
    %89 = arith.divf %87, %88 : vector<16x8xf32>
    %90 = vector.extract_strided_slice %77 {offsets = [0, 16], sizes = [16, 8], strides = [1, 1]} : vector<16x32xf32> to vector<16x8xf32>
    %91 = math.tanh %90 : vector<16x8xf32>
    %92 = vector.extract_strided_slice %77 {offsets = [0, 24], sizes = [16, 8], strides = [1, 1]} : vector<16x32xf32> to vector<16x8xf32>
    %93 = arith.negf %92 : vector<16x8xf32>
    %94 = math.exp %93 : vector<16x8xf32>
    %cst_19 = arith.constant 1.000000e+00 : f32
    %95 = vector.broadcast %cst_19 : f32 to vector<16x8xf32>
    %96 = arith.addf %95, %94 : vector<16x8xf32>
    %97 = arith.divf %95, %96 : vector<16x8xf32>
    %98 = arith.mulf %89, %69 : vector<16x8xf32>
    %99 = arith.mulf %83, %91 : vector<16x8xf32>
    %100 = arith.addf %98, %99 : vector<16x8xf32>
    %101 = math.tanh %100 : vector<16x8xf32>
    %102 = arith.mulf %97, %101 : vector<16x8xf32>
    %103 = vector.extract_strided_slice %0 {offsets = [0, 3], sizes = [16, 1], strides = [1, 1]} : vector<16x16xf32> to vector<16x1xf32>
    %104 = vector.broadcast %103 : vector<16x1xf32> to vector<16x32xf32>
    %105 = arith.mulf %104, %4 : vector<16x32xf32>
    %106 = arith.addf %105, %7 : vector<16x32xf32>
    %cst_20 = arith.constant dense<0.000000e+00> : vector<16x32xf32>
    %107 = tpu.matmul %102, %1, %cst_20 {dimension_numbers = #tpu.dot_dimension_numbers<[1], [0], [0], [1], [0, 0, 1, 1], [], []>} : vector<16x8xf32>, vector<8x32xf32>, vector<16x32xf32> -> vector<16x32xf32>
    %108 = arith.addf %106, %107 : vector<16x32xf32>
    %109 = vector.extract_strided_slice %108 {offsets = [0, 0], sizes = [16, 8], strides = [1, 1]} : vector<16x32xf32> to vector<16x8xf32>
    %110 = arith.negf %109 : vector<16x8xf32>
    %111 = math.exp %110 : vector<16x8xf32>
    %cst_21 = arith.constant 1.000000e+00 : f32
    %112 = vector.broadcast %cst_21 : f32 to vector<16x8xf32>
    %113 = arith.addf %112, %111 : vector<16x8xf32>
    %114 = arith.divf %112, %113 : vector<16x8xf32>
    %115 = vector.extract_strided_slice %108 {offsets = [0, 8], sizes = [16, 8], strides = [1, 1]} : vector<16x32xf32> to vector<16x8xf32>
    %116 = arith.negf %115 : vector<16x8xf32>
    %117 = math.exp %116 : vector<16x8xf32>
    %cst_22 = arith.constant 1.000000e+00 : f32
    %118 = vector.broadcast %cst_22 : f32 to vector<16x8xf32>
    %119 = arith.addf %118, %117 : vector<16x8xf32>
    %120 = arith.divf %118, %119 : vector<16x8xf32>
    %121 = vector.extract_strided_slice %108 {offsets = [0, 16], sizes = [16, 8], strides = [1, 1]} : vector<16x32xf32> to vector<16x8xf32>
    %122 = math.tanh %121 : vector<16x8xf32>
    %123 = vector.extract_strided_slice %108 {offsets = [0, 24], sizes = [16, 8], strides = [1, 1]} : vector<16x32xf32> to vector<16x8xf32>
    %124 = arith.negf %123 : vector<16x8xf32>
    %125 = math.exp %124 : vector<16x8xf32>
    %cst_23 = arith.constant 1.000000e+00 : f32
    %126 = vector.broadcast %cst_23 : f32 to vector<16x8xf32>
    %127 = arith.addf %126, %125 : vector<16x8xf32>
    %128 = arith.divf %126, %127 : vector<16x8xf32>
    %129 = arith.mulf %120, %100 : vector<16x8xf32>
    %130 = arith.mulf %114, %122 : vector<16x8xf32>
    %131 = arith.addf %129, %130 : vector<16x8xf32>
    %132 = math.tanh %131 : vector<16x8xf32>
    %133 = arith.mulf %128, %132 : vector<16x8xf32>
    %134 = vector.extract_strided_slice %0 {offsets = [0, 4], sizes = [16, 1], strides = [1, 1]} : vector<16x16xf32> to vector<16x1xf32>
    %135 = vector.broadcast %134 : vector<16x1xf32> to vector<16x32xf32>
    %136 = arith.mulf %135, %4 : vector<16x32xf32>
    %137 = arith.addf %136, %7 : vector<16x32xf32>
    %cst_24 = arith.constant dense<0.000000e+00> : vector<16x32xf32>
    %138 = tpu.matmul %133, %1, %cst_24 {dimension_numbers = #tpu.dot_dimension_numbers<[1], [0], [0], [1], [0, 0, 1, 1], [], []>} : vector<16x8xf32>, vector<8x32xf32>, vector<16x32xf32> -> vector<16x32xf32>
    %139 = arith.addf %137, %138 : vector<16x32xf32>
    %140 = vector.extract_strided_slice %139 {offsets = [0, 0], sizes = [16, 8], strides = [1, 1]} : vector<16x32xf32> to vector<16x8xf32>
    %141 = arith.negf %140 : vector<16x8xf32>
    %142 = math.exp %141 : vector<16x8xf32>
    %cst_25 = arith.constant 1.000000e+00 : f32
    %143 = vector.broadcast %cst_25 : f32 to vector<16x8xf32>
    %144 = arith.addf %143, %142 : vector<16x8xf32>
    %145 = arith.divf %143, %144 : vector<16x8xf32>
    %146 = vector.extract_strided_slice %139 {offsets = [0, 8], sizes = [16, 8], strides = [1, 1]} : vector<16x32xf32> to vector<16x8xf32>
    %147 = arith.negf %146 : vector<16x8xf32>
    %148 = math.exp %147 : vector<16x8xf32>
    %cst_26 = arith.constant 1.000000e+00 : f32
    %149 = vector.broadcast %cst_26 : f32 to vector<16x8xf32>
    %150 = arith.addf %149, %148 : vector<16x8xf32>
    %151 = arith.divf %149, %150 : vector<16x8xf32>
    %152 = vector.extract_strided_slice %139 {offsets = [0, 16], sizes = [16, 8], strides = [1, 1]} : vector<16x32xf32> to vector<16x8xf32>
    %153 = math.tanh %152 : vector<16x8xf32>
    %154 = vector.extract_strided_slice %139 {offsets = [0, 24], sizes = [16, 8], strides = [1, 1]} : vector<16x32xf32> to vector<16x8xf32>
    %155 = arith.negf %154 : vector<16x8xf32>
    %156 = math.exp %155 : vector<16x8xf32>
    %cst_27 = arith.constant 1.000000e+00 : f32
    %157 = vector.broadcast %cst_27 : f32 to vector<16x8xf32>
    %158 = arith.addf %157, %156 : vector<16x8xf32>
    %159 = arith.divf %157, %158 : vector<16x8xf32>
    %160 = arith.mulf %151, %131 : vector<16x8xf32>
    %161 = arith.mulf %145, %153 : vector<16x8xf32>
    %162 = arith.addf %160, %161 : vector<16x8xf32>
    %163 = math.tanh %162 : vector<16x8xf32>
    %164 = arith.mulf %159, %163 : vector<16x8xf32>
    %165 = vector.extract_strided_slice %0 {offsets = [0, 5], sizes = [16, 1], strides = [1, 1]} : vector<16x16xf32> to vector<16x1xf32>
    %166 = vector.broadcast %165 : vector<16x1xf32> to vector<16x32xf32>
    %167 = arith.mulf %166, %4 : vector<16x32xf32>
    %168 = arith.addf %167, %7 : vector<16x32xf32>
    %cst_28 = arith.constant dense<0.000000e+00> : vector<16x32xf32>
    %169 = tpu.matmul %164, %1, %cst_28 {dimension_numbers = #tpu.dot_dimension_numbers<[1], [0], [0], [1], [0, 0, 1, 1], [], []>} : vector<16x8xf32>, vector<8x32xf32>, vector<16x32xf32> -> vector<16x32xf32>
    %170 = arith.addf %168, %169 : vector<16x32xf32>
    %171 = vector.extract_strided_slice %170 {offsets = [0, 0], sizes = [16, 8], strides = [1, 1]} : vector<16x32xf32> to vector<16x8xf32>
    %172 = arith.negf %171 : vector<16x8xf32>
    %173 = math.exp %172 : vector<16x8xf32>
    %cst_29 = arith.constant 1.000000e+00 : f32
    %174 = vector.broadcast %cst_29 : f32 to vector<16x8xf32>
    %175 = arith.addf %174, %173 : vector<16x8xf32>
    %176 = arith.divf %174, %175 : vector<16x8xf32>
    %177 = vector.extract_strided_slice %170 {offsets = [0, 8], sizes = [16, 8], strides = [1, 1]} : vector<16x32xf32> to vector<16x8xf32>
    %178 = arith.negf %177 : vector<16x8xf32>
    %179 = math.exp %178 : vector<16x8xf32>
    %cst_30 = arith.constant 1.000000e+00 : f32
    %180 = vector.broadcast %cst_30 : f32 to vector<16x8xf32>
    %181 = arith.addf %180, %179 : vector<16x8xf32>
    %182 = arith.divf %180, %181 : vector<16x8xf32>
    %183 = vector.extract_strided_slice %170 {offsets = [0, 16], sizes = [16, 8], strides = [1, 1]} : vector<16x32xf32> to vector<16x8xf32>
    %184 = math.tanh %183 : vector<16x8xf32>
    %185 = vector.extract_strided_slice %170 {offsets = [0, 24], sizes = [16, 8], strides = [1, 1]} : vector<16x32xf32> to vector<16x8xf32>
    %186 = arith.negf %185 : vector<16x8xf32>
    %187 = math.exp %186 : vector<16x8xf32>
    %cst_31 = arith.constant 1.000000e+00 : f32
    %188 = vector.broadcast %cst_31 : f32 to vector<16x8xf32>
    %189 = arith.addf %188, %187 : vector<16x8xf32>
    %190 = arith.divf %188, %189 : vector<16x8xf32>
    %191 = arith.mulf %182, %162 : vector<16x8xf32>
    %192 = arith.mulf %176, %184 : vector<16x8xf32>
    %193 = arith.addf %191, %192 : vector<16x8xf32>
    %194 = math.tanh %193 : vector<16x8xf32>
    %195 = arith.mulf %190, %194 : vector<16x8xf32>
    %196 = vector.extract_strided_slice %0 {offsets = [0, 6], sizes = [16, 1], strides = [1, 1]} : vector<16x16xf32> to vector<16x1xf32>
    %197 = vector.broadcast %196 : vector<16x1xf32> to vector<16x32xf32>
    %198 = arith.mulf %197, %4 : vector<16x32xf32>
    %199 = arith.addf %198, %7 : vector<16x32xf32>
    %cst_32 = arith.constant dense<0.000000e+00> : vector<16x32xf32>
    %200 = tpu.matmul %195, %1, %cst_32 {dimension_numbers = #tpu.dot_dimension_numbers<[1], [0], [0], [1], [0, 0, 1, 1], [], []>} : vector<16x8xf32>, vector<8x32xf32>, vector<16x32xf32> -> vector<16x32xf32>
    %201 = arith.addf %199, %200 : vector<16x32xf32>
    %202 = vector.extract_strided_slice %201 {offsets = [0, 0], sizes = [16, 8], strides = [1, 1]} : vector<16x32xf32> to vector<16x8xf32>
    %203 = arith.negf %202 : vector<16x8xf32>
    %204 = math.exp %203 : vector<16x8xf32>
    %cst_33 = arith.constant 1.000000e+00 : f32
    %205 = vector.broadcast %cst_33 : f32 to vector<16x8xf32>
    %206 = arith.addf %205, %204 : vector<16x8xf32>
    %207 = arith.divf %205, %206 : vector<16x8xf32>
    %208 = vector.extract_strided_slice %201 {offsets = [0, 8], sizes = [16, 8], strides = [1, 1]} : vector<16x32xf32> to vector<16x8xf32>
    %209 = arith.negf %208 : vector<16x8xf32>
    %210 = math.exp %209 : vector<16x8xf32>
    %cst_34 = arith.constant 1.000000e+00 : f32
    %211 = vector.broadcast %cst_34 : f32 to vector<16x8xf32>
    %212 = arith.addf %211, %210 : vector<16x8xf32>
    %213 = arith.divf %211, %212 : vector<16x8xf32>
    %214 = vector.extract_strided_slice %201 {offsets = [0, 16], sizes = [16, 8], strides = [1, 1]} : vector<16x32xf32> to vector<16x8xf32>
    %215 = math.tanh %214 : vector<16x8xf32>
    %216 = vector.extract_strided_slice %201 {offsets = [0, 24], sizes = [16, 8], strides = [1, 1]} : vector<16x32xf32> to vector<16x8xf32>
    %217 = arith.negf %216 : vector<16x8xf32>
    %218 = math.exp %217 : vector<16x8xf32>
    %cst_35 = arith.constant 1.000000e+00 : f32
    %219 = vector.broadcast %cst_35 : f32 to vector<16x8xf32>
    %220 = arith.addf %219, %218 : vector<16x8xf32>
    %221 = arith.divf %219, %220 : vector<16x8xf32>
    %222 = arith.mulf %213, %193 : vector<16x8xf32>
    %223 = arith.mulf %207, %215 : vector<16x8xf32>
    %224 = arith.addf %222, %223 : vector<16x8xf32>
    %225 = math.tanh %224 : vector<16x8xf32>
    %226 = arith.mulf %221, %225 : vector<16x8xf32>
    %227 = vector.extract_strided_slice %0 {offsets = [0, 7], sizes = [16, 1], strides = [1, 1]} : vector<16x16xf32> to vector<16x1xf32>
    %228 = vector.broadcast %227 : vector<16x1xf32> to vector<16x32xf32>
    %229 = arith.mulf %228, %4 : vector<16x32xf32>
    %230 = arith.addf %229, %7 : vector<16x32xf32>
    %cst_36 = arith.constant dense<0.000000e+00> : vector<16x32xf32>
    %231 = tpu.matmul %226, %1, %cst_36 {dimension_numbers = #tpu.dot_dimension_numbers<[1], [0], [0], [1], [0, 0, 1, 1], [], []>} : vector<16x8xf32>, vector<8x32xf32>, vector<16x32xf32> -> vector<16x32xf32>
    %232 = arith.addf %230, %231 : vector<16x32xf32>
    %233 = vector.extract_strided_slice %232 {offsets = [0, 0], sizes = [16, 8], strides = [1, 1]} : vector<16x32xf32> to vector<16x8xf32>
    %234 = arith.negf %233 : vector<16x8xf32>
    %235 = math.exp %234 : vector<16x8xf32>
    %cst_37 = arith.constant 1.000000e+00 : f32
    %236 = vector.broadcast %cst_37 : f32 to vector<16x8xf32>
    %237 = arith.addf %236, %235 : vector<16x8xf32>
    %238 = arith.divf %236, %237 : vector<16x8xf32>
    %239 = vector.extract_strided_slice %232 {offsets = [0, 8], sizes = [16, 8], strides = [1, 1]} : vector<16x32xf32> to vector<16x8xf32>
    %240 = arith.negf %239 : vector<16x8xf32>
    %241 = math.exp %240 : vector<16x8xf32>
    %cst_38 = arith.constant 1.000000e+00 : f32
    %242 = vector.broadcast %cst_38 : f32 to vector<16x8xf32>
    %243 = arith.addf %242, %241 : vector<16x8xf32>
    %244 = arith.divf %242, %243 : vector<16x8xf32>
    %245 = vector.extract_strided_slice %232 {offsets = [0, 16], sizes = [16, 8], strides = [1, 1]} : vector<16x32xf32> to vector<16x8xf32>
    %246 = math.tanh %245 : vector<16x8xf32>
    %247 = vector.extract_strided_slice %232 {offsets = [0, 24], sizes = [16, 8], strides = [1, 1]} : vector<16x32xf32> to vector<16x8xf32>
    %248 = arith.negf %247 : vector<16x8xf32>
    %249 = math.exp %248 : vector<16x8xf32>
    %cst_39 = arith.constant 1.000000e+00 : f32
    %250 = vector.broadcast %cst_39 : f32 to vector<16x8xf32>
    %251 = arith.addf %250, %249 : vector<16x8xf32>
    %252 = arith.divf %250, %251 : vector<16x8xf32>
    %253 = arith.mulf %244, %224 : vector<16x8xf32>
    %254 = arith.mulf %238, %246 : vector<16x8xf32>
    %255 = arith.addf %253, %254 : vector<16x8xf32>
    %256 = math.tanh %255 : vector<16x8xf32>
    %257 = arith.mulf %252, %256 : vector<16x8xf32>
    %258 = vector.extract_strided_slice %0 {offsets = [0, 8], sizes = [16, 1], strides = [1, 1]} : vector<16x16xf32> to vector<16x1xf32>
    %259 = vector.broadcast %258 : vector<16x1xf32> to vector<16x32xf32>
    %260 = arith.mulf %259, %4 : vector<16x32xf32>
    %261 = arith.addf %260, %7 : vector<16x32xf32>
    %cst_40 = arith.constant dense<0.000000e+00> : vector<16x32xf32>
    %262 = tpu.matmul %257, %1, %cst_40 {dimension_numbers = #tpu.dot_dimension_numbers<[1], [0], [0], [1], [0, 0, 1, 1], [], []>} : vector<16x8xf32>, vector<8x32xf32>, vector<16x32xf32> -> vector<16x32xf32>
    %263 = arith.addf %261, %262 : vector<16x32xf32>
    %264 = vector.extract_strided_slice %263 {offsets = [0, 0], sizes = [16, 8], strides = [1, 1]} : vector<16x32xf32> to vector<16x8xf32>
    %265 = arith.negf %264 : vector<16x8xf32>
    %266 = math.exp %265 : vector<16x8xf32>
    %cst_41 = arith.constant 1.000000e+00 : f32
    %267 = vector.broadcast %cst_41 : f32 to vector<16x8xf32>
    %268 = arith.addf %267, %266 : vector<16x8xf32>
    %269 = arith.divf %267, %268 : vector<16x8xf32>
    %270 = vector.extract_strided_slice %263 {offsets = [0, 8], sizes = [16, 8], strides = [1, 1]} : vector<16x32xf32> to vector<16x8xf32>
    %271 = arith.negf %270 : vector<16x8xf32>
    %272 = math.exp %271 : vector<16x8xf32>
    %cst_42 = arith.constant 1.000000e+00 : f32
    %273 = vector.broadcast %cst_42 : f32 to vector<16x8xf32>
    %274 = arith.addf %273, %272 : vector<16x8xf32>
    %275 = arith.divf %273, %274 : vector<16x8xf32>
    %276 = vector.extract_strided_slice %263 {offsets = [0, 16], sizes = [16, 8], strides = [1, 1]} : vector<16x32xf32> to vector<16x8xf32>
    %277 = math.tanh %276 : vector<16x8xf32>
    %278 = vector.extract_strided_slice %263 {offsets = [0, 24], sizes = [16, 8], strides = [1, 1]} : vector<16x32xf32> to vector<16x8xf32>
    %279 = arith.negf %278 : vector<16x8xf32>
    %280 = math.exp %279 : vector<16x8xf32>
    %cst_43 = arith.constant 1.000000e+00 : f32
    %281 = vector.broadcast %cst_43 : f32 to vector<16x8xf32>
    %282 = arith.addf %281, %280 : vector<16x8xf32>
    %283 = arith.divf %281, %282 : vector<16x8xf32>
    %284 = arith.mulf %275, %255 : vector<16x8xf32>
    %285 = arith.mulf %269, %277 : vector<16x8xf32>
    %286 = arith.addf %284, %285 : vector<16x8xf32>
    %287 = math.tanh %286 : vector<16x8xf32>
    %288 = arith.mulf %283, %287 : vector<16x8xf32>
    %289 = vector.extract_strided_slice %0 {offsets = [0, 9], sizes = [16, 1], strides = [1, 1]} : vector<16x16xf32> to vector<16x1xf32>
    %290 = vector.broadcast %289 : vector<16x1xf32> to vector<16x32xf32>
    %291 = arith.mulf %290, %4 : vector<16x32xf32>
    %292 = arith.addf %291, %7 : vector<16x32xf32>
    %cst_44 = arith.constant dense<0.000000e+00> : vector<16x32xf32>
    %293 = tpu.matmul %288, %1, %cst_44 {dimension_numbers = #tpu.dot_dimension_numbers<[1], [0], [0], [1], [0, 0, 1, 1], [], []>} : vector<16x8xf32>, vector<8x32xf32>, vector<16x32xf32> -> vector<16x32xf32>
    %294 = arith.addf %292, %293 : vector<16x32xf32>
    %295 = vector.extract_strided_slice %294 {offsets = [0, 0], sizes = [16, 8], strides = [1, 1]} : vector<16x32xf32> to vector<16x8xf32>
    %296 = arith.negf %295 : vector<16x8xf32>
    %297 = math.exp %296 : vector<16x8xf32>
    %cst_45 = arith.constant 1.000000e+00 : f32
    %298 = vector.broadcast %cst_45 : f32 to vector<16x8xf32>
    %299 = arith.addf %298, %297 : vector<16x8xf32>
    %300 = arith.divf %298, %299 : vector<16x8xf32>
    %301 = vector.extract_strided_slice %294 {offsets = [0, 8], sizes = [16, 8], strides = [1, 1]} : vector<16x32xf32> to vector<16x8xf32>
    %302 = arith.negf %301 : vector<16x8xf32>
    %303 = math.exp %302 : vector<16x8xf32>
    %cst_46 = arith.constant 1.000000e+00 : f32
    %304 = vector.broadcast %cst_46 : f32 to vector<16x8xf32>
    %305 = arith.addf %304, %303 : vector<16x8xf32>
    %306 = arith.divf %304, %305 : vector<16x8xf32>
    %307 = vector.extract_strided_slice %294 {offsets = [0, 16], sizes = [16, 8], strides = [1, 1]} : vector<16x32xf32> to vector<16x8xf32>
    %308 = math.tanh %307 : vector<16x8xf32>
    %309 = vector.extract_strided_slice %294 {offsets = [0, 24], sizes = [16, 8], strides = [1, 1]} : vector<16x32xf32> to vector<16x8xf32>
    %310 = arith.negf %309 : vector<16x8xf32>
    %311 = math.exp %310 : vector<16x8xf32>
    %cst_47 = arith.constant 1.000000e+00 : f32
    %312 = vector.broadcast %cst_47 : f32 to vector<16x8xf32>
    %313 = arith.addf %312, %311 : vector<16x8xf32>
    %314 = arith.divf %312, %313 : vector<16x8xf32>
    %315 = arith.mulf %306, %286 : vector<16x8xf32>
    %316 = arith.mulf %300, %308 : vector<16x8xf32>
    %317 = arith.addf %315, %316 : vector<16x8xf32>
    %318 = math.tanh %317 : vector<16x8xf32>
    %319 = arith.mulf %314, %318 : vector<16x8xf32>
    %320 = vector.extract_strided_slice %0 {offsets = [0, 10], sizes = [16, 1], strides = [1, 1]} : vector<16x16xf32> to vector<16x1xf32>
    %321 = vector.broadcast %320 : vector<16x1xf32> to vector<16x32xf32>
    %322 = arith.mulf %321, %4 : vector<16x32xf32>
    %323 = arith.addf %322, %7 : vector<16x32xf32>
    %cst_48 = arith.constant dense<0.000000e+00> : vector<16x32xf32>
    %324 = tpu.matmul %319, %1, %cst_48 {dimension_numbers = #tpu.dot_dimension_numbers<[1], [0], [0], [1], [0, 0, 1, 1], [], []>} : vector<16x8xf32>, vector<8x32xf32>, vector<16x32xf32> -> vector<16x32xf32>
    %325 = arith.addf %323, %324 : vector<16x32xf32>
    %326 = vector.extract_strided_slice %325 {offsets = [0, 0], sizes = [16, 8], strides = [1, 1]} : vector<16x32xf32> to vector<16x8xf32>
    %327 = arith.negf %326 : vector<16x8xf32>
    %328 = math.exp %327 : vector<16x8xf32>
    %cst_49 = arith.constant 1.000000e+00 : f32
    %329 = vector.broadcast %cst_49 : f32 to vector<16x8xf32>
    %330 = arith.addf %329, %328 : vector<16x8xf32>
    %331 = arith.divf %329, %330 : vector<16x8xf32>
    %332 = vector.extract_strided_slice %325 {offsets = [0, 8], sizes = [16, 8], strides = [1, 1]} : vector<16x32xf32> to vector<16x8xf32>
    %333 = arith.negf %332 : vector<16x8xf32>
    %334 = math.exp %333 : vector<16x8xf32>
    %cst_50 = arith.constant 1.000000e+00 : f32
    %335 = vector.broadcast %cst_50 : f32 to vector<16x8xf32>
    %336 = arith.addf %335, %334 : vector<16x8xf32>
    %337 = arith.divf %335, %336 : vector<16x8xf32>
    %338 = vector.extract_strided_slice %325 {offsets = [0, 16], sizes = [16, 8], strides = [1, 1]} : vector<16x32xf32> to vector<16x8xf32>
    %339 = math.tanh %338 : vector<16x8xf32>
    %340 = vector.extract_strided_slice %325 {offsets = [0, 24], sizes = [16, 8], strides = [1, 1]} : vector<16x32xf32> to vector<16x8xf32>
    %341 = arith.negf %340 : vector<16x8xf32>
    %342 = math.exp %341 : vector<16x8xf32>
    %cst_51 = arith.constant 1.000000e+00 : f32
    %343 = vector.broadcast %cst_51 : f32 to vector<16x8xf32>
    %344 = arith.addf %343, %342 : vector<16x8xf32>
    %345 = arith.divf %343, %344 : vector<16x8xf32>
    %346 = arith.mulf %337, %317 : vector<16x8xf32>
    %347 = arith.mulf %331, %339 : vector<16x8xf32>
    %348 = arith.addf %346, %347 : vector<16x8xf32>
    %349 = math.tanh %348 : vector<16x8xf32>
    %350 = arith.mulf %345, %349 : vector<16x8xf32>
    %351 = vector.extract_strided_slice %0 {offsets = [0, 11], sizes = [16, 1], strides = [1, 1]} : vector<16x16xf32> to vector<16x1xf32>
    %352 = vector.broadcast %351 : vector<16x1xf32> to vector<16x32xf32>
    %353 = arith.mulf %352, %4 : vector<16x32xf32>
    %354 = arith.addf %353, %7 : vector<16x32xf32>
    %cst_52 = arith.constant dense<0.000000e+00> : vector<16x32xf32>
    %355 = tpu.matmul %350, %1, %cst_52 {dimension_numbers = #tpu.dot_dimension_numbers<[1], [0], [0], [1], [0, 0, 1, 1], [], []>} : vector<16x8xf32>, vector<8x32xf32>, vector<16x32xf32> -> vector<16x32xf32>
    %356 = arith.addf %354, %355 : vector<16x32xf32>
    %357 = vector.extract_strided_slice %356 {offsets = [0, 0], sizes = [16, 8], strides = [1, 1]} : vector<16x32xf32> to vector<16x8xf32>
    %358 = arith.negf %357 : vector<16x8xf32>
    %359 = math.exp %358 : vector<16x8xf32>
    %cst_53 = arith.constant 1.000000e+00 : f32
    %360 = vector.broadcast %cst_53 : f32 to vector<16x8xf32>
    %361 = arith.addf %360, %359 : vector<16x8xf32>
    %362 = arith.divf %360, %361 : vector<16x8xf32>
    %363 = vector.extract_strided_slice %356 {offsets = [0, 8], sizes = [16, 8], strides = [1, 1]} : vector<16x32xf32> to vector<16x8xf32>
    %364 = arith.negf %363 : vector<16x8xf32>
    %365 = math.exp %364 : vector<16x8xf32>
    %cst_54 = arith.constant 1.000000e+00 : f32
    %366 = vector.broadcast %cst_54 : f32 to vector<16x8xf32>
    %367 = arith.addf %366, %365 : vector<16x8xf32>
    %368 = arith.divf %366, %367 : vector<16x8xf32>
    %369 = vector.extract_strided_slice %356 {offsets = [0, 16], sizes = [16, 8], strides = [1, 1]} : vector<16x32xf32> to vector<16x8xf32>
    %370 = math.tanh %369 : vector<16x8xf32>
    %371 = vector.extract_strided_slice %356 {offsets = [0, 24], sizes = [16, 8], strides = [1, 1]} : vector<16x32xf32> to vector<16x8xf32>
    %372 = arith.negf %371 : vector<16x8xf32>
    %373 = math.exp %372 : vector<16x8xf32>
    %cst_55 = arith.constant 1.000000e+00 : f32
    %374 = vector.broadcast %cst_55 : f32 to vector<16x8xf32>
    %375 = arith.addf %374, %373 : vector<16x8xf32>
    %376 = arith.divf %374, %375 : vector<16x8xf32>
    %377 = arith.mulf %368, %348 : vector<16x8xf32>
    %378 = arith.mulf %362, %370 : vector<16x8xf32>
    %379 = arith.addf %377, %378 : vector<16x8xf32>
    %380 = math.tanh %379 : vector<16x8xf32>
    %381 = arith.mulf %376, %380 : vector<16x8xf32>
    %382 = vector.extract_strided_slice %0 {offsets = [0, 12], sizes = [16, 1], strides = [1, 1]} : vector<16x16xf32> to vector<16x1xf32>
    %383 = vector.broadcast %382 : vector<16x1xf32> to vector<16x32xf32>
    %384 = arith.mulf %383, %4 : vector<16x32xf32>
    %385 = arith.addf %384, %7 : vector<16x32xf32>
    %cst_56 = arith.constant dense<0.000000e+00> : vector<16x32xf32>
    %386 = tpu.matmul %381, %1, %cst_56 {dimension_numbers = #tpu.dot_dimension_numbers<[1], [0], [0], [1], [0, 0, 1, 1], [], []>} : vector<16x8xf32>, vector<8x32xf32>, vector<16x32xf32> -> vector<16x32xf32>
    %387 = arith.addf %385, %386 : vector<16x32xf32>
    %388 = vector.extract_strided_slice %387 {offsets = [0, 0], sizes = [16, 8], strides = [1, 1]} : vector<16x32xf32> to vector<16x8xf32>
    %389 = arith.negf %388 : vector<16x8xf32>
    %390 = math.exp %389 : vector<16x8xf32>
    %cst_57 = arith.constant 1.000000e+00 : f32
    %391 = vector.broadcast %cst_57 : f32 to vector<16x8xf32>
    %392 = arith.addf %391, %390 : vector<16x8xf32>
    %393 = arith.divf %391, %392 : vector<16x8xf32>
    %394 = vector.extract_strided_slice %387 {offsets = [0, 8], sizes = [16, 8], strides = [1, 1]} : vector<16x32xf32> to vector<16x8xf32>
    %395 = arith.negf %394 : vector<16x8xf32>
    %396 = math.exp %395 : vector<16x8xf32>
    %cst_58 = arith.constant 1.000000e+00 : f32
    %397 = vector.broadcast %cst_58 : f32 to vector<16x8xf32>
    %398 = arith.addf %397, %396 : vector<16x8xf32>
    %399 = arith.divf %397, %398 : vector<16x8xf32>
    %400 = vector.extract_strided_slice %387 {offsets = [0, 16], sizes = [16, 8], strides = [1, 1]} : vector<16x32xf32> to vector<16x8xf32>
    %401 = math.tanh %400 : vector<16x8xf32>
    %402 = vector.extract_strided_slice %387 {offsets = [0, 24], sizes = [16, 8], strides = [1, 1]} : vector<16x32xf32> to vector<16x8xf32>
    %403 = arith.negf %402 : vector<16x8xf32>
    %404 = math.exp %403 : vector<16x8xf32>
    %cst_59 = arith.constant 1.000000e+00 : f32
    %405 = vector.broadcast %cst_59 : f32 to vector<16x8xf32>
    %406 = arith.addf %405, %404 : vector<16x8xf32>
    %407 = arith.divf %405, %406 : vector<16x8xf32>
    %408 = arith.mulf %399, %379 : vector<16x8xf32>
    %409 = arith.mulf %393, %401 : vector<16x8xf32>
    %410 = arith.addf %408, %409 : vector<16x8xf32>
    %411 = math.tanh %410 : vector<16x8xf32>
    %412 = arith.mulf %407, %411 : vector<16x8xf32>
    %413 = vector.extract_strided_slice %0 {offsets = [0, 13], sizes = [16, 1], strides = [1, 1]} : vector<16x16xf32> to vector<16x1xf32>
    %414 = vector.broadcast %413 : vector<16x1xf32> to vector<16x32xf32>
    %415 = arith.mulf %414, %4 : vector<16x32xf32>
    %416 = arith.addf %415, %7 : vector<16x32xf32>
    %cst_60 = arith.constant dense<0.000000e+00> : vector<16x32xf32>
    %417 = tpu.matmul %412, %1, %cst_60 {dimension_numbers = #tpu.dot_dimension_numbers<[1], [0], [0], [1], [0, 0, 1, 1], [], []>} : vector<16x8xf32>, vector<8x32xf32>, vector<16x32xf32> -> vector<16x32xf32>
    %418 = arith.addf %416, %417 : vector<16x32xf32>
    %419 = vector.extract_strided_slice %418 {offsets = [0, 0], sizes = [16, 8], strides = [1, 1]} : vector<16x32xf32> to vector<16x8xf32>
    %420 = arith.negf %419 : vector<16x8xf32>
    %421 = math.exp %420 : vector<16x8xf32>
    %cst_61 = arith.constant 1.000000e+00 : f32
    %422 = vector.broadcast %cst_61 : f32 to vector<16x8xf32>
    %423 = arith.addf %422, %421 : vector<16x8xf32>
    %424 = arith.divf %422, %423 : vector<16x8xf32>
    %425 = vector.extract_strided_slice %418 {offsets = [0, 8], sizes = [16, 8], strides = [1, 1]} : vector<16x32xf32> to vector<16x8xf32>
    %426 = arith.negf %425 : vector<16x8xf32>
    %427 = math.exp %426 : vector<16x8xf32>
    %cst_62 = arith.constant 1.000000e+00 : f32
    %428 = vector.broadcast %cst_62 : f32 to vector<16x8xf32>
    %429 = arith.addf %428, %427 : vector<16x8xf32>
    %430 = arith.divf %428, %429 : vector<16x8xf32>
    %431 = vector.extract_strided_slice %418 {offsets = [0, 16], sizes = [16, 8], strides = [1, 1]} : vector<16x32xf32> to vector<16x8xf32>
    %432 = math.tanh %431 : vector<16x8xf32>
    %433 = vector.extract_strided_slice %418 {offsets = [0, 24], sizes = [16, 8], strides = [1, 1]} : vector<16x32xf32> to vector<16x8xf32>
    %434 = arith.negf %433 : vector<16x8xf32>
    %435 = math.exp %434 : vector<16x8xf32>
    %cst_63 = arith.constant 1.000000e+00 : f32
    %436 = vector.broadcast %cst_63 : f32 to vector<16x8xf32>
    %437 = arith.addf %436, %435 : vector<16x8xf32>
    %438 = arith.divf %436, %437 : vector<16x8xf32>
    %439 = arith.mulf %430, %410 : vector<16x8xf32>
    %440 = arith.mulf %424, %432 : vector<16x8xf32>
    %441 = arith.addf %439, %440 : vector<16x8xf32>
    %442 = math.tanh %441 : vector<16x8xf32>
    %443 = arith.mulf %438, %442 : vector<16x8xf32>
    %444 = vector.extract_strided_slice %0 {offsets = [0, 14], sizes = [16, 1], strides = [1, 1]} : vector<16x16xf32> to vector<16x1xf32>
    %445 = vector.broadcast %444 : vector<16x1xf32> to vector<16x32xf32>
    %446 = arith.mulf %445, %4 : vector<16x32xf32>
    %447 = arith.addf %446, %7 : vector<16x32xf32>
    %cst_64 = arith.constant dense<0.000000e+00> : vector<16x32xf32>
    %448 = tpu.matmul %443, %1, %cst_64 {dimension_numbers = #tpu.dot_dimension_numbers<[1], [0], [0], [1], [0, 0, 1, 1], [], []>} : vector<16x8xf32>, vector<8x32xf32>, vector<16x32xf32> -> vector<16x32xf32>
    %449 = arith.addf %447, %448 : vector<16x32xf32>
    %450 = vector.extract_strided_slice %449 {offsets = [0, 0], sizes = [16, 8], strides = [1, 1]} : vector<16x32xf32> to vector<16x8xf32>
    %451 = arith.negf %450 : vector<16x8xf32>
    %452 = math.exp %451 : vector<16x8xf32>
    %cst_65 = arith.constant 1.000000e+00 : f32
    %453 = vector.broadcast %cst_65 : f32 to vector<16x8xf32>
    %454 = arith.addf %453, %452 : vector<16x8xf32>
    %455 = arith.divf %453, %454 : vector<16x8xf32>
    %456 = vector.extract_strided_slice %449 {offsets = [0, 8], sizes = [16, 8], strides = [1, 1]} : vector<16x32xf32> to vector<16x8xf32>
    %457 = arith.negf %456 : vector<16x8xf32>
    %458 = math.exp %457 : vector<16x8xf32>
    %cst_66 = arith.constant 1.000000e+00 : f32
    %459 = vector.broadcast %cst_66 : f32 to vector<16x8xf32>
    %460 = arith.addf %459, %458 : vector<16x8xf32>
    %461 = arith.divf %459, %460 : vector<16x8xf32>
    %462 = vector.extract_strided_slice %449 {offsets = [0, 16], sizes = [16, 8], strides = [1, 1]} : vector<16x32xf32> to vector<16x8xf32>
    %463 = math.tanh %462 : vector<16x8xf32>
    %464 = vector.extract_strided_slice %449 {offsets = [0, 24], sizes = [16, 8], strides = [1, 1]} : vector<16x32xf32> to vector<16x8xf32>
    %465 = arith.negf %464 : vector<16x8xf32>
    %466 = math.exp %465 : vector<16x8xf32>
    %cst_67 = arith.constant 1.000000e+00 : f32
    %467 = vector.broadcast %cst_67 : f32 to vector<16x8xf32>
    %468 = arith.addf %467, %466 : vector<16x8xf32>
    %469 = arith.divf %467, %468 : vector<16x8xf32>
    %470 = arith.mulf %461, %441 : vector<16x8xf32>
    %471 = arith.mulf %455, %463 : vector<16x8xf32>
    %472 = arith.addf %470, %471 : vector<16x8xf32>
    %473 = math.tanh %472 : vector<16x8xf32>
    %474 = arith.mulf %469, %473 : vector<16x8xf32>
    %475 = vector.extract_strided_slice %0 {offsets = [0, 15], sizes = [16, 1], strides = [1, 1]} : vector<16x16xf32> to vector<16x1xf32>
    %476 = vector.broadcast %475 : vector<16x1xf32> to vector<16x32xf32>
    %477 = arith.mulf %476, %4 : vector<16x32xf32>
    %478 = arith.addf %477, %7 : vector<16x32xf32>
    %cst_68 = arith.constant dense<0.000000e+00> : vector<16x32xf32>
    %479 = tpu.matmul %474, %1, %cst_68 {dimension_numbers = #tpu.dot_dimension_numbers<[1], [0], [0], [1], [0, 0, 1, 1], [], []>} : vector<16x8xf32>, vector<8x32xf32>, vector<16x32xf32> -> vector<16x32xf32>
    %480 = arith.addf %478, %479 : vector<16x32xf32>
    %481 = vector.extract_strided_slice %480 {offsets = [0, 0], sizes = [16, 8], strides = [1, 1]} : vector<16x32xf32> to vector<16x8xf32>
    %482 = arith.negf %481 : vector<16x8xf32>
    %483 = math.exp %482 : vector<16x8xf32>
    %cst_69 = arith.constant 1.000000e+00 : f32
    %484 = vector.broadcast %cst_69 : f32 to vector<16x8xf32>
    %485 = arith.addf %484, %483 : vector<16x8xf32>
    %486 = arith.divf %484, %485 : vector<16x8xf32>
    %487 = vector.extract_strided_slice %480 {offsets = [0, 8], sizes = [16, 8], strides = [1, 1]} : vector<16x32xf32> to vector<16x8xf32>
    %488 = arith.negf %487 : vector<16x8xf32>
    %489 = math.exp %488 : vector<16x8xf32>
    %cst_70 = arith.constant 1.000000e+00 : f32
    %490 = vector.broadcast %cst_70 : f32 to vector<16x8xf32>
    %491 = arith.addf %490, %489 : vector<16x8xf32>
    %492 = arith.divf %490, %491 : vector<16x8xf32>
    %493 = vector.extract_strided_slice %480 {offsets = [0, 16], sizes = [16, 8], strides = [1, 1]} : vector<16x32xf32> to vector<16x8xf32>
    %494 = math.tanh %493 : vector<16x8xf32>
    %495 = vector.extract_strided_slice %480 {offsets = [0, 24], sizes = [16, 8], strides = [1, 1]} : vector<16x32xf32> to vector<16x8xf32>
    %496 = arith.negf %495 : vector<16x8xf32>
    %497 = math.exp %496 : vector<16x8xf32>
    %cst_71 = arith.constant 1.000000e+00 : f32
    %498 = vector.broadcast %cst_71 : f32 to vector<16x8xf32>
    %499 = arith.addf %498, %497 : vector<16x8xf32>
    %500 = arith.divf %498, %499 : vector<16x8xf32>
    %501 = arith.mulf %492, %472 : vector<16x8xf32>
    %502 = arith.mulf %486, %494 : vector<16x8xf32>
    %503 = arith.addf %501, %502 : vector<16x8xf32>
    %504 = math.tanh %503 : vector<16x8xf32>
    %505 = arith.mulf %500, %504 : vector<16x8xf32>
    %506 = arith.truncf %505 : vector<16x8xf32> to vector<16x8xbf16>
    %c0_72 = arith.constant 0 : index
    %c0_73 = arith.constant 0 : index
    %507 = vector.load %arg4[%c0_72, %c0_73] : memref<8x512xbf16, #tpu.memory_space<vmem>>, vector<8x512xbf16>
    %cst_74 = arith.constant dense<0.000000e+00> : vector<16x512xf32>
    %508 = tpu.matmul %506, %507, %cst_74 {dimension_numbers = #tpu.dot_dimension_numbers<[1], [0], [0], [1], [0, 0, 1, 1], [], []>} : vector<16x8xbf16>, vector<8x512xbf16>, vector<16x512xf32> -> vector<16x512xf32>
    %c0_75 = arith.constant 0 : index
    %c0_76 = arith.constant 0 : index
    %509 = vector.load %arg6[%c0_75, %c0_76] : memref<1x512xf32, #tpu.memory_space<vmem>>, vector<1x512xf32>
    %510 = vector.broadcast %509 : vector<1x512xf32> to vector<16x512xf32>
    %511 = arith.addf %508, %510 : vector<16x512xf32>
    %cst_77 = arith.constant 0.000000e+00 : f32
    %512 = vector.broadcast %cst_77 : f32 to vector<2x128xf32>
    %cst_78 = arith.constant 0.000000e+00 : f32
    %513 = vector.broadcast %cst_78 : f32 to vector<2x128xf32>
    %514 = vector.extract_strided_slice %511 {offsets = [0, 0], sizes = [2, 512], strides = [1, 1]} : vector<16x512xf32> to vector<2x512xf32>
    %515 = arith.truncf %512 : vector<2x128xf32> to vector<2x128xbf16>
    %c0_79 = arith.constant 0 : index
    %c0_80 = arith.constant 0 : index
    %516 = vector.load %arg5[%c0_79, %c0_80] : memref<128x512xbf16, #tpu.memory_space<vmem>>, vector<128x512xbf16>
    %cst_81 = arith.constant dense<0.000000e+00> : vector<2x512xf32>
    %517 = tpu.matmul %515, %516, %cst_81 {dimension_numbers = #tpu.dot_dimension_numbers<[1], [0], [0], [1], [0, 0, 1, 1], [], []>} : vector<2x128xbf16>, vector<128x512xbf16>, vector<2x512xf32> -> vector<2x512xf32>
    %518 = arith.addf %514, %517 : vector<2x512xf32>
    %519 = vector.extract_strided_slice %518 {offsets = [0, 0], sizes = [2, 128], strides = [1, 1]} : vector<2x512xf32> to vector<2x128xf32>
    %520 = arith.negf %519 : vector<2x128xf32>
    %521 = math.exp %520 : vector<2x128xf32>
    %cst_82 = arith.constant 1.000000e+00 : f32
    %522 = vector.broadcast %cst_82 : f32 to vector<2x128xf32>
    %523 = arith.addf %522, %521 : vector<2x128xf32>
    %524 = arith.divf %522, %523 : vector<2x128xf32>
    %525 = vector.extract_strided_slice %518 {offsets = [0, 128], sizes = [2, 128], strides = [1, 1]} : vector<2x512xf32> to vector<2x128xf32>
    %526 = arith.negf %525 : vector<2x128xf32>
    %527 = math.exp %526 : vector<2x128xf32>
    %cst_83 = arith.constant 1.000000e+00 : f32
    %528 = vector.broadcast %cst_83 : f32 to vector<2x128xf32>
    %529 = arith.addf %528, %527 : vector<2x128xf32>
    %530 = arith.divf %528, %529 : vector<2x128xf32>
    %531 = vector.extract_strided_slice %518 {offsets = [0, 256], sizes = [2, 128], strides = [1, 1]} : vector<2x512xf32> to vector<2x128xf32>
    %532 = math.tanh %531 : vector<2x128xf32>
    %533 = vector.extract_strided_slice %518 {offsets = [0, 384], sizes = [2, 128], strides = [1, 1]} : vector<2x512xf32> to vector<2x128xf32>
    %534 = arith.negf %533 : vector<2x128xf32>
    %535 = math.exp %534 : vector<2x128xf32>
    %cst_84 = arith.constant 1.000000e+00 : f32
    %536 = vector.broadcast %cst_84 : f32 to vector<2x128xf32>
    %537 = arith.addf %536, %535 : vector<2x128xf32>
    %538 = arith.divf %536, %537 : vector<2x128xf32>
    %539 = arith.mulf %530, %513 : vector<2x128xf32>
    %540 = arith.mulf %524, %532 : vector<2x128xf32>
    %541 = arith.addf %539, %540 : vector<2x128xf32>
    %542 = math.tanh %541 : vector<2x128xf32>
    %543 = arith.mulf %538, %542 : vector<2x128xf32>
    %544 = vector.extract_strided_slice %511 {offsets = [2, 0], sizes = [2, 512], strides = [1, 1]} : vector<16x512xf32> to vector<2x512xf32>
    %545 = arith.truncf %543 : vector<2x128xf32> to vector<2x128xbf16>
    %c0_85 = arith.constant 0 : index
    %c0_86 = arith.constant 0 : index
    %546 = vector.load %arg5[%c0_85, %c0_86] : memref<128x512xbf16, #tpu.memory_space<vmem>>, vector<128x512xbf16>
    %cst_87 = arith.constant dense<0.000000e+00> : vector<2x512xf32>
    %547 = tpu.matmul %545, %546, %cst_87 {dimension_numbers = #tpu.dot_dimension_numbers<[1], [0], [0], [1], [0, 0, 1, 1], [], []>} : vector<2x128xbf16>, vector<128x512xbf16>, vector<2x512xf32> -> vector<2x512xf32>
    %548 = arith.addf %544, %547 : vector<2x512xf32>
    %549 = vector.extract_strided_slice %548 {offsets = [0, 0], sizes = [2, 128], strides = [1, 1]} : vector<2x512xf32> to vector<2x128xf32>
    %550 = arith.negf %549 : vector<2x128xf32>
    %551 = math.exp %550 : vector<2x128xf32>
    %cst_88 = arith.constant 1.000000e+00 : f32
    %552 = vector.broadcast %cst_88 : f32 to vector<2x128xf32>
    %553 = arith.addf %552, %551 : vector<2x128xf32>
    %554 = arith.divf %552, %553 : vector<2x128xf32>
    %555 = vector.extract_strided_slice %548 {offsets = [0, 128], sizes = [2, 128], strides = [1, 1]} : vector<2x512xf32> to vector<2x128xf32>
    %556 = arith.negf %555 : vector<2x128xf32>
    %557 = math.exp %556 : vector<2x128xf32>
    %cst_89 = arith.constant 1.000000e+00 : f32
    %558 = vector.broadcast %cst_89 : f32 to vector<2x128xf32>
    %559 = arith.addf %558, %557 : vector<2x128xf32>
    %560 = arith.divf %558, %559 : vector<2x128xf32>
    %561 = vector.extract_strided_slice %548 {offsets = [0, 256], sizes = [2, 128], strides = [1, 1]} : vector<2x512xf32> to vector<2x128xf32>
    %562 = math.tanh %561 : vector<2x128xf32>
    %563 = vector.extract_strided_slice %548 {offsets = [0, 384], sizes = [2, 128], strides = [1, 1]} : vector<2x512xf32> to vector<2x128xf32>
    %564 = arith.negf %563 : vector<2x128xf32>
    %565 = math.exp %564 : vector<2x128xf32>
    %cst_90 = arith.constant 1.000000e+00 : f32
    %566 = vector.broadcast %cst_90 : f32 to vector<2x128xf32>
    %567 = arith.addf %566, %565 : vector<2x128xf32>
    %568 = arith.divf %566, %567 : vector<2x128xf32>
    %569 = arith.mulf %560, %541 : vector<2x128xf32>
    %570 = arith.mulf %554, %562 : vector<2x128xf32>
    %571 = arith.addf %569, %570 : vector<2x128xf32>
    %572 = math.tanh %571 : vector<2x128xf32>
    %573 = arith.mulf %568, %572 : vector<2x128xf32>
    %574 = vector.extract_strided_slice %511 {offsets = [4, 0], sizes = [2, 512], strides = [1, 1]} : vector<16x512xf32> to vector<2x512xf32>
    %575 = arith.truncf %573 : vector<2x128xf32> to vector<2x128xbf16>
    %c0_91 = arith.constant 0 : index
    %c0_92 = arith.constant 0 : index
    %576 = vector.load %arg5[%c0_91, %c0_92] : memref<128x512xbf16, #tpu.memory_space<vmem>>, vector<128x512xbf16>
    %cst_93 = arith.constant dense<0.000000e+00> : vector<2x512xf32>
    %577 = tpu.matmul %575, %576, %cst_93 {dimension_numbers = #tpu.dot_dimension_numbers<[1], [0], [0], [1], [0, 0, 1, 1], [], []>} : vector<2x128xbf16>, vector<128x512xbf16>, vector<2x512xf32> -> vector<2x512xf32>
    %578 = arith.addf %574, %577 : vector<2x512xf32>
    %579 = vector.extract_strided_slice %578 {offsets = [0, 0], sizes = [2, 128], strides = [1, 1]} : vector<2x512xf32> to vector<2x128xf32>
    %580 = arith.negf %579 : vector<2x128xf32>
    %581 = math.exp %580 : vector<2x128xf32>
    %cst_94 = arith.constant 1.000000e+00 : f32
    %582 = vector.broadcast %cst_94 : f32 to vector<2x128xf32>
    %583 = arith.addf %582, %581 : vector<2x128xf32>
    %584 = arith.divf %582, %583 : vector<2x128xf32>
    %585 = vector.extract_strided_slice %578 {offsets = [0, 128], sizes = [2, 128], strides = [1, 1]} : vector<2x512xf32> to vector<2x128xf32>
    %586 = arith.negf %585 : vector<2x128xf32>
    %587 = math.exp %586 : vector<2x128xf32>
    %cst_95 = arith.constant 1.000000e+00 : f32
    %588 = vector.broadcast %cst_95 : f32 to vector<2x128xf32>
    %589 = arith.addf %588, %587 : vector<2x128xf32>
    %590 = arith.divf %588, %589 : vector<2x128xf32>
    %591 = vector.extract_strided_slice %578 {offsets = [0, 256], sizes = [2, 128], strides = [1, 1]} : vector<2x512xf32> to vector<2x128xf32>
    %592 = math.tanh %591 : vector<2x128xf32>
    %593 = vector.extract_strided_slice %578 {offsets = [0, 384], sizes = [2, 128], strides = [1, 1]} : vector<2x512xf32> to vector<2x128xf32>
    %594 = arith.negf %593 : vector<2x128xf32>
    %595 = math.exp %594 : vector<2x128xf32>
    %cst_96 = arith.constant 1.000000e+00 : f32
    %596 = vector.broadcast %cst_96 : f32 to vector<2x128xf32>
    %597 = arith.addf %596, %595 : vector<2x128xf32>
    %598 = arith.divf %596, %597 : vector<2x128xf32>
    %599 = arith.mulf %590, %571 : vector<2x128xf32>
    %600 = arith.mulf %584, %592 : vector<2x128xf32>
    %601 = arith.addf %599, %600 : vector<2x128xf32>
    %602 = math.tanh %601 : vector<2x128xf32>
    %603 = arith.mulf %598, %602 : vector<2x128xf32>
    %604 = vector.extract_strided_slice %511 {offsets = [6, 0], sizes = [2, 512], strides = [1, 1]} : vector<16x512xf32> to vector<2x512xf32>
    %605 = arith.truncf %603 : vector<2x128xf32> to vector<2x128xbf16>
    %c0_97 = arith.constant 0 : index
    %c0_98 = arith.constant 0 : index
    %606 = vector.load %arg5[%c0_97, %c0_98] : memref<128x512xbf16, #tpu.memory_space<vmem>>, vector<128x512xbf16>
    %cst_99 = arith.constant dense<0.000000e+00> : vector<2x512xf32>
    %607 = tpu.matmul %605, %606, %cst_99 {dimension_numbers = #tpu.dot_dimension_numbers<[1], [0], [0], [1], [0, 0, 1, 1], [], []>} : vector<2x128xbf16>, vector<128x512xbf16>, vector<2x512xf32> -> vector<2x512xf32>
    %608 = arith.addf %604, %607 : vector<2x512xf32>
    %609 = vector.extract_strided_slice %608 {offsets = [0, 0], sizes = [2, 128], strides = [1, 1]} : vector<2x512xf32> to vector<2x128xf32>
    %610 = arith.negf %609 : vector<2x128xf32>
    %611 = math.exp %610 : vector<2x128xf32>
    %cst_100 = arith.constant 1.000000e+00 : f32
    %612 = vector.broadcast %cst_100 : f32 to vector<2x128xf32>
    %613 = arith.addf %612, %611 : vector<2x128xf32>
    %614 = arith.divf %612, %613 : vector<2x128xf32>
    %615 = vector.extract_strided_slice %608 {offsets = [0, 128], sizes = [2, 128], strides = [1, 1]} : vector<2x512xf32> to vector<2x128xf32>
    %616 = arith.negf %615 : vector<2x128xf32>
    %617 = math.exp %616 : vector<2x128xf32>
    %cst_101 = arith.constant 1.000000e+00 : f32
    %618 = vector.broadcast %cst_101 : f32 to vector<2x128xf32>
    %619 = arith.addf %618, %617 : vector<2x128xf32>
    %620 = arith.divf %618, %619 : vector<2x128xf32>
    %621 = vector.extract_strided_slice %608 {offsets = [0, 256], sizes = [2, 128], strides = [1, 1]} : vector<2x512xf32> to vector<2x128xf32>
    %622 = math.tanh %621 : vector<2x128xf32>
    %623 = vector.extract_strided_slice %608 {offsets = [0, 384], sizes = [2, 128], strides = [1, 1]} : vector<2x512xf32> to vector<2x128xf32>
    %624 = arith.negf %623 : vector<2x128xf32>
    %625 = math.exp %624 : vector<2x128xf32>
    %cst_102 = arith.constant 1.000000e+00 : f32
    %626 = vector.broadcast %cst_102 : f32 to vector<2x128xf32>
    %627 = arith.addf %626, %625 : vector<2x128xf32>
    %628 = arith.divf %626, %627 : vector<2x128xf32>
    %629 = arith.mulf %620, %601 : vector<2x128xf32>
    %630 = arith.mulf %614, %622 : vector<2x128xf32>
    %631 = arith.addf %629, %630 : vector<2x128xf32>
    %632 = math.tanh %631 : vector<2x128xf32>
    %633 = arith.mulf %628, %632 : vector<2x128xf32>
    %634 = vector.extract_strided_slice %511 {offsets = [8, 0], sizes = [2, 512], strides = [1, 1]} : vector<16x512xf32> to vector<2x512xf32>
    %635 = arith.truncf %633 : vector<2x128xf32> to vector<2x128xbf16>
    %c0_103 = arith.constant 0 : index
    %c0_104 = arith.constant 0 : index
    %636 = vector.load %arg5[%c0_103, %c0_104] : memref<128x512xbf16, #tpu.memory_space<vmem>>, vector<128x512xbf16>
    %cst_105 = arith.constant dense<0.000000e+00> : vector<2x512xf32>
    %637 = tpu.matmul %635, %636, %cst_105 {dimension_numbers = #tpu.dot_dimension_numbers<[1], [0], [0], [1], [0, 0, 1, 1], [], []>} : vector<2x128xbf16>, vector<128x512xbf16>, vector<2x512xf32> -> vector<2x512xf32>
    %638 = arith.addf %634, %637 : vector<2x512xf32>
    %639 = vector.extract_strided_slice %638 {offsets = [0, 0], sizes = [2, 128], strides = [1, 1]} : vector<2x512xf32> to vector<2x128xf32>
    %640 = arith.negf %639 : vector<2x128xf32>
    %641 = math.exp %640 : vector<2x128xf32>
    %cst_106 = arith.constant 1.000000e+00 : f32
    %642 = vector.broadcast %cst_106 : f32 to vector<2x128xf32>
    %643 = arith.addf %642, %641 : vector<2x128xf32>
    %644 = arith.divf %642, %643 : vector<2x128xf32>
    %645 = vector.extract_strided_slice %638 {offsets = [0, 128], sizes = [2, 128], strides = [1, 1]} : vector<2x512xf32> to vector<2x128xf32>
    %646 = arith.negf %645 : vector<2x128xf32>
    %647 = math.exp %646 : vector<2x128xf32>
    %cst_107 = arith.constant 1.000000e+00 : f32
    %648 = vector.broadcast %cst_107 : f32 to vector<2x128xf32>
    %649 = arith.addf %648, %647 : vector<2x128xf32>
    %650 = arith.divf %648, %649 : vector<2x128xf32>
    %651 = vector.extract_strided_slice %638 {offsets = [0, 256], sizes = [2, 128], strides = [1, 1]} : vector<2x512xf32> to vector<2x128xf32>
    %652 = math.tanh %651 : vector<2x128xf32>
    %653 = vector.extract_strided_slice %638 {offsets = [0, 384], sizes = [2, 128], strides = [1, 1]} : vector<2x512xf32> to vector<2x128xf32>
    %654 = arith.negf %653 : vector<2x128xf32>
    %655 = math.exp %654 : vector<2x128xf32>
    %cst_108 = arith.constant 1.000000e+00 : f32
    %656 = vector.broadcast %cst_108 : f32 to vector<2x128xf32>
    %657 = arith.addf %656, %655 : vector<2x128xf32>
    %658 = arith.divf %656, %657 : vector<2x128xf32>
    %659 = arith.mulf %650, %631 : vector<2x128xf32>
    %660 = arith.mulf %644, %652 : vector<2x128xf32>
    %661 = arith.addf %659, %660 : vector<2x128xf32>
    %662 = math.tanh %661 : vector<2x128xf32>
    %663 = arith.mulf %658, %662 : vector<2x128xf32>
    %664 = vector.extract_strided_slice %511 {offsets = [10, 0], sizes = [2, 512], strides = [1, 1]} : vector<16x512xf32> to vector<2x512xf32>
    %665 = arith.truncf %663 : vector<2x128xf32> to vector<2x128xbf16>
    %c0_109 = arith.constant 0 : index
    %c0_110 = arith.constant 0 : index
    %666 = vector.load %arg5[%c0_109, %c0_110] : memref<128x512xbf16, #tpu.memory_space<vmem>>, vector<128x512xbf16>
    %cst_111 = arith.constant dense<0.000000e+00> : vector<2x512xf32>
    %667 = tpu.matmul %665, %666, %cst_111 {dimension_numbers = #tpu.dot_dimension_numbers<[1], [0], [0], [1], [0, 0, 1, 1], [], []>} : vector<2x128xbf16>, vector<128x512xbf16>, vector<2x512xf32> -> vector<2x512xf32>
    %668 = arith.addf %664, %667 : vector<2x512xf32>
    %669 = vector.extract_strided_slice %668 {offsets = [0, 0], sizes = [2, 128], strides = [1, 1]} : vector<2x512xf32> to vector<2x128xf32>
    %670 = arith.negf %669 : vector<2x128xf32>
    %671 = math.exp %670 : vector<2x128xf32>
    %cst_112 = arith.constant 1.000000e+00 : f32
    %672 = vector.broadcast %cst_112 : f32 to vector<2x128xf32>
    %673 = arith.addf %672, %671 : vector<2x128xf32>
    %674 = arith.divf %672, %673 : vector<2x128xf32>
    %675 = vector.extract_strided_slice %668 {offsets = [0, 128], sizes = [2, 128], strides = [1, 1]} : vector<2x512xf32> to vector<2x128xf32>
    %676 = arith.negf %675 : vector<2x128xf32>
    %677 = math.exp %676 : vector<2x128xf32>
    %cst_113 = arith.constant 1.000000e+00 : f32
    %678 = vector.broadcast %cst_113 : f32 to vector<2x128xf32>
    %679 = arith.addf %678, %677 : vector<2x128xf32>
    %680 = arith.divf %678, %679 : vector<2x128xf32>
    %681 = vector.extract_strided_slice %668 {offsets = [0, 256], sizes = [2, 128], strides = [1, 1]} : vector<2x512xf32> to vector<2x128xf32>
    %682 = math.tanh %681 : vector<2x128xf32>
    %683 = vector.extract_strided_slice %668 {offsets = [0, 384], sizes = [2, 128], strides = [1, 1]} : vector<2x512xf32> to vector<2x128xf32>
    %684 = arith.negf %683 : vector<2x128xf32>
    %685 = math.exp %684 : vector<2x128xf32>
    %cst_114 = arith.constant 1.000000e+00 : f32
    %686 = vector.broadcast %cst_114 : f32 to vector<2x128xf32>
    %687 = arith.addf %686, %685 : vector<2x128xf32>
    %688 = arith.divf %686, %687 : vector<2x128xf32>
    %689 = arith.mulf %680, %661 : vector<2x128xf32>
    %690 = arith.mulf %674, %682 : vector<2x128xf32>
    %691 = arith.addf %689, %690 : vector<2x128xf32>
    %692 = math.tanh %691 : vector<2x128xf32>
    %693 = arith.mulf %688, %692 : vector<2x128xf32>
    %694 = vector.extract_strided_slice %511 {offsets = [12, 0], sizes = [2, 512], strides = [1, 1]} : vector<16x512xf32> to vector<2x512xf32>
    %695 = arith.truncf %693 : vector<2x128xf32> to vector<2x128xbf16>
    %c0_115 = arith.constant 0 : index
    %c0_116 = arith.constant 0 : index
    %696 = vector.load %arg5[%c0_115, %c0_116] : memref<128x512xbf16, #tpu.memory_space<vmem>>, vector<128x512xbf16>
    %cst_117 = arith.constant dense<0.000000e+00> : vector<2x512xf32>
    %697 = tpu.matmul %695, %696, %cst_117 {dimension_numbers = #tpu.dot_dimension_numbers<[1], [0], [0], [1], [0, 0, 1, 1], [], []>} : vector<2x128xbf16>, vector<128x512xbf16>, vector<2x512xf32> -> vector<2x512xf32>
    %698 = arith.addf %694, %697 : vector<2x512xf32>
    %699 = vector.extract_strided_slice %698 {offsets = [0, 0], sizes = [2, 128], strides = [1, 1]} : vector<2x512xf32> to vector<2x128xf32>
    %700 = arith.negf %699 : vector<2x128xf32>
    %701 = math.exp %700 : vector<2x128xf32>
    %cst_118 = arith.constant 1.000000e+00 : f32
    %702 = vector.broadcast %cst_118 : f32 to vector<2x128xf32>
    %703 = arith.addf %702, %701 : vector<2x128xf32>
    %704 = arith.divf %702, %703 : vector<2x128xf32>
    %705 = vector.extract_strided_slice %698 {offsets = [0, 128], sizes = [2, 128], strides = [1, 1]} : vector<2x512xf32> to vector<2x128xf32>
    %706 = arith.negf %705 : vector<2x128xf32>
    %707 = math.exp %706 : vector<2x128xf32>
    %cst_119 = arith.constant 1.000000e+00 : f32
    %708 = vector.broadcast %cst_119 : f32 to vector<2x128xf32>
    %709 = arith.addf %708, %707 : vector<2x128xf32>
    %710 = arith.divf %708, %709 : vector<2x128xf32>
    %711 = vector.extract_strided_slice %698 {offsets = [0, 256], sizes = [2, 128], strides = [1, 1]} : vector<2x512xf32> to vector<2x128xf32>
    %712 = math.tanh %711 : vector<2x128xf32>
    %713 = vector.extract_strided_slice %698 {offsets = [0, 384], sizes = [2, 128], strides = [1, 1]} : vector<2x512xf32> to vector<2x128xf32>
    %714 = arith.negf %713 : vector<2x128xf32>
    %715 = math.exp %714 : vector<2x128xf32>
    %cst_120 = arith.constant 1.000000e+00 : f32
    %716 = vector.broadcast %cst_120 : f32 to vector<2x128xf32>
    %717 = arith.addf %716, %715 : vector<2x128xf32>
    %718 = arith.divf %716, %717 : vector<2x128xf32>
    %719 = arith.mulf %710, %691 : vector<2x128xf32>
    %720 = arith.mulf %704, %712 : vector<2x128xf32>
    %721 = arith.addf %719, %720 : vector<2x128xf32>
    %722 = math.tanh %721 : vector<2x128xf32>
    %723 = arith.mulf %718, %722 : vector<2x128xf32>
    %724 = vector.extract_strided_slice %511 {offsets = [14, 0], sizes = [2, 512], strides = [1, 1]} : vector<16x512xf32> to vector<2x512xf32>
    %725 = arith.truncf %723 : vector<2x128xf32> to vector<2x128xbf16>
    %c0_121 = arith.constant 0 : index
    %c0_122 = arith.constant 0 : index
    %726 = vector.load %arg5[%c0_121, %c0_122] : memref<128x512xbf16, #tpu.memory_space<vmem>>, vector<128x512xbf16>
    %cst_123 = arith.constant dense<0.000000e+00> : vector<2x512xf32>
    %727 = tpu.matmul %725, %726, %cst_123 {dimension_numbers = #tpu.dot_dimension_numbers<[1], [0], [0], [1], [0, 0, 1, 1], [], []>} : vector<2x128xbf16>, vector<128x512xbf16>, vector<2x512xf32> -> vector<2x512xf32>
    %728 = arith.addf %724, %727 : vector<2x512xf32>
    %729 = vector.extract_strided_slice %728 {offsets = [0, 0], sizes = [2, 128], strides = [1, 1]} : vector<2x512xf32> to vector<2x128xf32>
    %730 = arith.negf %729 : vector<2x128xf32>
    %731 = math.exp %730 : vector<2x128xf32>
    %cst_124 = arith.constant 1.000000e+00 : f32
    %732 = vector.broadcast %cst_124 : f32 to vector<2x128xf32>
    %733 = arith.addf %732, %731 : vector<2x128xf32>
    %734 = arith.divf %732, %733 : vector<2x128xf32>
    %735 = vector.extract_strided_slice %728 {offsets = [0, 128], sizes = [2, 128], strides = [1, 1]} : vector<2x512xf32> to vector<2x128xf32>
    %736 = arith.negf %735 : vector<2x128xf32>
    %737 = math.exp %736 : vector<2x128xf32>
    %cst_125 = arith.constant 1.000000e+00 : f32
    %738 = vector.broadcast %cst_125 : f32 to vector<2x128xf32>
    %739 = arith.addf %738, %737 : vector<2x128xf32>
    %740 = arith.divf %738, %739 : vector<2x128xf32>
    %741 = vector.extract_strided_slice %728 {offsets = [0, 256], sizes = [2, 128], strides = [1, 1]} : vector<2x512xf32> to vector<2x128xf32>
    %742 = math.tanh %741 : vector<2x128xf32>
    %743 = vector.extract_strided_slice %728 {offsets = [0, 384], sizes = [2, 128], strides = [1, 1]} : vector<2x512xf32> to vector<2x128xf32>
    %744 = arith.negf %743 : vector<2x128xf32>
    %745 = math.exp %744 : vector<2x128xf32>
    %cst_126 = arith.constant 1.000000e+00 : f32
    %746 = vector.broadcast %cst_126 : f32 to vector<2x128xf32>
    %747 = arith.addf %746, %745 : vector<2x128xf32>
    %748 = arith.divf %746, %747 : vector<2x128xf32>
    %749 = arith.mulf %740, %721 : vector<2x128xf32>
    %750 = arith.mulf %734, %742 : vector<2x128xf32>
    %751 = arith.addf %749, %750 : vector<2x128xf32>
    %752 = math.tanh %751 : vector<2x128xf32>
    %753 = arith.mulf %748, %752 : vector<2x128xf32>
    %c0_127 = arith.constant 0 : index
    %c0_128 = arith.constant 0 : index
    %754 = vector.load %arg7[%c0_127, %c0_128] : memref<1x128xf32, #tpu.memory_space<vmem>>, vector<1x128xf32>
    %755 = vector.broadcast %754 : vector<1x128xf32> to vector<2x128xf32>
    %756 = arith.mulf %753, %755 : vector<2x128xf32>
    %cst_129 = arith.constant dense<0.000000e+00> : vector<2xf32>
    %757 = vector.multi_reduction <add>, %756, %cst_129 [1] : vector<2x128xf32> to vector<2xf32>
    %758 = vector.shape_cast %757 : vector<2xf32> to vector<2x1xf32>
    %c0_130 = arith.constant 0 : index
    %c0_131 = arith.constant 0 : index
    %759 = vector.load %arg8[%c0_130, %c0_131] : memref<1x1xf32, #tpu.memory_space<vmem>>, vector<1x1xf32>
    %760 = vector.broadcast %759 : vector<1x1xf32> to vector<2x1xf32>
    %761 = arith.addf %758, %760 : vector<2x1xf32>
    %c0_132 = arith.constant 0 : index
    %c0_133 = arith.constant 0 : index
    %762 = vector.load %arg9[%c0_132, %c0_133] : memref<2x1xf32, #tpu.memory_space<vmem>>, vector<2x1xf32>
    tpu.vector_store %arg9[%c0_132, %c0_133], %761 {strides = array<i32>} : memref<2x1xf32, #tpu.memory_space<vmem>>, vector<2x1xf32>,
    return
  }
}

</mosaic_0001>

<bundles_post_ra>
// kernel: nnn_forward.1
= control target key start
LH: loop header
LB: loop body
LE: loop exit
PB: predicated region body
PF: predicated region fallthrough
CT: control target
= control target key end

     0   :  { %v4536_v1 = vmov 0.0   ;;  %v4537_v2 = vmov 0   ;;  %s4538_s19 = smov 112   ;;  %s4539_s20 = smov 8   ;;  %v4541_v39 = vmov 1   ;;  %vm66_vm0 = vcmask 64512   ;;  %s5595_s2 = inlined_call_operand.vmem [shape: f32[8,32], index: 2, kind: input, shape index: {}]   ;;  %s5596_s0 = inlined_call_operand.vmem [shape: f32[16,16], index: 0, kind: input, shape index: {}]   ;;  %s5597_s1 = inlined_call_operand.vmem [shape: f32[1,32], index: 1, kind: input, shape index: {}]   ;;  %s5598_s3 = inlined_call_operand.vmem [shape: f32[1,32], index: 3, kind: input, shape index: {}]   ;;  %s5599_s4 = inlined_call_operand.vmem [shape: bf16[8,512], index: 4, kind: input, shape index: {}]   ;;  %s5600_s5 = inlined_call_operand.vmem [shape: bf16[128,512], index: 5, kind: input, shape index: {}]   ;;  %s5601_s6 = inlined_call_operand.vmem [shape: f32[1,512], index: 6, kind: input, shape index: {}]   ;;  %s5602_s8 = inlined_call_operand.<no memory space> [shape: f32[1,1], index: 8, kind: input, shape index: {}]   ;;  %s5603_s7 = inlined_call_operand.vmem [shape: f32[1,128], index: 7, kind: input, shape index: {}]   ;;  %s5604_s9 = inlined_call_operand.vmem [shape: f32[2,1], index: 9, kind: output, shape index: {}]  }
   0x1   :  { %v4610_v0 = vld [vmem:[%s5595_s2] sm:$0xff]  ;;  %3933 = vmatprep.mubr.f32.mxu0 %v4536_v1  ;;  %4032 = vset.pattern.permute.xlu0 %v4537_v2  ;;  %v4624_v4 = vld [vmem:[%s5596_s0 + $0x8] sm:$0xff]  ;;  %s4540_s21 = smov 16   ;;  %s4542_s22 = smov 104   ;;  %vm2441_vm1 = vcmask 1043456   ;;  %vm3735_vm2 = vcmask 1047558  }
   0x2   :  { %v4616_v3 = vld [vmem:[%s5596_s0] sm:$0xff]  ;;  %3931 = vmatprep.subr.mxu0 %v4610_v0  ;;  %3936 = vmatprep.subr.mxu1 %v4610_v0  ;;  %vm3747_vm3 = vcmask 7174  }
   0x3   :  { %54 = vperm.xlu0 %4032, %v4616_v3   ;;  %3932 = vmatpush3.msra.mxu0 %v4610_v0  ;;  %v4636_v6 = vld [vmem:[%s5597_s1] ss:$0 sm:$0xff] }
   0x4   :  { %3934 = vmatmul.mubr.f32.vlgmr.msra.gmra.mxu0 %v4536_v1  ;;  %3937 = vmatpush3.msra.mxu1 %v4610_v0  ;;  %v4643_v10 = vld [vmem:[%s5598_s3] ss:$0 sm:$0xff] }
   0x5   :  { %3941 = vmatprep.subr.mxu0 %v4610_v0  ;;  %3946 = vmatprep.subr.mxu1 %v4610_v0 }
   0x6   :  { %3942 = vmatpush3.msra.mxu0 %v4610_v0  ;;  %4034 = vset.pattern.permute.xlu1 %v4541_v39 }
   0x7   :  { %59 = vperm.xlu0 %4032, %v4624_v4   ;;  %3951 = vmatprep.subr.mxu0 %v4610_v0 }
   0xb   :  { %4033 = vset.pattern.permute.xlu0 %v4541_v39 }
  0x7e   :  { %v55_v5 = vpop.permute.xlu0 %54 }
  0x7f   :  { %v62_v7 = vmul.f32 %v4636_v6, %v55_v5 }
  0x81   :  { %v64_v11 = vadd.f32 %v4643_v10, %v62_v7 }
  0x82   :  { %v60_v8 = vpop.permute.xlu0 %59 }
  0x83   :  { %v63_v9 = vmul.f32 %v4636_v6, %v60_v8 }
  0x85   :  { %v65_v13 = vadd.f32 %v4643_v10, %v63_v9 }
  0xc4   :  { %v3935_v12 = vpop.f32.mrf.mxu0 }
  0xc5   :  { %v146_v16 = vadd.f32 %v3935_v12, %v65_v13 }
  0xc6   :  { %v136_v14 = vpop.f32.mrf.mxu0 }
  0xc7   :  { %v145_v15 = vadd.f32 %v136_v14, %v64_v11  ;;  %v3756_v20 = vmul.f32 -1.442695, %v146_v16 }
  0xc9   :  { %4115 = vtanh.f32 %v145_v15  ;;  %v3755_v19 = vmul.f32 -1.442695, %v145_v15 }
  0xca   :  { %4117 = vtanh.f32 %v146_v16 }
  0xcb   :  { %4119 = vpow2.f32 %v3755_v19 }
  0xcc   :  { %4121 = vpow2.f32 %v3756_v20  ;;  %v4543_v20 = vmov 2  }
  0xd6   :  { %v4116_v17 = vpop.eup %4115 }
  0xd7   :  { %165 = vrot.lane.b32.xlu1 %v4116_v17, %s4538_s19  ;;  %v4118_v18 = vpop.eup %4117 }
  0xd8   :  { %v4120_v21 = vpop.eup %4119 }
  0xd9   :  { %v153_v22 = vadd.f32 1.0, %v4120_v21  ;;  %v4122_v23 = vpop.eup %4121 }
  0xda   :  { %v154_v24 = vadd.f32 1.0, %v4122_v23 }
  0xdb   :  { %167 = vrot.lane.b32.xlu1 %v4118_v18, %s4538_s19  ;;  %4123 = vrcp.f32 %v153_v22 }
  0xdc   :  { %4125 = vrcp.f32 %v154_v24 }
  0xe8   :  { %v4124_v25 = vpop.eup %4123 }
  0xe9   :  { %v4126_v28 = vpop.eup %4125  ;;  %v161_v31 = vmul.f32 0.0, %v4124_v25 }
  0xea   :  { %v162_v34 = vmul.f32 0.0, %v4126_v28 }
 0x149   :  { %v166_v26 = vpop.permute.xlu1 %165 }
 0x14a   :  { %v171_v27 = vmul.f32 %v4124_v25, %v166_v26 }
 0x14c   :  { %175 = vrot.lane.b32.xlu0 %v171_v27, %s4539_s20 }
 0x14d   :  { %v168_v29 = vpop.permute.xlu1 %167 }
 0x14e   :  { %v172_v30 = vmul.f32 %v4126_v28, %v168_v29 }
 0x150   :  { %177 = vrot.lane.b32.xlu1 %v172_v30, %s4539_s20 }
 0x1be   :  { %v176_v32 = vpop.permute.xlu0 %175 }
 0x1bf   :  { %v4651_v33 = vadd.f32 %v176_v32, %v161_v31 }
 0x1c1   :  { %4127 = vtanh.f32 %v4651_v33 }
 0x1c2   :  { %v178_v35 = vpop.permute.xlu1 %177 }
 0x1c3   :  { %v182_v36 = vadd.f32 %v178_v35, %v162_v34 }
 0x1c5   :  { %4129 = vtanh.f32 %v182_v36 }
 0x1ce   :  { %v4128_v37 = vpop.eup %4127 }
 0x1cf   :  { %187 = vrot.lane.b32.xlu0 %v4128_v37, %s4540_s21 }
 0x1d2   :  { %v4130_v38 = vpop.eup %4129 }
 0x1d3   :  { %189 = vrot.lane.b32.xlu1 %v4130_v38, %s4540_s21 }
 0x241   :  { %v188_v40 = vpop.permute.xlu0 %187 }
 0x242   :  { %v193_v41 = vmul.f32 %v4124_v25, %v188_v40 }
 0x244   :  { %209 = vrot.lane.b32.xlu0 %v193_v41, %s4542_s22 }
 0x245   :  { %v190_v42 = vpop.permute.xlu1 %189 }
 0x246   :  { %v194_v43 = vmul.f32 %v4126_v28, %v190_v42 }
 0x248   :  { %211 = vrot.lane.b32.xlu1 %v194_v43, %s4542_s22  ;;  %196 = vperm.xlu0 %4033, %v4616_v3  }
 0x24c   :  { %200 = vperm.xlu1 %4034, %v4624_v4   ;;  %4036 = vset.pattern.permute.xlu0 %v4543_v20 }
 0x250   :  { %4035 = vset.pattern.permute.xlu1 %v4543_v20 }
 0x2b6   :  { %v210_v44 = vpop.permute.xlu0 %209 }
 0x2b7   :  { %3938 = vmatprep.mubr.msk.f32.mxu1 %vm66_vm0, %v210_v44 }
 0x2ba   :  { %v212_v45 = vpop.permute.xlu1 %211 }
 0x2bb   :  { %3939 = vmatmul.mubr.msk.f32.vlgmr.msra.gmra.mxu1 %vm66_vm0, %v212_v45 }
 0x2bc   :  { %3947 = vmatpush3.msra.mxu1 %v4610_v0 }
 0x2bd   :  { %3956 = vmatprep.subr.mxu1 %v4610_v0 }
 0x2c3   :  { %v197_v47 = vpop.permute.xlu0 %196 }
 0x2c4   :  { %v203_v49 = vmul.f32 %v4636_v6, %v197_v47 }
 0x2c6   :  { %v205_v51 = vadd.f32 %v4643_v10, %v203_v49 }
 0x2c7   :  { %v201_v46 = vpop.permute.xlu1 %200 }
 0x2c8   :  { %v204_v48 = vmul.f32 %v4636_v6, %v201_v46 }
 0x2ca   :  { %v206_v50 = vadd.f32 %v4643_v10, %v204_v48 }
 0x37b   :  { %v3940_v52 = vpop.f32.mrf.mxu1 }
 0x37c   :  { %v293_v53 = vadd.f32 %v3940_v52, %v206_v50 }
 0x37d   :  { %v283_v54 = vpop.f32.mrf.mxu1 }
 0x37e   :  { %4131 = vtanh.f32 %v293_v53  ;;  %v292_v55 = vadd.f32 %v283_v54, %v205_v51  ;;  %v3760_v58 = vmul.f32 -1.442695, %v293_v53 }
 0x380   :  { %4133 = vtanh.f32 %v292_v55  ;;  %v3759_v59 = vmul.f32 -1.442695, %v292_v55 }
 0x381   :  { %4135 = vpow2.f32 %v3760_v58 }
 0x382   :  { %4137 = vpow2.f32 %v3759_v59  ;;  %v4544_v59 = vmov 3  }
 0x38b   :  { %v4132_v56 = vpop.eup %4131 }
 0x38c   :  { %314 = vrot.lane.b32.xlu0 %v4132_v56, %s4538_s19 }
 0x38d   :  { %v4134_v57 = vpop.eup %4133 }
 0x38e   :  { %312 = vrot.lane.b32.xlu1 %v4134_v57, %s4538_s19  ;;  %v4136_v60 = vpop.eup %4135 }
 0x38f   :  { %v4138_v61 = vpop.eup %4137  ;;  %v301_v62 = vadd.f32 1.0, %v4136_v60 }
 0x390   :  { %v300_v63 = vadd.f32 1.0, %v4138_v61 }
 0x391   :  { %4139 = vrcp.f32 %v301_v62 }
 0x392   :  { %4141 = vrcp.f32 %v300_v63 }
 0x39e   :  { %v4140_v1 = vpop.eup %4139 }
 0x39f   :  { %v4142_v8 = vpop.eup %4141  ;;  %v309_v12 = vmul.f32 %v4140_v1, %v182_v36 }
 0x3a0   :  { %v308_v15 = vmul.f32 %v4142_v8, %v4651_v33 }
 0x3fe   :  { %v315_v5 = vpop.permute.xlu0 %314 }
 0x3ff   :  { %v319_v7 = vmul.f32 %v4140_v1, %v315_v5 }
 0x400   :  { %v313_v9 = vpop.permute.xlu1 %312 }
 0x401   :  { %324 = vrot.lane.b32.xlu0 %v319_v7, %s4539_s20  ;;  %v318_v11 = vmul.f32 %v4142_v8, %v313_v9 }
 0x403   :  { %322 = vrot.lane.b32.xlu1 %v318_v11, %s4539_s20 }
 0x473   :  { %v325_v13 = vpop.permute.xlu0 %324 }
 0x474   :  { %v4672_v14 = vadd.f32 %v325_v13, %v309_v12 }
 0x475   :  { %v323_v16 = vpop.permute.xlu1 %322 }
 0x476   :  { %4143 = vtanh.f32 %v4672_v14  ;;  %v328_v17 = vadd.f32 %v323_v16, %v308_v15 }
 0x478   :  { %4145 = vtanh.f32 %v328_v17 }
 0x483   :  { %v4144_v18 = vpop.eup %4143 }
 0x484   :  { %336 = vrot.lane.b32.xlu0 %v4144_v18, %s4540_s21 }
 0x485   :  { %v4146_v19 = vpop.eup %4145 }
 0x486   :  { %334 = vrot.lane.b32.xlu1 %v4146_v19, %s4540_s21 }
 0x4f6   :  { %v337_v21 = vpop.permute.xlu0 %336 }
 0x4f7   :  { %v341_v22 = vmul.f32 %v4140_v1, %v337_v21 }
 0x4f8   :  { %v335_v23 = vpop.permute.xlu1 %334 }
 0x4f9   :  { %358 = vrot.lane.b32.xlu0 %v341_v22, %s4542_s22  ;;  %v340_v24 = vmul.f32 %v4142_v8, %v335_v23 }
 0x4fb   :  { %356 = vrot.lane.b32.xlu1 %v340_v24, %s4542_s22 }
 0x4fd   :  { %347 = vperm.xlu0 %4036, %v4624_v4  }
 0x4ff   :  { %343 = vperm.xlu1 %4035, %v4616_v3  }
 0x501   :  { %4037 = vset.pattern.permute.xlu0 %v4544_v59 }
 0x503   :  { %4038 = vset.pattern.permute.xlu1 %v4544_v59 }
 0x56b   :  { %v359_v26 = vpop.permute.xlu0 %358 }
 0x56d   :  { %v357_v25 = vpop.permute.xlu1 %356 }
 0x56e   :  { %3943 = vmatprep.mubr.msk.f32.mxu0 %vm66_vm0, %v357_v25 }
 0x56f   :  { %3944 = vmatmul.mubr.msk.f32.vlgmr.msra.gmra.mxu0 %vm66_vm0, %v359_v26 }
 0x570   :  { %3952 = vmatpush3.msra.mxu0 %v4610_v0 }
 0x571   :  { %3961 = vmatprep.subr.mxu0 %v4610_v0 }
 0x578   :  { %v348_v28 = vpop.permute.xlu0 %347 }
 0x579   :  { %v351_v30 = vmul.f32 %v4636_v6, %v348_v28 }
 0x57a   :  { %v344_v27 = vpop.permute.xlu1 %343 }
 0x57b   :  { %v350_v29 = vmul.f32 %v4636_v6, %v344_v27  ;;  %v353_v33 = vadd.f32 %v4643_v10, %v351_v30 }
 0x57d   :  { %v352_v31 = vadd.f32 %v4643_v10, %v350_v29 }
 0x62f   :  { %v3945_v32 = vpop.f32.mrf.mxu0 }
 0x630   :  { %v440_v36 = vadd.f32 %v3945_v32, %v353_v33 }
 0x631   :  { %v430_v34 = vpop.f32.mrf.mxu0 }
 0x632   :  { %v439_v35 = vadd.f32 %v430_v34, %v352_v31  ;;  %v3764_v40 = vmul.f32 -1.442695, %v440_v36 }
 0x634   :  { %4147 = vtanh.f32 %v439_v35  ;;  %v3763_v39 = vmul.f32 -1.442695, %v439_v35 }
 0x635   :  { %4149 = vtanh.f32 %v440_v36 }
 0x636   :  { %4151 = vpow2.f32 %v3763_v39 }
 0x637   :  { %4153 = vpow2.f32 %v3764_v40  ;;  %v4545_v40 = vmov 4  }
 0x641   :  { %v4148_v37 = vpop.eup %4147 }
 0x642   :  { %459 = vrot.lane.b32.xlu1 %v4148_v37, %s4538_s19  ;;  %v4150_v38 = vpop.eup %4149 }
 0x643   :  { %v4152_v41 = vpop.eup %4151 }
 0x644   :  { %v447_v42 = vadd.f32 1.0, %v4152_v41  ;;  %v4154_v43 = vpop.eup %4153 }
 0x645   :  { %v448_v44 = vadd.f32 1.0, %v4154_v43 }
 0x646   :  { %461 = vrot.lane.b32.xlu1 %v4150_v38, %s4538_s19  ;;  %4155 = vrcp.f32 %v447_v42 }
 0x647   :  { %4157 = vrcp.f32 %v448_v44 }
 0x653   :  { %v4156_v45 = vpop.eup %4155 }
 0x654   :  { %v4158_v48 = vpop.eup %4157  ;;  %v455_v51 = vmul.f32 %v4156_v45, %v328_v17 }
 0x655   :  { %v456_v54 = vmul.f32 %v4158_v48, %v4672_v14 }
 0x6b4   :  { %v460_v46 = vpop.permute.xlu1 %459 }
 0x6b5   :  { %v465_v47 = vmul.f32 %v4156_v45, %v460_v46 }
 0x6b7   :  { %469 = vrot.lane.b32.xlu0 %v465_v47, %s4539_s20 }
 0x6b8   :  { %v462_v49 = vpop.permute.xlu1 %461 }
 0x6b9   :  { %v466_v50 = vmul.f32 %v4158_v48, %v462_v49 }
 0x6bb   :  { %471 = vrot.lane.b32.xlu1 %v466_v50, %s4539_s20 }
 0x729   :  { %v470_v52 = vpop.permute.xlu0 %469 }
 0x72a   :  { %v4694_v53 = vadd.f32 %v470_v52, %v455_v51 }
 0x72c   :  { %4159 = vtanh.f32 %v4694_v53 }
 0x72d   :  { %v472_v55 = vpop.permute.xlu1 %471 }
 0x72e   :  { %v476_v56 = vadd.f32 %v472_v55, %v456_v54 }
 0x730   :  { %4161 = vtanh.f32 %v476_v56 }
 0x739   :  { %v4160_v57 = vpop.eup %4159 }
 0x73a   :  { %481 = vrot.lane.b32.xlu0 %v4160_v57, %s4540_s21 }
 0x73d   :  { %v4162_v58 = vpop.eup %4161 }
 0x73e   :  { %483 = vrot.lane.b32.xlu1 %v4162_v58, %s4540_s21 }
 0x7ac   :  { %v482_v60 = vpop.permute.xlu0 %481 }
 0x7ad   :  { %v487_v61 = vmul.f32 %v4156_v45, %v482_v60 }
 0x7af   :  { %503 = vrot.lane.b32.xlu0 %v487_v61, %s4542_s22 }
 0x7b0   :  { %v484_v62 = vpop.permute.xlu1 %483 }
 0x7b1   :  { %v488_v63 = vmul.f32 %v4158_v48, %v484_v62 }
 0x7b3   :  { %505 = vrot.lane.b32.xlu1 %v488_v63, %s4542_s22  ;;  %490 = vperm.xlu0 %4037, %v4616_v3  }
 0x7b7   :  { %494 = vperm.xlu1 %4038, %v4624_v4   ;;  %4040 = vset.pattern.permute.xlu0 %v4545_v40 }
 0x7bb   :  { %4039 = vset.pattern.permute.xlu1 %v4545_v40 }
 0x821   :  { %v504_v1 = vpop.permute.xlu0 %503 }
 0x822   :  { %3948 = vmatprep.mubr.msk.f32.mxu1 %vm66_vm0, %v504_v1 }
 0x825   :  { %v506_v5 = vpop.permute.xlu1 %505 }
 0x826   :  { %3949 = vmatmul.mubr.msk.f32.vlgmr.msra.gmra.mxu1 %vm66_vm0, %v506_v5 }
 0x827   :  { %3957 = vmatpush3.msra.mxu1 %v4610_v0 }
 0x828   :  { %3966 = vmatprep.subr.mxu1 %v4610_v0 }
 0x82e   :  { %v491_v8 = vpop.permute.xlu0 %490 }
 0x82f   :  { %v497_v11 = vmul.f32 %v4636_v6, %v491_v8 }
 0x831   :  { %v499_v13 = vadd.f32 %v4643_v10, %v497_v11 }
 0x832   :  { %v495_v7 = vpop.permute.xlu1 %494 }
 0x833   :  { %v498_v9 = vmul.f32 %v4636_v6, %v495_v7 }
 0x835   :  { %v500_v12 = vadd.f32 %v4643_v10, %v498_v9 }
 0x8e6   :  { %v3950_v14 = vpop.f32.mrf.mxu1 }
 0x8e7   :  { %v587_v15 = vadd.f32 %v3950_v14, %v500_v12 }
 0x8e8   :  { %v577_v16 = vpop.f32.mrf.mxu1 }
 0x8e9   :  { %4163 = vtanh.f32 %v587_v15  ;;  %v586_v17 = vadd.f32 %v577_v16, %v499_v13  ;;  %v3768_v20 = vmul.f32 -1.442695, %v587_v15 }
 0x8eb   :  { %4165 = vtanh.f32 %v586_v17  ;;  %v3767_v21 = vmul.f32 -1.442695, %v586_v17 }
 0x8ec   :  { %4167 = vpow2.f32 %v3768_v20 }
 0x8ed   :  { %4169 = vpow2.f32 %v3767_v21  ;;  %v4546_v21 = vmov 5  }
 0x8f6   :  { %v4164_v18 = vpop.eup %4163 }
 0x8f7   :  { %608 = vrot.lane.b32.xlu0 %v4164_v18, %s4538_s19 }
 0x8f8   :  { %v4166_v19 = vpop.eup %4165 }
 0x8f9   :  { %606 = vrot.lane.b32.xlu1 %v4166_v19, %s4538_s19  ;;  %v4168_v22 = vpop.eup %4167 }
 0x8fa   :  { %v4170_v23 = vpop.eup %4169  ;;  %v595_v24 = vadd.f32 1.0, %v4168_v22 }
 0x8fb   :  { %v594_v25 = vadd.f32 1.0, %v4170_v23 }
 0x8fc   :  { %4171 = vrcp.f32 %v595_v24 }
 0x8fd   :  { %4173 = vrcp.f32 %v594_v25 }
 0x909   :  { %v4172_v26 = vpop.eup %4171 }
 0x90a   :  { %v4174_v29 = vpop.eup %4173  ;;  %v603_v32 = vmul.f32 %v4172_v26, %v476_v56 }
 0x90b   :  { %v602_v35 = vmul.f32 %v4174_v29, %v4694_v53 }
 0x969   :  { %v609_v27 = vpop.permute.xlu0 %608 }
 0x96a   :  { %v613_v28 = vmul.f32 %v4172_v26, %v609_v27 }
 0x96b   :  { %v607_v30 = vpop.permute.xlu1 %606 }
 0x96c   :  { %618 = vrot.lane.b32.xlu0 %v613_v28, %s4539_s20  ;;  %v612_v31 = vmul.f32 %v4174_v29, %v607_v30 }
 0x96e   :  { %616 = vrot.lane.b32.xlu1 %v612_v31, %s4539_s20 }
 0x9de   :  { %v619_v33 = vpop.permute.xlu0 %618 }
 0x9df   :  { %v4716_v34 = vadd.f32 %v619_v33, %v603_v32 }
 0x9e0   :  { %v617_v36 = vpop.permute.xlu1 %616 }
 0x9e1   :  { %4175 = vtanh.f32 %v4716_v34  ;;  %v622_v37 = vadd.f32 %v617_v36, %v602_v35 }
 0x9e3   :  { %4177 = vtanh.f32 %v622_v37 }
 0x9ee   :  { %v4176_v38 = vpop.eup %4175 }
 0x9ef   :  { %630 = vrot.lane.b32.xlu0 %v4176_v38, %s4540_s21 }
 0x9f0   :  { %v4178_v39 = vpop.eup %4177 }
 0x9f1   :  { %628 = vrot.lane.b32.xlu1 %v4178_v39, %s4540_s21 }
 0xa61   :  { %v631_v41 = vpop.permute.xlu0 %630 }
 0xa62   :  { %v635_v42 = vmul.f32 %v4172_v26, %v631_v41 }
 0xa63   :  { %v629_v43 = vpop.permute.xlu1 %628 }
 0xa64   :  { %652 = vrot.lane.b32.xlu0 %v635_v42, %s4542_s22  ;;  %v634_v44 = vmul.f32 %v4174_v29, %v629_v43 }
 0xa66   :  { %650 = vrot.lane.b32.xlu1 %v634_v44, %s4542_s22 }
 0xa68   :  { %641 = vperm.xlu0 %4040, %v4624_v4  }
 0xa6a   :  { %637 = vperm.xlu1 %4039, %v4616_v3  }
 0xa6c   :  { %4041 = vset.pattern.permute.xlu0 %v4546_v21 }
 0xa6e   :  { %4042 = vset.pattern.permute.xlu1 %v4546_v21 }
 0xad6   :  { %v653_v46 = vpop.permute.xlu0 %652 }
 0xad8   :  { %v651_v45 = vpop.permute.xlu1 %650 }
 0xad9   :  { %3953 = vmatprep.mubr.msk.f32.mxu0 %vm66_vm0, %v651_v45 }
 0xada   :  { %3954 = vmatmul.mubr.msk.f32.vlgmr.msra.gmra.mxu0 %vm66_vm0, %v653_v46 }
 0xadb   :  { %3962 = vmatpush3.msra.mxu0 %v4610_v0 }
 0xadc   :  { %3971 = vmatprep.subr.mxu0 %v4610_v0 }
 0xae3   :  { %v642_v48 = vpop.permute.xlu0 %641 }
 0xae4   :  { %v645_v50 = vmul.f32 %v4636_v6, %v642_v48 }
 0xae5   :  { %v638_v47 = vpop.permute.xlu1 %637 }
 0xae6   :  { %v644_v49 = vmul.f32 %v4636_v6, %v638_v47  ;;  %v647_v53 = vadd.f32 %v4643_v10, %v645_v50 }
 0xae8   :  { %v646_v51 = vadd.f32 %v4643_v10, %v644_v49 }
 0xb9a   :  { %v3955_v52 = vpop.f32.mrf.mxu0 }
 0xb9b   :  { %v734_v56 = vadd.f32 %v3955_v52, %v647_v53 }
 0xb9c   :  { %v724_v54 = vpop.f32.mrf.mxu0 }
 0xb9d   :  { %v733_v55 = vadd.f32 %v724_v54, %v646_v51  ;;  %v3772_v60 = vmul.f32 -1.442695, %v734_v56 }
 0xb9f   :  { %4179 = vtanh.f32 %v733_v55  ;;  %v3771_v59 = vmul.f32 -1.442695, %v733_v55 }
 0xba0   :  { %4181 = vtanh.f32 %v734_v56 }
 0xba1   :  { %4183 = vpow2.f32 %v3771_v59 }
 0xba2   :  { %4185 = vpow2.f32 %v3772_v60  ;;  %v4547_v60 = vmov 6  }
 0xbac   :  { %v4180_v57 = vpop.eup %4179 }
 0xbad   :  { %753 = vrot.lane.b32.xlu1 %v4180_v57, %s4538_s19  ;;  %v4182_v58 = vpop.eup %4181 }
 0xbae   :  { %v4184_v61 = vpop.eup %4183 }
 0xbaf   :  { %v741_v62 = vadd.f32 1.0, %v4184_v61  ;;  %v4186_v63 = vpop.eup %4185 }
 0xbb0   :  { %v742_v1 = vadd.f32 1.0, %v4186_v63 }
 0xbb1   :  { %755 = vrot.lane.b32.xlu1 %v4182_v58, %s4538_s19  ;;  %4187 = vrcp.f32 %v741_v62 }
 0xbb2   :  { %4189 = vrcp.f32 %v742_v1 }
 0xbbe   :  { %v4188_v5 = vpop.eup %4187 }
 0xbbf   :  { %v4190_v9 = vpop.eup %4189  ;;  %v749_v13 = vmul.f32 %v4188_v5, %v622_v37 }
 0xbc0   :  { %v750_v16 = vmul.f32 %v4190_v9, %v4716_v34 }
 0xc1f   :  { %v754_v7 = vpop.permute.xlu1 %753 }
 0xc20   :  { %v759_v8 = vmul.f32 %v4188_v5, %v754_v7 }
 0xc22   :  { %763 = vrot.lane.b32.xlu0 %v759_v8, %s4539_s20 }
 0xc23   :  { %v756_v11 = vpop.permute.xlu1 %755 }
 0xc24   :  { %v760_v12 = vmul.f32 %v4190_v9, %v756_v11 }
 0xc26   :  { %765 = vrot.lane.b32.xlu1 %v760_v12, %s4539_s20 }
 0xc94   :  { %v764_v14 = vpop.permute.xlu0 %763 }
 0xc95   :  { %v4738_v15 = vadd.f32 %v764_v14, %v749_v13 }
 0xc97   :  { %4191 = vtanh.f32 %v4738_v15 }
 0xc98   :  { %v766_v17 = vpop.permute.xlu1 %765 }
 0xc99   :  { %v770_v18 = vadd.f32 %v766_v17, %v750_v16 }
 0xc9b   :  { %4193 = vtanh.f32 %v770_v18 }
 0xca4   :  { %v4192_v19 = vpop.eup %4191 }
 0xca5   :  { %775 = vrot.lane.b32.xlu0 %v4192_v19, %s4540_s21 }
 0xca8   :  { %v4194_v20 = vpop.eup %4193 }
 0xca9   :  { %777 = vrot.lane.b32.xlu1 %v4194_v20, %s4540_s21 }
 0xd17   :  { %v776_v22 = vpop.permute.xlu0 %775 }
 0xd18   :  { %v781_v23 = vmul.f32 %v4188_v5, %v776_v22 }
 0xd1a   :  { %797 = vrot.lane.b32.xlu0 %v781_v23, %s4542_s22 }
 0xd1b   :  { %v778_v24 = vpop.permute.xlu1 %777 }
 0xd1c   :  { %v782_v25 = vmul.f32 %v4190_v9, %v778_v24 }
 0xd1e   :  { %799 = vrot.lane.b32.xlu1 %v782_v25, %s4542_s22  ;;  %784 = vperm.xlu0 %4041, %v4616_v3  }
 0xd22   :  { %788 = vperm.xlu1 %4042, %v4624_v4   ;;  %4044 = vset.pattern.permute.xlu0 %v4547_v60 }
 0xd26   :  { %4043 = vset.pattern.permute.xlu1 %v4547_v60 }
 0xd8c   :  { %v798_v26 = vpop.permute.xlu0 %797 }
 0xd8d   :  { %3958 = vmatprep.mubr.msk.f32.mxu1 %vm66_vm0, %v798_v26 }
 0xd90   :  { %v800_v27 = vpop.permute.xlu1 %799 }
 0xd91   :  { %3959 = vmatmul.mubr.msk.f32.vlgmr.msra.gmra.mxu1 %vm66_vm0, %v800_v27 }
 0xd92   :  { %3967 = vmatpush3.msra.mxu1 %v4610_v0 }
 0xd93   :  { %3976 = vmatprep.subr.mxu1 %v4610_v0 }
 0xd99   :  { %v785_v29 = vpop.permute.xlu0 %784 }
 0xd9a   :  { %v791_v31 = vmul.f32 %v4636_v6, %v785_v29 }
 0xd9c   :  { %v793_v33 = vadd.f32 %v4643_v10, %v791_v31 }
 0xd9d   :  { %v789_v28 = vpop.permute.xlu1 %788 }
 0xd9e   :  { %v792_v30 = vmul.f32 %v4636_v6, %v789_v28 }
 0xda0   :  { %v794_v32 = vadd.f32 %v4643_v10, %v792_v30 }
 0xe51   :  { %v3960_v34 = vpop.f32.mrf.mxu1 }
 0xe52   :  { %v881_v35 = vadd.f32 %v3960_v34, %v794_v32 }
 0xe53   :  { %v871_v36 = vpop.f32.mrf.mxu1 }
 0xe54   :  { %4195 = vtanh.f32 %v881_v35  ;;  %v880_v37 = vadd.f32 %v871_v36, %v793_v33  ;;  %v3776_v40 = vmul.f32 -1.442695, %v881_v35 }
 0xe56   :  { %4197 = vtanh.f32 %v880_v37  ;;  %v3775_v41 = vmul.f32 -1.442695, %v880_v37 }
 0xe57   :  { %4199 = vpow2.f32 %v3776_v40 }
 0xe58   :  { %4201 = vpow2.f32 %v3775_v41  ;;  %v4548_v41 = vmov 7  }
 0xe61   :  { %v4196_v38 = vpop.eup %4195 }
 0xe62   :  { %902 = vrot.lane.b32.xlu0 %v4196_v38, %s4538_s19 }
 0xe63   :  { %v4198_v39 = vpop.eup %4197 }
 0xe64   :  { %900 = vrot.lane.b32.xlu1 %v4198_v39, %s4538_s19  ;;  %v4200_v42 = vpop.eup %4199 }
 0xe65   :  { %v4202_v43 = vpop.eup %4201  ;;  %v889_v44 = vadd.f32 1.0, %v4200_v42 }
 0xe66   :  { %v888_v45 = vadd.f32 1.0, %v4202_v43 }
 0xe67   :  { %4203 = vrcp.f32 %v889_v44 }
 0xe68   :  { %4205 = vrcp.f32 %v888_v45 }
 0xe74   :  { %v4204_v46 = vpop.eup %4203 }
 0xe75   :  { %v4206_v49 = vpop.eup %4205  ;;  %v897_v52 = vmul.f32 %v4204_v46, %v770_v18 }
 0xe76   :  { %v896_v55 = vmul.f32 %v4206_v49, %v4738_v15 }
 0xed4   :  { %v903_v47 = vpop.permute.xlu0 %902 }
 0xed5   :  { %v907_v48 = vmul.f32 %v4204_v46, %v903_v47 }
 0xed6   :  { %v901_v50 = vpop.permute.xlu1 %900 }
 0xed7   :  { %912 = vrot.lane.b32.xlu0 %v907_v48, %s4539_s20  ;;  %v906_v51 = vmul.f32 %v4206_v49, %v901_v50 }
 0xed9   :  { %910 = vrot.lane.b32.xlu1 %v906_v51, %s4539_s20 }
 0xf49   :  { %v913_v53 = vpop.permute.xlu0 %912 }
 0xf4a   :  { %v4760_v54 = vadd.f32 %v913_v53, %v897_v52 }
 0xf4b   :  { %v911_v56 = vpop.permute.xlu1 %910 }
 0xf4c   :  { %4207 = vtanh.f32 %v4760_v54  ;;  %v916_v57 = vadd.f32 %v911_v56, %v896_v55 }
 0xf4e   :  { %4209 = vtanh.f32 %v916_v57 }
 0xf59   :  { %v4208_v58 = vpop.eup %4207 }
 0xf5a   :  { %924 = vrot.lane.b32.xlu0 %v4208_v58, %s4540_s21 }
 0xf5b   :  { %v4210_v59 = vpop.eup %4209 }
 0xf5c   :  { %922 = vrot.lane.b32.xlu1 %v4210_v59, %s4540_s21 }
 0xfcc   :  { %v925_v61 = vpop.permute.xlu0 %924 }
 0xfcd   :  { %v929_v62 = vmul.f32 %v4204_v46, %v925_v61 }
 0xfce   :  { %v923_v63 = vpop.permute.xlu1 %922 }
 0xfcf   :  { %946 = vrot.lane.b32.xlu0 %v929_v62, %s4542_s22  ;;  %v928_v1 = vmul.f32 %v4206_v49, %v923_v63 }
 0xfd1   :  { %944 = vrot.lane.b32.xlu1 %v928_v1, %s4542_s22 }
 0xfd3   :  { %935 = vperm.xlu0 %4044, %v4624_v4  }
 0xfd5   :  { %931 = vperm.xlu1 %4043, %v4616_v3  }
 0xfd7   :  { %4045 = vset.pattern.permute.xlu0 %v4548_v41 }
 0xfd9   :  { %4046 = vset.pattern.permute.xlu1 %v4548_v41 }
0x1041   :  { %v947_v7 = vpop.permute.xlu0 %946 }
0x1043   :  { %v945_v5 = vpop.permute.xlu1 %944 }
0x1044   :  { %3963 = vmatprep.mubr.msk.f32.mxu0 %vm66_vm0, %v945_v5 }
0x1045   :  { %3964 = vmatmul.mubr.msk.f32.vlgmr.msra.gmra.mxu0 %vm66_vm0, %v947_v7 }
0x1046   :  { %3972 = vmatpush3.msra.mxu0 %v4610_v0 }
0x1047   :  { %3981 = vmatprep.subr.mxu0 %v4610_v0 }
0x104e   :  { %v936_v9 = vpop.permute.xlu0 %935 }
0x104f   :  { %v939_v12 = vmul.f32 %v4636_v6, %v936_v9 }
0x1050   :  { %v932_v8 = vpop.permute.xlu1 %931 }
0x1051   :  { %v938_v11 = vmul.f32 %v4636_v6, %v932_v8  ;;  %v941_v15 = vadd.f32 %v4643_v10, %v939_v12 }
0x1053   :  { %v940_v13 = vadd.f32 %v4643_v10, %v938_v11 }
0x1105   :  { %v3965_v14 = vpop.f32.mrf.mxu0 }
0x1106   :  { %v1028_v18 = vadd.f32 %v3965_v14, %v941_v15 }
0x1107   :  { %v1018_v16 = vpop.f32.mrf.mxu0 }
0x1108   :  { %v1027_v17 = vadd.f32 %v1018_v16, %v940_v13  ;;  %v3780_v22 = vmul.f32 -1.442695, %v1028_v18 }
0x110a   :  { %4211 = vtanh.f32 %v1027_v17  ;;  %v3779_v21 = vmul.f32 -1.442695, %v1027_v17 }
0x110b   :  { %4213 = vtanh.f32 %v1028_v18  ;;  %v4549_v18 = vmov 8  }
0x110c   :  { %4215 = vpow2.f32 %v3779_v21 }
0x110d   :  { %4217 = vpow2.f32 %v3780_v22 }
0x1117   :  { %v4212_v19 = vpop.eup %4211 }
0x1118   :  { %1047 = vrot.lane.b32.xlu1 %v4212_v19, %s4538_s19  ;;  %v4214_v20 = vpop.eup %4213 }
0x1119   :  { %v4216_v23 = vpop.eup %4215 }
0x111a   :  { %v1035_v24 = vadd.f32 1.0, %v4216_v23  ;;  %v4218_v25 = vpop.eup %4217  ;;  %v4815_v23 = vld [vmem:[%s5596_s0 + $0x8] sm:$0xff] }
0x111b   :  { %v1036_v26 = vadd.f32 1.0, %v4218_v25 }
0x111c   :  { %1049 = vrot.lane.b32.xlu1 %v4214_v20, %s4538_s19  ;;  %4219 = vrcp.f32 %v1035_v24  ;;  %v4821_v24 = vld [vmem:[%s5596_s0] sm:$0xff] }
0x111d   :  { %4221 = vrcp.f32 %v1036_v26 }
0x1129   :  { %v4220_v27 = vpop.eup %4219 }
0x112a   :  { %v4222_v30 = vpop.eup %4221  ;;  %v1043_v33 = vmul.f32 %v4220_v27, %v916_v57 }
0x112b   :  { %v1044_v36 = vmul.f32 %v4222_v30, %v4760_v54 }
0x118a   :  { %v1048_v28 = vpop.permute.xlu1 %1047 }
0x118b   :  { %v1053_v29 = vmul.f32 %v4220_v27, %v1048_v28 }
0x118d   :  { %1057 = vrot.lane.b32.xlu0 %v1053_v29, %s4539_s20 }
0x118e   :  { %v1050_v31 = vpop.permute.xlu1 %1049 }
0x118f   :  { %v1054_v32 = vmul.f32 %v4222_v30, %v1050_v31 }
0x1191   :  { %1059 = vrot.lane.b32.xlu1 %v1054_v32, %s4539_s20 }
0x11ff   :  { %v1058_v34 = vpop.permute.xlu0 %1057 }
0x1200   :  { %v4782_v35 = vadd.f32 %v1058_v34, %v1043_v33 }
0x1202   :  { %4223 = vtanh.f32 %v4782_v35 }
0x1203   :  { %v1060_v37 = vpop.permute.xlu1 %1059 }
0x1204   :  { %v1064_v38 = vadd.f32 %v1060_v37, %v1044_v36 }
0x1206   :  { %4225 = vtanh.f32 %v1064_v38 }
0x120f   :  { %v4224_v39 = vpop.eup %4223 }
0x1210   :  { %1069 = vrot.lane.b32.xlu0 %v4224_v39, %s4540_s21 }
0x1213   :  { %v4226_v40 = vpop.eup %4225 }
0x1214   :  { %1071 = vrot.lane.b32.xlu1 %v4226_v40, %s4540_s21 }
0x1282   :  { %v1070_v42 = vpop.permute.xlu0 %1069 }
0x1283   :  { %v1075_v43 = vmul.f32 %v4220_v27, %v1070_v42  ;;  %v4829_v27 = vld [vmem:[%s5595_s2] sm:$0xff] }
0x1285   :  { %1091 = vrot.lane.b32.xlu0 %v1075_v43, %s4542_s22 }
0x1286   :  { %v1072_v44 = vpop.permute.xlu1 %1071 }
0x1287   :  { %v1076_v45 = vmul.f32 %v4222_v30, %v1072_v44  ;;  %v4836_v30 = vld [vmem:[%s5597_s1] ss:$0 sm:$0xff] }
0x1289   :  { %1093 = vrot.lane.b32.xlu1 %v1076_v45, %s4542_s22  ;;  %1078 = vperm.xlu0 %4045, %v4616_v3  }
0x128d   :  { %1082 = vperm.xlu1 %4046, %v4624_v4   ;;  %4048 = vset.pattern.permute.xlu0 %v4549_v18 }
0x1291   :  { %4047 = vset.pattern.permute.xlu1 %v4549_v18 }
0x12f7   :  { %v1092_v46 = vpop.permute.xlu0 %1091 }
0x12f8   :  { %3968 = vmatprep.mubr.msk.f32.mxu1 %vm66_vm0, %v1092_v46 }
0x12fb   :  { %v1094_v47 = vpop.permute.xlu1 %1093 }
0x12fc   :  { %3969 = vmatmul.mubr.msk.f32.vlgmr.msra.gmra.mxu1 %vm66_vm0, %v1094_v47 }
0x12fd   :  { %3977 = vmatpush3.msra.mxu1 %v4610_v0 }
0x12fe   :  { %3986 = vmatprep.subr.mxu1 %v4610_v0 }
0x1304   :  { %v1079_v49 = vpop.permute.xlu0 %1078 }
0x1305   :  { %v1085_v51 = vmul.f32 %v4636_v6, %v1079_v49 }
0x1307   :  { %v1087_v4 = vadd.f32 %v4643_v10, %v1085_v51 }
0x1308   :  { %v1083_v48 = vpop.permute.xlu1 %1082 }
0x1309   :  { %v1086_v50 = vmul.f32 %v4636_v6, %v1083_v48 }
0x130b   :  { %v1088_v3 = vadd.f32 %v4643_v10, %v1086_v50 }
0x13bc   :  { %v3970_v52 = vpop.f32.mrf.mxu1 }
0x13bd   :  { %v1175_v53 = vadd.f32 %v3970_v52, %v1088_v3 }
0x13be   :  { %v1165_v54 = vpop.f32.mrf.mxu1 }
0x13bf   :  { %4227 = vtanh.f32 %v1175_v53  ;;  %v1174_v55 = vadd.f32 %v1165_v54, %v1087_v4  ;;  %v3784_v57 = vmul.f32 -1.442695, %v1175_v53 }
0x13c1   :  { %4229 = vtanh.f32 %v1174_v55  ;;  %v3783_v58 = vmul.f32 -1.442695, %v1174_v55 }
0x13c2   :  { %4231 = vpow2.f32 %v3784_v57 }
0x13c3   :  { %4233 = vpow2.f32 %v3783_v58  ;;  %v4550_v58 = vmov 9  }
0x13cc   :  { %v4228_v56 = vpop.eup %4227 }
0x13cd   :  { %1196 = vrot.lane.b32.xlu0 %v4228_v56, %s4538_s19 }
0x13ce   :  { %v4230_v0 = vpop.eup %4229 }
0x13cf   :  { %1194 = vrot.lane.b32.xlu1 %v4230_v0, %s4538_s19  ;;  %v4232_v6 = vpop.eup %4231 }
0x13d0   :  { %v4234_v59 = vpop.eup %4233  ;;  %v1183_v60 = vadd.f32 1.0, %v4232_v6 }
0x13d1   :  { %v1182_v61 = vadd.f32 1.0, %v4234_v59 }
0x13d2   :  { %4235 = vrcp.f32 %v1183_v60 }
0x13d3   :  { %4237 = vrcp.f32 %v1182_v61 }
0x13df   :  { %v4236_v62 = vpop.eup %4235 }
0x13e0   :  { %v4238_v5 = vpop.eup %4237  ;;  %v1191_v9 = vmul.f32 %v4236_v62, %v1064_v38 }
0x13e1   :  { %v1190_v13 = vmul.f32 %v4238_v5, %v4782_v35  ;;  %v4844_v35 = vld [vmem:[%s5598_s3] ss:$0 sm:$0xff] }
0x143f   :  { %v1197_v63 = vpop.permute.xlu0 %1196 }
0x1440   :  { %v1201_v1 = vmul.f32 %v4236_v62, %v1197_v63 }
0x1441   :  { %v1195_v7 = vpop.permute.xlu1 %1194 }
0x1442   :  { %1206 = vrot.lane.b32.xlu0 %v1201_v1, %s4539_s20  ;;  %v1200_v8 = vmul.f32 %v4238_v5, %v1195_v7 }
0x1444   :  { %1204 = vrot.lane.b32.xlu1 %v1200_v8, %s4539_s20 }
0x14b4   :  { %v1207_v11 = vpop.permute.xlu0 %1206 }
0x14b5   :  { %v4804_v12 = vadd.f32 %v1207_v11, %v1191_v9 }
0x14b6   :  { %v1205_v14 = vpop.permute.xlu1 %1204 }
0x14b7   :  { %4239 = vtanh.f32 %v4804_v12  ;;  %v1210_v15 = vadd.f32 %v1205_v14, %v1190_v13 }
0x14b9   :  { %4241 = vtanh.f32 %v1210_v15 }
0x14c4   :  { %v4240_v16 = vpop.eup %4239 }
0x14c5   :  { %1218 = vrot.lane.b32.xlu0 %v4240_v16, %s4540_s21 }
0x14c6   :  { %v4242_v17 = vpop.eup %4241 }
0x14c7   :  { %1216 = vrot.lane.b32.xlu1 %v4242_v17, %s4540_s21 }
0x1537   :  { %v1219_v19 = vpop.permute.xlu0 %1218 }
0x1538   :  { %v1223_v20 = vmul.f32 %v4236_v62, %v1219_v19 }
0x1539   :  { %v1217_v21 = vpop.permute.xlu1 %1216 }
0x153a   :  { %1240 = vrot.lane.b32.xlu0 %v1223_v20, %s4542_s22  ;;  %v1222_v22 = vmul.f32 %v4238_v5, %v1217_v21 }
0x153c   :  { %1238 = vrot.lane.b32.xlu1 %v1222_v22, %s4542_s22 }
0x153e   :  { %1229 = vperm.xlu0 %4048, %v4815_v23  }
0x1540   :  { %1225 = vperm.xlu1 %4047, %v4821_v24  }
0x1542   :  { %4049 = vset.pattern.permute.xlu0 %v4550_v58 }
0x1544   :  { %4050 = vset.pattern.permute.xlu1 %v4550_v58 }
0x15ac   :  { %v1241_v26 = vpop.permute.xlu0 %1240 }
0x15ae   :  { %v1239_v25 = vpop.permute.xlu1 %1238 }
0x15af   :  { %3973 = vmatprep.mubr.msk.f32.mxu0 %vm66_vm0, %v1239_v25 }
0x15b0   :  { %3974 = vmatmul.mubr.msk.f32.vlgmr.msra.gmra.mxu0 %vm66_vm0, %v1241_v26 }
0x15b1   :  { %3982 = vmatpush3.msra.mxu0 %v4829_v27 }
0x15b2   :  { %3991 = vmatprep.subr.mxu0 %v4829_v27 }
0x15b9   :  { %v1230_v29 = vpop.permute.xlu0 %1229 }
0x15ba   :  { %v1233_v32 = vmul.f32 %v4836_v30, %v1230_v29 }
0x15bb   :  { %v1226_v28 = vpop.permute.xlu1 %1225 }
0x15bc   :  { %v1232_v31 = vmul.f32 %v4836_v30, %v1226_v28  ;;  %v1235_v36 = vadd.f32 %v4844_v35, %v1233_v32 }
0x15be   :  { %v1234_v33 = vadd.f32 %v4643_v10, %v1232_v31 }
0x1670   :  { %v3975_v34 = vpop.f32.mrf.mxu0 }
0x1671   :  { %v1322_v39 = vadd.f32 %v3975_v34, %v1235_v36 }
0x1672   :  { %v1312_v37 = vpop.f32.mrf.mxu0 }
0x1673   :  { %v1321_v38 = vadd.f32 %v1312_v37, %v1234_v33  ;;  %v3788_v42 = vmul.f32 -1.442695, %v1322_v39 }
0x1675   :  { %4243 = vtanh.f32 %v1321_v38  ;;  %v3787_v10 = vmul.f32 -1.442695, %v1321_v38 }
0x1676   :  { %4245 = vtanh.f32 %v1322_v39 }
0x1677   :  { %4247 = vpow2.f32 %v3787_v10 }
0x1678   :  { %4249 = vpow2.f32 %v3788_v42  ;;  %v4551_v42 = vmov 10  }
0x1682   :  { %v4244_v40 = vpop.eup %4243 }
0x1683   :  { %1341 = vrot.lane.b32.xlu1 %v4244_v40, %s4538_s19  ;;  %v4246_v41 = vpop.eup %4245 }
0x1684   :  { %v4248_v43 = vpop.eup %4247 }
0x1685   :  { %v1329_v44 = vadd.f32 1.0, %v4248_v43  ;;  %v4250_v45 = vpop.eup %4249 }
0x1686   :  { %v1330_v46 = vadd.f32 1.0, %v4250_v45 }
0x1687   :  { %1343 = vrot.lane.b32.xlu1 %v4246_v41, %s4538_s19  ;;  %4251 = vrcp.f32 %v1329_v44 }
0x1688   :  { %4253 = vrcp.f32 %v1330_v46 }
0x1694   :  { %v4252_v47 = vpop.eup %4251 }
0x1695   :  { %v4254_v50 = vpop.eup %4253  ;;  %v1337_v4 = vmul.f32 %v4252_v47, %v1210_v15 }
0x1696   :  { %v1338_v54 = vmul.f32 %v4254_v50, %v4804_v12 }
0x16f5   :  { %v1342_v48 = vpop.permute.xlu1 %1341 }
0x16f6   :  { %v1347_v49 = vmul.f32 %v4252_v47, %v1342_v48 }
0x16f8   :  { %1351 = vrot.lane.b32.xlu0 %v1347_v49, %s4539_s20 }
0x16f9   :  { %v1344_v51 = vpop.permute.xlu1 %1343 }
0x16fa   :  { %v1348_v3 = vmul.f32 %v4254_v50, %v1344_v51 }
0x16fc   :  { %1353 = vrot.lane.b32.xlu1 %v1348_v3, %s4539_s20 }
0x176a   :  { %v1352_v52 = vpop.permute.xlu0 %1351 }
0x176b   :  { %v4851_v53 = vadd.f32 %v1352_v52, %v1337_v4 }
0x176d   :  { %4255 = vtanh.f32 %v4851_v53 }
0x176e   :  { %v1354_v55 = vpop.permute.xlu1 %1353 }
0x176f   :  { %v1358_v56 = vadd.f32 %v1354_v55, %v1338_v54 }
0x1771   :  { %4257 = vtanh.f32 %v1358_v56 }
0x177a   :  { %v4256_v0 = vpop.eup %4255 }
0x177b   :  { %1363 = vrot.lane.b32.xlu0 %v4256_v0, %s4540_s21 }
0x177e   :  { %v4258_v57 = vpop.eup %4257 }
0x177f   :  { %1365 = vrot.lane.b32.xlu1 %v4258_v57, %s4540_s21 }
0x17ed   :  { %v1364_v6 = vpop.permute.xlu0 %1363 }
0x17ee   :  { %v1369_v59 = vmul.f32 %v4252_v47, %v1364_v6 }
0x17f0   :  { %1385 = vrot.lane.b32.xlu0 %v1369_v59, %s4542_s22 }
0x17f1   :  { %v1366_v60 = vpop.permute.xlu1 %1365 }
0x17f2   :  { %v1370_v61 = vmul.f32 %v4254_v50, %v1366_v60 }
0x17f4   :  { %1387 = vrot.lane.b32.xlu1 %v1370_v61, %s4542_s22  ;;  %1372 = vperm.xlu0 %4049, %v4821_v24  }
0x17f8   :  { %1376 = vperm.xlu1 %4050, %v4815_v23   ;;  %4052 = vset.pattern.permute.xlu0 %v4551_v42 }
0x17fc   :  { %4051 = vset.pattern.permute.xlu1 %v4551_v42 }
0x1862   :  { %v1386_v62 = vpop.permute.xlu0 %1385 }
0x1863   :  { %3978 = vmatprep.mubr.msk.f32.mxu1 %vm66_vm0, %v1386_v62 }
0x1866   :  { %v1388_v63 = vpop.permute.xlu1 %1387 }
0x1867   :  { %3979 = vmatmul.mubr.msk.f32.vlgmr.msra.gmra.mxu1 %vm66_vm0, %v1388_v63 }
0x1868   :  { %3987 = vmatpush3.msra.mxu1 %v4829_v27 }
0x1869   :  { %3996 = vmatprep.subr.mxu1 %v4829_v27 }
0x186f   :  { %v1373_v5 = vpop.permute.xlu0 %1372 }
0x1870   :  { %v1379_v8 = vmul.f32 %v4836_v30, %v1373_v5 }
0x1872   :  { %v1381_v11 = vadd.f32 %v4844_v35, %v1379_v8 }
0x1873   :  { %v1377_v1 = vpop.permute.xlu1 %1376 }
0x1874   :  { %v1380_v7 = vmul.f32 %v4836_v30, %v1377_v1 }
0x1876   :  { %v1382_v9 = vadd.f32 %v4844_v35, %v1380_v7 }
0x1927   :  { %v3980_v12 = vpop.f32.mrf.mxu1 }
0x1928   :  { %v1469_v13 = vadd.f32 %v3980_v12, %v1382_v9 }
0x1929   :  { %v1459_v14 = vpop.f32.mrf.mxu1 }
0x192a   :  { %4259 = vtanh.f32 %v1469_v13  ;;  %v1468_v15 = vadd.f32 %v1459_v14, %v1381_v11  ;;  %v3792_v18 = vmul.f32 -1.442695, %v1469_v13 }
0x192c   :  { %4261 = vtanh.f32 %v1468_v15  ;;  %v3791_v19 = vmul.f32 -1.442695, %v1468_v15 }
0x192d   :  { %4263 = vpow2.f32 %v3792_v18 }
0x192e   :  { %4265 = vpow2.f32 %v3791_v19  ;;  %v4552_v19 = vmov 11  }
0x1937   :  { %v4260_v16 = vpop.eup %4259 }
0x1938   :  { %1490 = vrot.lane.b32.xlu0 %v4260_v16, %s4538_s19 }
0x1939   :  { %v4262_v17 = vpop.eup %4261 }
0x193a   :  { %1488 = vrot.lane.b32.xlu1 %v4262_v17, %s4538_s19  ;;  %v4264_v20 = vpop.eup %4263 }
0x193b   :  { %v4266_v21 = vpop.eup %4265  ;;  %v1477_v22 = vadd.f32 1.0, %v4264_v20 }
0x193c   :  { %v1476_v25 = vadd.f32 1.0, %v4266_v21 }
0x193d   :  { %4267 = vrcp.f32 %v1477_v22 }
0x193e   :  { %4269 = vrcp.f32 %v1476_v25 }
0x194a   :  { %v4268_v26 = vpop.eup %4267 }
0x194b   :  { %v4270_v31 = vpop.eup %4269  ;;  %v1485_v34 = vmul.f32 %v4268_v26, %v1358_v56 }
0x194c   :  { %v1484_v38 = vmul.f32 %v4270_v31, %v4851_v53 }
0x19aa   :  { %v1491_v28 = vpop.permute.xlu0 %1490 }
0x19ab   :  { %v1495_v29 = vmul.f32 %v4268_v26, %v1491_v28 }
0x19ac   :  { %v1489_v32 = vpop.permute.xlu1 %1488 }
0x19ad   :  { %1500 = vrot.lane.b32.xlu0 %v1495_v29, %s4539_s20  ;;  %v1494_v33 = vmul.f32 %v4270_v31, %v1489_v32 }
0x19af   :  { %1498 = vrot.lane.b32.xlu1 %v1494_v33, %s4539_s20 }
0x1a1f   :  { %v1501_v36 = vpop.permute.xlu0 %1500 }
0x1a20   :  { %v4873_v37 = vadd.f32 %v1501_v36, %v1485_v34 }
0x1a21   :  { %v1499_v39 = vpop.permute.xlu1 %1498 }
0x1a22   :  { %4271 = vtanh.f32 %v4873_v37  ;;  %v1504_v40 = vadd.f32 %v1499_v39, %v1484_v38 }
0x1a24   :  { %4273 = vtanh.f32 %v1504_v40 }
0x1a2f   :  { %v4272_v41 = vpop.eup %4271 }
0x1a30   :  { %1512 = vrot.lane.b32.xlu0 %v4272_v41, %s4540_s21 }
0x1a31   :  { %v4274_v10 = vpop.eup %4273 }
0x1a32   :  { %1510 = vrot.lane.b32.xlu1 %v4274_v10, %s4540_s21 }
0x1aa2   :  { %v1513_v43 = vpop.permute.xlu0 %1512 }
0x1aa3   :  { %v1517_v44 = vmul.f32 %v4268_v26, %v1513_v43 }
0x1aa4   :  { %v1511_v45 = vpop.permute.xlu1 %1510 }
0x1aa5   :  { %1534 = vrot.lane.b32.xlu0 %v1517_v44, %s4542_s22  ;;  %v1516_v46 = vmul.f32 %v4270_v31, %v1511_v45 }
0x1aa7   :  { %1532 = vrot.lane.b32.xlu1 %v1516_v46, %s4542_s22 }
0x1aa9   :  { %1523 = vperm.xlu0 %4052, %v4815_v23  }
0x1aab   :  { %1519 = vperm.xlu1 %4051, %v4821_v24  }
0x1aad   :  { %4053 = vset.pattern.permute.xlu0 %v4552_v19 }
0x1aaf   :  { %4054 = vset.pattern.permute.xlu1 %v4552_v19 }
0x1b17   :  { %v1535_v48 = vpop.permute.xlu0 %1534 }
0x1b19   :  { %v1533_v47 = vpop.permute.xlu1 %1532 }
0x1b1a   :  { %3983 = vmatprep.mubr.msk.f32.mxu0 %vm66_vm0, %v1533_v47 }
0x1b1b   :  { %3984 = vmatmul.mubr.msk.f32.vlgmr.msra.gmra.mxu0 %vm66_vm0, %v1535_v48 }
0x1b1c   :  { %3992 = vmatpush3.msra.mxu0 %v4829_v27 }
0x1b1d   :  { %4001 = vmatprep.subr.mxu0 %v4829_v27 }
0x1b24   :  { %v1524_v50 = vpop.permute.xlu0 %1523 }
0x1b25   :  { %v1527_v3 = vmul.f32 %v4836_v30, %v1524_v50 }
0x1b26   :  { %v1520_v49 = vpop.permute.xlu1 %1519 }
0x1b27   :  { %v1526_v51 = vmul.f32 %v4836_v30, %v1520_v49  ;;  %v1529_v53 = vadd.f32 %v4844_v35, %v1527_v3 }
0x1b29   :  { %v1528_v4 = vadd.f32 %v4844_v35, %v1526_v51 }
0x1bdb   :  { %v3985_v52 = vpop.f32.mrf.mxu0 }
0x1bdc   :  { %v1616_v56 = vadd.f32 %v3985_v52, %v1529_v53 }
0x1bdd   :  { %v1606_v54 = vpop.f32.mrf.mxu0 }
0x1bde   :  { %v1615_v55 = vadd.f32 %v1606_v54, %v1528_v4  ;;  %v3796_v6 = vmul.f32 -1.442695, %v1616_v56 }
0x1be0   :  { %4275 = vtanh.f32 %v1615_v55  ;;  %v3795_v58 = vmul.f32 -1.442695, %v1615_v55 }
0x1be1   :  { %4277 = vtanh.f32 %v1616_v56 }
0x1be2   :  { %4279 = vpow2.f32 %v3795_v58 }
0x1be3   :  { %4281 = vpow2.f32 %v3796_v6  ;;  %v4553_v6 = vmov 12  }
0x1bed   :  { %v4276_v0 = vpop.eup %4275 }
0x1bee   :  { %1635 = vrot.lane.b32.xlu1 %v4276_v0, %s4538_s19  ;;  %v4278_v57 = vpop.eup %4277 }
0x1bef   :  { %v4280_v59 = vpop.eup %4279 }
0x1bf0   :  { %v1623_v60 = vadd.f32 1.0, %v4280_v59  ;;  %v4282_v61 = vpop.eup %4281 }
0x1bf1   :  { %v1624_v62 = vadd.f32 1.0, %v4282_v61 }
0x1bf2   :  { %1637 = vrot.lane.b32.xlu1 %v4278_v57, %s4538_s19  ;;  %4283 = vrcp.f32 %v1623_v60 }
0x1bf3   :  { %4285 = vrcp.f32 %v1624_v62 }
0x1bff   :  { %v4284_v63 = vpop.eup %4283 }
0x1c00   :  { %v4286_v7 = vpop.eup %4285  ;;  %v1631_v11 = vmul.f32 %v4284_v63, %v1504_v40 }
0x1c01   :  { %v1632_v14 = vmul.f32 %v4286_v7, %v4873_v37 }
0x1c60   :  { %v1636_v1 = vpop.permute.xlu1 %1635 }
0x1c61   :  { %v1641_v5 = vmul.f32 %v4284_v63, %v1636_v1 }
0x1c63   :  { %1645 = vrot.lane.b32.xlu0 %v1641_v5, %s4539_s20 }
0x1c64   :  { %v1638_v8 = vpop.permute.xlu1 %1637 }
0x1c65   :  { %v1642_v9 = vmul.f32 %v4286_v7, %v1638_v8 }
0x1c67   :  { %1647 = vrot.lane.b32.xlu1 %v1642_v9, %s4539_s20 }
0x1cd5   :  { %v1646_v12 = vpop.permute.xlu0 %1645 }
0x1cd6   :  { %v4895_v13 = vadd.f32 %v1646_v12, %v1631_v11 }
0x1cd8   :  { %4287 = vtanh.f32 %v4895_v13 }
0x1cd9   :  { %v1648_v15 = vpop.permute.xlu1 %1647 }
0x1cda   :  { %v1652_v16 = vadd.f32 %v1648_v15, %v1632_v14 }
0x1cdc   :  { %4289 = vtanh.f32 %v1652_v16 }
0x1ce5   :  { %v4288_v17 = vpop.eup %4287 }
0x1ce6   :  { %1657 = vrot.lane.b32.xlu0 %v4288_v17, %s4540_s21 }
0x1ce9   :  { %v4290_v18 = vpop.eup %4289 }
0x1cea   :  { %1659 = vrot.lane.b32.xlu1 %v4290_v18, %s4540_s21 }
0x1d58   :  { %v1658_v20 = vpop.permute.xlu0 %1657 }
0x1d59   :  { %v1663_v21 = vmul.f32 %v4284_v63, %v1658_v20 }
0x1d5b   :  { %1679 = vrot.lane.b32.xlu0 %v1663_v21, %s4542_s22 }
0x1d5c   :  { %v1660_v22 = vpop.permute.xlu1 %1659 }
0x1d5d   :  { %v1664_v25 = vmul.f32 %v4286_v7, %v1660_v22 }
0x1d5f   :  { %1681 = vrot.lane.b32.xlu1 %v1664_v25, %s4542_s22  ;;  %1666 = vperm.xlu0 %4053, %v4821_v24  }
0x1d63   :  { %1670 = vperm.xlu1 %4054, %v4815_v23   ;;  %4056 = vset.pattern.permute.xlu0 %v4553_v6 }
0x1d67   :  { %4055 = vset.pattern.permute.xlu1 %v4553_v6 }
0x1dcd   :  { %v1680_v26 = vpop.permute.xlu0 %1679 }
0x1dce   :  { %3988 = vmatprep.mubr.msk.f32.mxu1 %vm66_vm0, %v1680_v26 }
0x1dd1   :  { %v1682_v28 = vpop.permute.xlu1 %1681 }
0x1dd2   :  { %3989 = vmatmul.mubr.msk.f32.vlgmr.msra.gmra.mxu1 %vm66_vm0, %v1682_v28 }
0x1dd3   :  { %3997 = vmatpush3.msra.mxu1 %v4829_v27 }
0x1dd4   :  { %4006 = vmatprep.subr.mxu1 %v4829_v27 }
0x1dda   :  { %v1667_v31 = vpop.permute.xlu0 %1666 }
0x1ddb   :  { %v1673_v33 = vmul.f32 %v4836_v30, %v1667_v31 }
0x1ddd   :  { %v1675_v36 = vadd.f32 %v4844_v35, %v1673_v33 }
0x1dde   :  { %v1671_v29 = vpop.permute.xlu1 %1670 }
0x1ddf   :  { %v1674_v32 = vmul.f32 %v4836_v30, %v1671_v29 }
0x1de1   :  { %v1676_v34 = vadd.f32 %v4844_v35, %v1674_v32 }
0x1e92   :  { %v3990_v37 = vpop.f32.mrf.mxu1 }
0x1e93   :  { %v1763_v38 = vadd.f32 %v3990_v37, %v1676_v34 }
0x1e94   :  { %v1753_v39 = vpop.f32.mrf.mxu1 }
0x1e95   :  { %4291 = vtanh.f32 %v1763_v38  ;;  %v1762_v40 = vadd.f32 %v1753_v39, %v1675_v36  ;;  %v3800_v42 = vmul.f32 -1.442695, %v1763_v38 }
0x1e97   :  { %4293 = vtanh.f32 %v1762_v40  ;;  %v3799_v43 = vmul.f32 -1.442695, %v1762_v40 }
0x1e98   :  { %4295 = vpow2.f32 %v3800_v42 }
0x1e99   :  { %4297 = vpow2.f32 %v3799_v43  ;;  %v4554_v43 = vmov 13  }
0x1ea2   :  { %v4292_v41 = vpop.eup %4291 }
0x1ea3   :  { %1784 = vrot.lane.b32.xlu0 %v4292_v41, %s4538_s19 }
0x1ea4   :  { %v4294_v10 = vpop.eup %4293 }
0x1ea5   :  { %1782 = vrot.lane.b32.xlu1 %v4294_v10, %s4538_s19  ;;  %v4296_v44 = vpop.eup %4295 }
0x1ea6   :  { %v4298_v45 = vpop.eup %4297  ;;  %v1771_v46 = vadd.f32 1.0, %v4296_v44 }
0x1ea7   :  { %v1770_v47 = vadd.f32 1.0, %v4298_v45 }
0x1ea8   :  { %4299 = vrcp.f32 %v1771_v46 }
0x1ea9   :  { %4301 = vrcp.f32 %v1770_v47 }
0x1eb5   :  { %v4300_v48 = vpop.eup %4299 }
0x1eb6   :  { %v4302_v51 = vpop.eup %4301  ;;  %v1779_v52 = vmul.f32 %v4300_v48, %v1652_v16 }
0x1eb7   :  { %v1778_v55 = vmul.f32 %v4302_v51, %v4895_v13 }
0x1f15   :  { %v1785_v49 = vpop.permute.xlu0 %1784 }
0x1f16   :  { %v1789_v50 = vmul.f32 %v4300_v48, %v1785_v49 }
0x1f17   :  { %v1783_v3 = vpop.permute.xlu1 %1782 }
0x1f18   :  { %1794 = vrot.lane.b32.xlu0 %v1789_v50, %s4539_s20  ;;  %v1788_v4 = vmul.f32 %v4302_v51, %v1783_v3 }
0x1f1a   :  { %1792 = vrot.lane.b32.xlu1 %v1788_v4, %s4539_s20 }
0x1f8a   :  { %v1795_v53 = vpop.permute.xlu0 %1794 }
0x1f8b   :  { %v4917_v54 = vadd.f32 %v1795_v53, %v1779_v52 }
0x1f8c   :  { %v1793_v56 = vpop.permute.xlu1 %1792 }
0x1f8d   :  { %4303 = vtanh.f32 %v4917_v54  ;;  %v1798_v0 = vadd.f32 %v1793_v56, %v1778_v55 }
0x1f8f   :  { %4305 = vtanh.f32 %v1798_v0 }
0x1f9a   :  { %v4304_v57 = vpop.eup %4303 }
0x1f9b   :  { %1806 = vrot.lane.b32.xlu0 %v4304_v57, %s4540_s21 }
0x1f9c   :  { %v4306_v58 = vpop.eup %4305 }
0x1f9d   :  { %1804 = vrot.lane.b32.xlu1 %v4306_v58, %s4540_s21 }
0x200d   :  { %v1807_v59 = vpop.permute.xlu0 %1806 }
0x200e   :  { %v1811_v60 = vmul.f32 %v4300_v48, %v1807_v59 }
0x200f   :  { %v1805_v61 = vpop.permute.xlu1 %1804 }
0x2010   :  { %1828 = vrot.lane.b32.xlu0 %v1811_v60, %s4542_s22  ;;  %v1810_v62 = vmul.f32 %v4302_v51, %v1805_v61 }
0x2012   :  { %1826 = vrot.lane.b32.xlu1 %v1810_v62, %s4542_s22 }
0x2014   :  { %1817 = vperm.xlu0 %4056, %v4815_v23  }
0x2016   :  { %1813 = vperm.xlu1 %4055, %v4821_v24  }
0x2018   :  { %4057 = vset.pattern.permute.xlu0 %v4554_v43 }
0x201a   :  { %4058 = vset.pattern.permute.xlu1 %v4554_v43 }
0x2082   :  { %v1829_v1 = vpop.permute.xlu0 %1828 }
0x2084   :  { %v1827_v63 = vpop.permute.xlu1 %1826 }
0x2085   :  { %3993 = vmatprep.mubr.msk.f32.mxu0 %vm66_vm0, %v1827_v63 }
0x2086   :  { %3994 = vmatmul.mubr.msk.f32.vlgmr.msra.gmra.mxu0 %vm66_vm0, %v1829_v1 }
0x2087   :  { %4002 = vmatpush3.msra.mxu0 %v4829_v27 }
0x208f   :  { %v1818_v7 = vpop.permute.xlu0 %1817 }
0x2090   :  { %v1821_v9 = vmul.f32 %v4836_v30, %v1818_v7 }
0x2091   :  { %v1814_v5 = vpop.permute.xlu1 %1813 }
0x2092   :  { %v1820_v8 = vmul.f32 %v4836_v30, %v1814_v5  ;;  %v1823_v13 = vadd.f32 %v4844_v35, %v1821_v9 }
0x2094   :  { %v1822_v11 = vadd.f32 %v4844_v35, %v1820_v8 }
0x2146   :  { %v3995_v12 = vpop.f32.mrf.mxu0 }
0x2147   :  { %v1910_v16 = vadd.f32 %v3995_v12, %v1823_v13 }
0x2148   :  { %v1900_v14 = vpop.f32.mrf.mxu0 }
0x2149   :  { %v1909_v15 = vadd.f32 %v1900_v14, %v1822_v11  ;;  %v3804_v20 = vmul.f32 -1.442695, %v1910_v16 }
0x214b   :  { %4307 = vtanh.f32 %v1909_v15  ;;  %v3803_v19 = vmul.f32 -1.442695, %v1909_v15 }
0x214c   :  { %4309 = vtanh.f32 %v1910_v16 }
0x214d   :  { %4311 = vpow2.f32 %v3803_v19  ;;  %v4555_v19 = vmov 14  }
0x214e   :  { %4313 = vpow2.f32 %v3804_v20 }
0x2158   :  { %v4308_v17 = vpop.eup %4307 }
0x2159   :  { %1929 = vrot.lane.b32.xlu1 %v4308_v17, %s4538_s19  ;;  %v4310_v18 = vpop.eup %4309 }
0x215a   :  { %v4312_v21 = vpop.eup %4311 }
0x215b   :  { %v1917_v22 = vadd.f32 1.0, %v4312_v21  ;;  %v4314_v25 = vpop.eup %4313 }
0x215c   :  { %v1918_v26 = vadd.f32 1.0, %v4314_v25 }
0x215d   :  { %1931 = vrot.lane.b32.xlu1 %v4310_v18, %s4538_s19  ;;  %4315 = vrcp.f32 %v1917_v22 }
0x215e   :  { %4317 = vrcp.f32 %v1918_v26 }
0x216a   :  { %v4316_v28 = vpop.eup %4315 }
0x216b   :  { %v4318_v32 = vpop.eup %4317  ;;  %v1925_v36 = vmul.f32 %v4316_v28, %v1798_v0 }
0x216c   :  { %v1926_v39 = vmul.f32 %v4318_v32, %v4917_v54 }
0x21cb   :  { %v1930_v29 = vpop.permute.xlu1 %1929 }
0x21cc   :  { %v1935_v31 = vmul.f32 %v4316_v28, %v1930_v29 }
0x21ce   :  { %1939 = vrot.lane.b32.xlu0 %v1935_v31, %s4539_s20 }
0x21cf   :  { %v1932_v33 = vpop.permute.xlu1 %1931 }
0x21d0   :  { %v1936_v34 = vmul.f32 %v4318_v32, %v1932_v33 }
0x21d2   :  { %1941 = vrot.lane.b32.xlu1 %v1936_v34, %s4539_s20 }
0x2240   :  { %v1940_v37 = vpop.permute.xlu0 %1939 }
0x2241   :  { %v4938_v38 = vadd.f32 %v1940_v37, %v1925_v36 }
0x2243   :  { %4319 = vtanh.f32 %v4938_v38 }
0x2244   :  { %v1942_v40 = vpop.permute.xlu1 %1941 }
0x2245   :  { %v1946_v41 = vadd.f32 %v1942_v40, %v1926_v39 }
0x2247   :  { %4321 = vtanh.f32 %v1946_v41 }
0x2250   :  { %v4320_v10 = vpop.eup %4319 }
0x2251   :  { %1951 = vrot.lane.b32.xlu0 %v4320_v10, %s4540_s21 }
0x2254   :  { %v4322_v42 = vpop.eup %4321 }
0x2255   :  { %1953 = vrot.lane.b32.xlu1 %v4322_v42, %s4540_s21 }
0x22c3   :  { %v1952_v44 = vpop.permute.xlu0 %1951 }
0x22c4   :  { %v1957_v45 = vmul.f32 %v4316_v28, %v1952_v44 }
0x22c6   :  { %1973 = vrot.lane.b32.xlu0 %v1957_v45, %s4542_s22 }
0x22c7   :  { %v1954_v46 = vpop.permute.xlu1 %1953 }
0x22c8   :  { %v1958_v47 = vmul.f32 %v4318_v32, %v1954_v46 }
0x22ca   :  { %1975 = vrot.lane.b32.xlu1 %v1958_v47, %s4542_s22  ;;  %1960 = vperm.xlu0 %4057, %v4821_v24  }
0x22ce   :  { %1964 = vperm.xlu1 %4058, %v4815_v23   ;;  %4060 = vset.pattern.permute.xlu0 %v4555_v19 }
0x22d2   :  { %4059 = vset.pattern.permute.xlu1 %v4555_v19 }
0x2338   :  { %v1974_v48 = vpop.permute.xlu0 %1973 }
0x2339   :  { %3998 = vmatprep.mubr.msk.f32.mxu1 %vm66_vm0, %v1974_v48 }
0x233c   :  { %v1976_v49 = vpop.permute.xlu1 %1975 }
0x233d   :  { %3999 = vmatmul.mubr.msk.f32.vlgmr.msra.gmra.mxu1 %vm66_vm0, %v1976_v49 }
0x233e   :  { %4007 = vmatpush3.msra.mxu1 %v4829_v27 }
0x2345   :  { %v1961_v51 = vpop.permute.xlu0 %1960 }
0x2346   :  { %v1967_v4 = vmul.f32 %v4836_v30, %v1961_v51 }
0x2348   :  { %v1969_v53 = vadd.f32 %v4844_v35, %v1967_v4 }
0x2349   :  { %v1965_v50 = vpop.permute.xlu1 %1964 }
0x234a   :  { %v1968_v3 = vmul.f32 %v4836_v30, %v1965_v50 }
0x234c   :  { %v1970_v52 = vadd.f32 %v4844_v35, %v1968_v3 }
0x23fd   :  { %v4000_v54 = vpop.f32.mrf.mxu1 }
0x23fe   :  { %v2057_v55 = vadd.f32 %v4000_v54, %v1970_v52 }
0x23ff   :  { %v2047_v56 = vpop.f32.mrf.mxu1 }
0x2400   :  { %4323 = vtanh.f32 %v2057_v55  ;;  %v2056_v0 = vadd.f32 %v2047_v56, %v1969_v53  ;;  %v3808_v58 = vmul.f32 -1.442695, %v2057_v55 }
0x2402   :  { %4325 = vtanh.f32 %v2056_v0  ;;  %v3807_v6 = vmul.f32 -1.442695, %v2056_v0 }
0x2403   :  { %4327 = vpow2.f32 %v3808_v58  ;;  %v4556_v58 = vmov 15  }
0x2404   :  { %4329 = vpow2.f32 %v3807_v6 }
0x240d   :  { %v4324_v57 = vpop.eup %4323 }
0x240e   :  { %2078 = vrot.lane.b32.xlu0 %v4324_v57, %s4538_s19 }
0x240f   :  { %v4326_v27 = vpop.eup %4325 }
0x2410   :  { %2076 = vrot.lane.b32.xlu1 %v4326_v27, %s4538_s19  ;;  %v4328_v59 = vpop.eup %4327 }
0x2411   :  { %v4330_v60 = vpop.eup %4329  ;;  %v2065_v61 = vadd.f32 1.0, %v4328_v59 }
0x2412   :  { %v2064_v62 = vadd.f32 1.0, %v4330_v60 }
0x2413   :  { %4331 = vrcp.f32 %v2065_v61 }
0x2414   :  { %4333 = vrcp.f32 %v2064_v62 }
0x2420   :  { %v4332_v63 = vpop.eup %4331 }
0x2421   :  { %v4334_v7 = vpop.eup %4333  ;;  %v2073_v11 = vmul.f32 %v4332_v63, %v1946_v41 }
0x2422   :  { %v2072_v14 = vmul.f32 %v4334_v7, %v4938_v38 }
0x2480   :  { %v2079_v1 = vpop.permute.xlu0 %2078 }
0x2481   :  { %v2083_v5 = vmul.f32 %v4332_v63, %v2079_v1 }
0x2482   :  { %v2077_v8 = vpop.permute.xlu1 %2076 }
0x2483   :  { %2088 = vrot.lane.b32.xlu0 %v2083_v5, %s4539_s20  ;;  %v2082_v9 = vmul.f32 %v4334_v7, %v2077_v8 }
0x2485   :  { %2086 = vrot.lane.b32.xlu1 %v2082_v9, %s4539_s20 }
0x24f5   :  { %v2089_v12 = vpop.permute.xlu0 %2088 }
0x24f6   :  { %v4959_v13 = vadd.f32 %v2089_v12, %v2073_v11 }
0x24f7   :  { %v2087_v15 = vpop.permute.xlu1 %2086 }
0x24f8   :  { %4335 = vtanh.f32 %v4959_v13  ;;  %v2092_v16 = vadd.f32 %v2087_v15, %v2072_v14 }
0x24fa   :  { %4337 = vtanh.f32 %v2092_v16 }
0x2505   :  { %v4336_v17 = vpop.eup %4335 }
0x2506   :  { %2100 = vrot.lane.b32.xlu0 %v4336_v17, %s4540_s21 }
0x2507   :  { %v4338_v18 = vpop.eup %4337 }
0x2508   :  { %2098 = vrot.lane.b32.xlu1 %v4338_v18, %s4540_s21 }
0x2578   :  { %v2101_v20 = vpop.permute.xlu0 %2100 }
0x2579   :  { %v2105_v21 = vmul.f32 %v4332_v63, %v2101_v20 }
0x257a   :  { %v2099_v22 = vpop.permute.xlu1 %2098 }
0x257b   :  { %2122 = vrot.lane.b32.xlu0 %v2105_v21, %s4542_s22  ;;  %v2104_v25 = vmul.f32 %v4334_v7, %v2099_v22 }
0x257d   :  { %2120 = vrot.lane.b32.xlu1 %v2104_v25, %s4542_s22 }
0x257f   :  { %2111 = vperm.xlu0 %4060, %v4815_v23  }
0x2581   :  { %2107 = vperm.xlu1 %4059, %v4821_v24  }
0x2583   :  { %4061 = vset.pattern.permute.xlu0 %v4556_v58 }
0x2585   :  { %4062 = vset.pattern.permute.xlu1 %v4556_v58  ;;  %v5076_v58 = vld [vmem:[%s5600_s5 + $0xa0] ss:$16 sps:$4 sm:$0xff]  }
0x25ed   :  { %v2123_v28 = vpop.permute.xlu0 %2122 }
0x25ef   :  { %v2121_v26 = vpop.permute.xlu1 %2120 }
0x25f0   :  { %4003 = vmatprep.mubr.msk.f32.mxu0 %vm66_vm0, %v2121_v26 }
0x25f1   :  { %4004 = vmatmul.mubr.msk.f32.vlgmr.msra.gmra.mxu0 %vm66_vm0, %v2123_v28 }
0x25f2   :  { %2486 = vmatprep.mubr.bf16.mxu0 %v4537_v2 }
0x25fa   :  { %v2112_v31 = vpop.permute.xlu0 %2111 }
0x25fb   :  { %v2115_v33 = vmul.f32 %v4836_v30, %v2112_v31 }
0x25fc   :  { %v2108_v29 = vpop.permute.xlu1 %2107 }
0x25fd   :  { %v2114_v32 = vmul.f32 %v4836_v30, %v2108_v29  ;;  %v2117_v37 = vadd.f32 %v4844_v35, %v2115_v33 }
0x25ff   :  { %v2116_v34 = vadd.f32 %v4844_v35, %v2114_v32 }
0x26b1   :  { %v4005_v36 = vpop.f32.mrf.mxu0 }
0x26b2   :  { %v2204_v40 = vadd.f32 %v4005_v36, %v2117_v37  ;;  %v2401_v37 = vld [vmem:[%s5599_s4] sm:$0xff] }
0x26b3   :  { %v2194_v38 = vpop.f32.mrf.mxu0 }
0x26b4   :  { %v2203_v39 = vadd.f32 %v2194_v38, %v2116_v34  ;;  %v3812_v43 = vmul.f32 -1.442695, %v2204_v40  ;;  %v2402_v38 = vld [vmem:[%s5599_s4 + $0x8] sm:$0xff] }
0x26b6   :  { %4339 = vtanh.f32 %v2203_v39  ;;  %v3811_v42 = vmul.f32 -1.442695, %v2203_v39  ;;  %v3818_v39 = vcombine.high %v2401_v37, %v2401_v37 }
0x26b7   :  { %4341 = vtanh.f32 %v2204_v40  ;;  %v3820_v40 = vcombine.high %v2402_v38, %v2402_v38 }
0x26b8   :  { %4343 = vpow2.f32 %v3811_v42  ;;  %v5011_v42 = vld [vmem:[%s5600_s5 + $0xe4] ss:$16 sps:$4 sm:$0xff]   ;;  %3821 = vmatprep.subr.msk.bf16.mxu0 %vm2441_vm1, %v3818_v39 }
0x26b9   :  { %4345 = vpow2.f32 %v3812_v43  ;;  %v5016_v43 = vld [vmem:[%s5600_s5 + $0xec] ss:$16 sps:$4 sm:$0xff]   ;;  %3823 = vmatprep.subr.msk.bf16.mxu1 %vm2441_vm1, %v3820_v40 }
0x26c3   :  { %v4340_v41 = vpop.eup %4339 }
0x26c4   :  { %2223 = vrot.lane.b32.xlu1 %v4340_v41, %s4538_s19  ;;  %v4342_v10 = vpop.eup %4341  ;;  %v3817_v41 = vcombine.low %v2401_v37, %v2401_v37 }
0x26c5   :  { %v4344_v44 = vpop.eup %4343 }
0x26c6   :  { %v2211_v45 = vadd.f32 1.0, %v4344_v44  ;;  %v4346_v46 = vpop.eup %4345  ;;  %v2443_v44 = vsel %vm2441_vm1, %v3817_v41, 0 }
0x26c7   :  { %v2212_v47 = vadd.f32 1.0, %v4346_v46  ;;  %2469 = vmatpush1.bf16.msra.mxu0 %v2443_v44 }
0x26c8   :  { %2225 = vrot.lane.b32.xlu1 %v4342_v10, %s4538_s19  ;;  %4347 = vrcp.f32 %v2211_v45  ;;  %v3819_v10 = vcombine.low %v2402_v38, %v2402_v38  ;;  %2732 = vmatprep.subr.bf16.mxu0 %v5011_v42 }
0x26c9   :  { %4349 = vrcp.f32 %v2212_v47 }
0x26ca   :  { %v2449_v45 = vsel %vm2441_vm1, %v3819_v10, 0 }
0x26d5   :  { %v4348_v48 = vpop.eup %4347 }
0x26d6   :  { %v4350_v51 = vpop.eup %4349  ;;  %v2219_v52 = vmul.f32 %v4348_v48, %v2092_v16 }
0x26d7   :  { %v2220_v55 = vmul.f32 %v4350_v51, %v4959_v13 }
0x2736   :  { %v2224_v49 = vpop.permute.xlu1 %2223 }
0x2737   :  { %v2229_v50 = vmul.f32 %v4348_v48, %v2224_v49 }
0x2739   :  { %2233 = vrot.lane.b32.xlu0 %v2229_v50, %s4539_s20 }
0x273a   :  { %v2226_v3 = vpop.permute.xlu1 %2225 }
0x273b   :  { %v2230_v4 = vmul.f32 %v4350_v51, %v2226_v3 }
0x273d   :  { %2235 = vrot.lane.b32.xlu1 %v2230_v4, %s4539_s20  ;;  %v5026_v4 = vld [vmem:[%s5600_s5 + $0xe0] ss:$16 sps:$4 sm:$0xff]  }
0x27ab   :  { %v2234_v53 = vpop.permute.xlu0 %2233 }
0x27ac   :  { %v4980_v54 = vadd.f32 %v2234_v53, %v2219_v52  ;;  %v5031_v52 = vld [vmem:[%s5600_s5 + $0xe8] ss:$16 sps:$4 sm:$0xff]   ;;  %v5036_v53 = vld [vmem:[%s5600_s5 + $0xc4] ss:$16 sps:$4 sm:$0xff]  }
0x27ae   :  { %4351 = vtanh.f32 %v4980_v54 }
0x27af   :  { %v2236_v56 = vpop.permute.xlu1 %2235 }
0x27b0   :  { %v2240_v0 = vadd.f32 %v2236_v56, %v2220_v55  ;;  %v5050_v56 = vld [vmem:[%s5600_s5 + $0xc0] ss:$16 sps:$4 sm:$0xff]  }
0x27b2   :  { %4353 = vtanh.f32 %v2240_v0 }
0x27bb   :  { %v4352_v57 = vpop.eup %4351 }
0x27bc   :  { %2245 = vrot.lane.b32.xlu0 %v4352_v57, %s4540_s21  ;;  %v5062_v57 = vld [vmem:[%s5600_s5 + $0xa4] ss:$16 sps:$4 sm:$0xff]  }
0x27bf   :  { %v4354_v27 = vpop.eup %4353 }
0x27c0   :  { %2247 = vrot.lane.b32.xlu1 %v4354_v27, %s4540_s21  ;;  %v5067_v27 = vld [vmem:[%s5600_s5 + $0xac] ss:$16 sps:$4 sm:$0xff]  }
0x282e   :  { %v2246_v6 = vpop.permute.xlu0 %2245 }
0x282f   :  { %v2251_v59 = vmul.f32 %v4348_v48, %v2246_v6  ;;  %v5081_v6 = vld [vmem:[%s5600_s5 + $0xa8] ss:$16 sps:$4 sm:$0xff]  }
0x2831   :  { %2267 = vrot.lane.b32.xlu0 %v2251_v59, %s4542_s22  ;;  %v5088_v59 = vld [vmem:[%s5600_s5 + $0x84] ss:$16 sps:$4 sm:$0xff]  }
0x2832   :  { %v2248_v60 = vpop.permute.xlu1 %2247 }
0x2833   :  { %v2252_v61 = vmul.f32 %v4350_v51, %v2248_v60  ;;  %v5093_v60 = vld [vmem:[%s5600_s5 + $0x8c] ss:$16 sps:$4 sm:$0xff]  }
0x2835   :  { %2269 = vrot.lane.b32.xlu1 %v2252_v61, %s4542_s22  ;;  %2254 = vperm.xlu0 %4061, %v4821_v24   ;;  %v5100_v61 = vld [vmem:[%s5600_s5 + $0x80] ss:$16 sps:$4 sm:$0xff]  }
0x2839   :  { %2258 = vperm.xlu1 %4062, %v4815_v23  }
0x28a3   :  { %v2268_v62 = vpop.permute.xlu0 %2267 }
0x28a4   :  { %4008 = vmatprep.mubr.msk.f32.mxu1 %vm66_vm0, %v2268_v62  ;;  %v5105_v62 = vld [vmem:[%s5600_s5 + $0x88] ss:$16 sps:$4 sm:$0xff]  }
0x28a7   :  { %v2270_v63 = vpop.permute.xlu1 %2269 }
0x28a8   :  { %4009 = vmatmul.mubr.msk.f32.vlgmr.msra.gmra.mxu1 %vm66_vm0, %v2270_v63  ;;  %v5112_v63 = vld [vmem:[%s5600_s5 + $0x64] ss:$16 sps:$4 sm:$0xff]  }
0x28a9   :  { %2529 = vmatprep.mubr.bf16.mxu1 %v4537_v2  ;;  %2512 = vmatpush1.bf16.msra.mxu1 %v2449_v45 }
0x28aa   :  { %2773 = vmatprep.subr.bf16.mxu1 %v5016_v43 }
0x28b0   :  { %v2255_v5 = vpop.permute.xlu0 %2254 }
0x28b1   :  { %v2261_v8 = vmul.f32 %v4836_v30, %v2255_v5  ;;  %v5124_v5 = vld [vmem:[%s5600_s5 + $0x60] ss:$16 sps:$4 sm:$0xff]  }
0x28b3   :  { %v2263_v24 = vadd.f32 %v4844_v35, %v2261_v8  ;;  %v5136_v8 = vld [vmem:[%s5600_s5 + $0x44] ss:$16 sps:$4 sm:$0xff]  }
0x28b4   :  { %v2259_v1 = vpop.permute.xlu1 %2258 }
0x28b5   :  { %v2262_v7 = vmul.f32 %v4836_v30, %v2259_v1  ;;  %v5117_v1 = vld [vmem:[%s5600_s5 + $0x6c] ss:$16 sps:$4 sm:$0xff]  }
0x28b7   :  { %v2264_v9 = vadd.f32 %v4844_v35, %v2262_v7  ;;  %v5129_v7 = vld [vmem:[%s5600_s5 + $0x68] ss:$16 sps:$4 sm:$0xff]  }
0x2968   :  { %v4010_v11 = vpop.f32.mrf.mxu1 }
0x2969   :  { %v2351_v23 = vadd.f32 %v4010_v11, %v2264_v9  ;;  %v5141_v9 = vld [vmem:[%s5600_s5 + $0x4c] ss:$16 sps:$4 sm:$0xff]   ;;  %v5153_v11 = vld [vmem:[%s5600_s5 + $0x48] ss:$16 sps:$4 sm:$0xff]  }
0x296a   :  { %v2341_v12 = vpop.f32.mrf.mxu1 }
0x296b   :  { %4355 = vtanh.f32 %v2351_v23  ;;  %v2350_v13 = vadd.f32 %v2341_v12, %v2263_v24  ;;  %v3816_v16 = vmul.f32 -1.442695, %v2351_v23  ;;  %v5148_v24 = vld [vmem:[%s5600_s5 + $0x40] ss:$16 sps:$4 sm:$0xff]   ;;  %v5160_v23 = vld [vmem:[%s5600_s5 + $0x24] ss:$16 sps:$4 sm:$0xff]  }
0x296c   :  { %v5165_v12 = vld [vmem:[%s5600_s5 + $0x2c] ss:$16 sps:$4 sm:$0xff]  }
0x296d   :  { %4357 = vtanh.f32 %v2350_v13  ;;  %v3815_v17 = vmul.f32 -1.442695, %v2350_v13  ;;  %v5172_v13 = vld [vmem:[%s5600_s5 + $0x20] ss:$16 sps:$4 sm:$0xff]  }
0x296e   :  { %4359 = vpow2.f32 %v3816_v16  ;;  %v5189_v16 = vld [vmem:[%s5600_s5 + $0xc] ss:$16 sps:$4 sm:$0xff]  }
0x296f   :  { %4361 = vpow2.f32 %v3815_v17  ;;  %v5196_v17 = vld [vmem:[%s5600_s5] ss:$16 sps:$4 sm:$0xff]  }
0x2978   :  { %v4356_v14 = vpop.eup %4355 }
0x2979   :  { %2372 = vrot.lane.b32.xlu0 %v4356_v14, %s4538_s19  ;;  %v5177_v14 = vld [vmem:[%s5600_s5 + $0x28] ss:$16 sps:$4 sm:$0xff]  }
0x297a   :  { %v4358_v15 = vpop.eup %4357 }
0x297b   :  { %2370 = vrot.lane.b32.xlu1 %v4358_v15, %s4538_s19  ;;  %v4360_v30 = vpop.eup %4359  ;;  %v5184_v15 = vld [vmem:[%s5600_s5 + $0x4] ss:$16 sps:$4 sm:$0xff]  }
0x297c   :  { %v4362_v18 = vpop.eup %4361  ;;  %v2359_v19 = vadd.f32 1.0, %v4360_v30  ;;  %v5201_v30 = vld [vmem:[%s5600_s5 + $0x8] ss:$16 sps:$4 sm:$0xff]  }
0x297d   :  { %v2358_v35 = vadd.f32 1.0, %v4362_v18  ;;  %v2405_v18 = vlaneseq }
0x297e   :  { %4363 = vrcp.f32 %v2359_v19 }
0x297f   :  { %4365 = vrcp.f32 %v2358_v35  ;;  %v2406_v19 = vshrl.u32 %v2405_v18, 7 }
0x2981   :  { %v2407_v35 = vsub.s32 0, %v2406_v19 }
0x298b   :  { %v4364_v20 = vpop.eup %4363 }
0x298c   :  { %v4366_v25 = vpop.eup %4365  ;;  %v2367_v29 = vmul.f32 %v4364_v20, %v2240_v0  ;;  %v5055_v0 = vld [vmem:[%s5600_s5 + $0xc8] ss:$16 sps:$4 sm:$0xff]  }
0x298d   :  { %v2366_v33 = vmul.f32 %v4366_v25, %v4980_v54  ;;  %v5041_v54 = vld [vmem:[%s5600_s5 + $0xcc] ss:$16 sps:$4 sm:$0xff]  }
0x29eb   :  { %v2373_v21 = vpop.permute.xlu0 %2372 }
0x29ec   :  { %v2377_v22 = vmul.f32 %v4364_v20, %v2373_v21  ;;  %v2403_v21 = vld [vmem:[%s5601_s6] sm:$0xf] }
0x29ed   :  { %v2371_v26 = vpop.permute.xlu1 %2370 }
0x29ee   :  { %2382 = vrot.lane.b32.xlu0 %v2377_v22, %s4539_s20  ;;  %v2376_v28 = vmul.f32 %v4366_v25, %v2371_v26  ;;  %v2411_v26 = vsub.s32 1, %v2406_v19 }
0x29f0   :  { %2380 = vrot.lane.b32.xlu1 %v2376_v28, %s4539_s20  ;;  %v2419_v28 = vsub.s32 3, %v2406_v19  ;;  %v2412_v37 = vrot.slane %v2403_v21, %v2411_v26 }
0x29f2   :  { %v2420_v38 = vrot.slane %v2403_v21, %v2419_v28 }
0x2a60   :  { %v2383_v31 = vpop.permute.xlu0 %2382 }
0x2a61   :  { %v2387_v32 = vadd.f32 %v2383_v31, %v2367_v29 }
0x2a62   :  { %v2381_v34 = vpop.permute.xlu1 %2380 }
0x2a63   :  { %4367 = vtanh.f32 %v2387_v32  ;;  %v2386_v36 = vadd.f32 %v2381_v34, %v2366_v33  ;;  %v2408_v32 = vrot.slane %v2403_v21, %v2407_v35 }
0x2a65   :  { %4369 = vtanh.f32 %v2386_v36 }
0x2a70   :  { %v4368_v46 = vpop.eup %4367 }
0x2a71   :  { %2394 = vrot.lane.b32.xlu0 %v4368_v46, %s4540_s21 }
0x2a72   :  { %v4370_v47 = vpop.eup %4369 }
0x2a73   :  { %2392 = vrot.lane.b32.xlu1 %v4370_v47, %s4540_s21 }
0x2ae3   :  { %v2395_v48 = vpop.permute.xlu0 %2394 }
0x2ae4   :  { %v2399_v50 = vmul.f32 %v4364_v20, %v2395_v48  ;;  %v2415_v20 = vsub.s32 2, %v2406_v19 }
0x2ae5   :  { %v2393_v49 = vpop.permute.xlu1 %2392 }
0x2ae6   :  { %v2398_v51 = vmul.f32 %v4366_v25, %v2393_v49  ;;  %v2416_v33 = vrot.slane %v2403_v21, %v2415_v20 }
0x2ae8   :  { %v2400_v3 = vpack.c.bf16 %v2399_v50, %v2398_v51 }
0x2aea   :  { %2426 = vrot.lane.b32.xlu1 %v2400_v3, %s4542_s22 }
0x2b5c   :  { %v2427_v55 = vpop.permute.xlu1 %2426 }
0x2b5d   :  { %3822 = vmatmul.mubr.msk.bf16.vlgmr.msra.gmra.mxu0 %vm66_vm0, %v2427_v55  ;;  %3824 = vmatmul.mubr.msk.bf16.vlgmr.msra.gmra.mxu1 %vm66_vm0, %v2427_v55 }
0x2b5e   :  { %2733 = vmatpush1.bf16.msra.mxu0 %v5026_v4  ;;  %2774 = vmatpush1.bf16.msra.mxu1 %v5031_v52 }
0x2b5f   :  { %2734 = vmatprep.subr.bf16.mxu0 %v5036_v53  ;;  %2775 = vmatprep.subr.bf16.mxu1 %v5041_v54 }
0x2b60   :  { %2764 = vmatprep.mubr.bf16.mxu0 %v4537_v2  ;;  %2805 = vmatprep.mubr.bf16.mxu1 %v4537_v2 }
0x2b62   :  { %2735 = vmatpush1.bf16.msra.mxu0 %v5050_v56  ;;  %2776 = vmatpush1.bf16.msra.mxu1 %v5055_v0 }
0x2b63   :  { %2736 = vmatprep.subr.bf16.mxu0 %v5062_v57  ;;  %2777 = vmatprep.subr.bf16.mxu1 %v5067_v27 }
0x2b66   :  { %2737 = vmatpush1.bf16.msra.mxu0 %v5076_v58  ;;  %2778 = vmatpush1.bf16.msra.mxu1 %v5081_v6 }
0x2b67   :  { %2738 = vmatprep.subr.bf16.mxu0 %v5088_v59  ;;  %2779 = vmatprep.subr.bf16.mxu1 %v5093_v60 }
0x2b6a   :  { %2739 = vmatpush1.bf16.msra.mxu0 %v5100_v61  ;;  %2780 = vmatpush1.bf16.msra.mxu1 %v5105_v62 }
0x2b6b   :  { %2740 = vmatprep.subr.bf16.mxu0 %v5112_v63  ;;  %2781 = vmatprep.subr.bf16.mxu1 %v5117_v1 }
0x2b6e   :  { %2741 = vmatpush1.bf16.msra.mxu0 %v5124_v5  ;;  %2782 = vmatpush1.bf16.msra.mxu1 %v5129_v7 }
0x2b6f   :  { %2742 = vmatprep.subr.bf16.mxu0 %v5136_v8  ;;  %2783 = vmatprep.subr.bf16.mxu1 %v5141_v9 }
0x2b72   :  { %2743 = vmatpush1.bf16.msra.mxu0 %v5148_v24  ;;  %2784 = vmatpush1.bf16.msra.mxu1 %v5153_v11 }
0x2b73   :  { %2744 = vmatprep.subr.bf16.mxu0 %v5160_v23  ;;  %2785 = vmatprep.subr.bf16.mxu1 %v5165_v12 }
0x2b76   :  { %2745 = vmatpush1.bf16.msra.mxu0 %v5172_v13  ;;  %2786 = vmatpush1.bf16.msra.mxu1 %v5177_v14 }
0x2b77   :  { %2746 = vmatprep.subr.bf16.mxu0 %v5184_v15  ;;  %2787 = vmatprep.subr.bf16.mxu1 %v5189_v16 }
0x2b7a   :  { %2747 = vmatpush1.bf16.msra.mxu0 %v5196_v17  ;;  %2788 = vmatpush1.bf16.msra.mxu1 %v5201_v30 }
0x2b7b   :  { %2843 = vmatprep.subr.bf16.mxu0 %v5011_v42  ;;  %2884 = vmatprep.subr.bf16.mxu1 %v5016_v43 }
0x2b7d   :  { %2765 = vmatmul.mubr.bf16.vlgmr.msra.gmra.mxu0 %v4537_v2  ;;  %2806 = vmatmul.mubr.bf16.vlgmr.msra.gmra.mxu1 %v4537_v2 }
0x2b7e   :  { %2844 = vmatpush1.bf16.msra.mxu0 %v5026_v4  ;;  %2885 = vmatpush1.bf16.msra.mxu1 %v5031_v52 }
0x2b7f   :  { %2845 = vmatprep.subr.bf16.mxu0 %v5036_v53  ;;  %2886 = vmatprep.subr.bf16.mxu1 %v5041_v54 }
0x2b80   :  { %2875 = vmatprep.mubr.bf16.mxu0 %v4537_v2  ;;  %2916 = vmatprep.mubr.bf16.mxu1 %v4537_v2 }
0x2b82   :  { %2846 = vmatpush1.bf16.msra.mxu0 %v5050_v56  ;;  %2887 = vmatpush1.bf16.msra.mxu1 %v5055_v0 }
0x2b83   :  { %2847 = vmatprep.subr.bf16.mxu0 %v5062_v57  ;;  %2888 = vmatprep.subr.bf16.mxu1 %v5067_v27 }
0x2b86   :  { %2848 = vmatpush1.bf16.msra.mxu0 %v5076_v58  ;;  %2889 = vmatpush1.bf16.msra.mxu1 %v5081_v6 }
0x2b87   :  { %2849 = vmatprep.subr.bf16.mxu0 %v5088_v59  ;;  %2890 = vmatprep.subr.bf16.mxu1 %v5093_v60 }
0x2b8a   :  { %2850 = vmatpush1.bf16.msra.mxu0 %v5100_v61  ;;  %2891 = vmatpush1.bf16.msra.mxu1 %v5105_v62 }
0x2b8b   :  { %2851 = vmatprep.subr.bf16.mxu0 %v5112_v63  ;;  %2892 = vmatprep.subr.bf16.mxu1 %v5117_v1 }
0x2b8e   :  { %2852 = vmatpush1.bf16.msra.mxu0 %v5124_v5  ;;  %2893 = vmatpush1.bf16.msra.mxu1 %v5129_v7 }
0x2b8f   :  { %2853 = vmatprep.subr.bf16.mxu0 %v5136_v8  ;;  %2894 = vmatprep.subr.bf16.mxu1 %v5141_v9 }
0x2b92   :  { %2854 = vmatpush1.bf16.msra.mxu0 %v5148_v24  ;;  %2895 = vmatpush1.bf16.msra.mxu1 %v5153_v11 }
0x2b93   :  { %2855 = vmatprep.subr.bf16.mxu0 %v5160_v23  ;;  %2896 = vmatprep.subr.bf16.mxu1 %v5165_v12 }
0x2b96   :  { %2856 = vmatpush1.bf16.msra.mxu0 %v5172_v13  ;;  %2897 = vmatpush1.bf16.msra.mxu1 %v5177_v14 }
0x2b97   :  { %2857 = vmatprep.subr.bf16.mxu0 %v5184_v15  ;;  %2898 = vmatprep.subr.bf16.mxu1 %v5189_v16 }
0x2b9a   :  { %2858 = vmatpush1.bf16.msra.mxu0 %v5196_v17  ;;  %2899 = vmatpush1.bf16.msra.mxu1 %v5201_v30 }
0x2b9b   :  { %2972 = vmatprep.subr.bf16.mxu0 %v5011_v42  ;;  %3013 = vmatprep.subr.bf16.mxu1 %v5016_v43 }
0x2c1d   :  { %v2488_v22 = vpop.f32.mrf.mxu0  ;;  %v2531_v25 = vpop.f32.mrf.mxu1 }
0x2c1e   :  { %v5256_v46 = vadd.f32 %v2488_v22, %v2408_v32 }
0x2c1f   :  { %v2490_v29 = vpop.f32.mrf.mxu0  ;;  %v2533_v31 = vpop.f32.mrf.mxu1 }
0x2c20   :  { %v5258_v49 = vadd.f32 %v2490_v29, %v2412_v37  ;;  %v5262_v22 = vadd.f32 %v2533_v31, %v2420_v38  ;;  %v5265_v29 = vadd.f32 %v2531_v25, %v2416_v33 }
0x2c21   :  { %v2492_v34 = vpop.f32.mrf.mxu0  ;;  %v2535_v36 = vpop.f32.mrf.mxu1 }
0x2c22   :  { %v5248_v39 = vadd.f32 %v2492_v34, %v2408_v32  ;;  %v5250_v40 = vadd.f32 %v2535_v36, %v2416_v33 }
0x2c23   :  { %v2494_v41 = vpop.f32.mrf.mxu0  ;;  %v2537_v10 = vpop.f32.mrf.mxu1 }
0x2c24   :  { %v5252_v44 = vadd.f32 %v2494_v41, %v2412_v37  ;;  %v5254_v45 = vadd.f32 %v2537_v10, %v2420_v38 }
0x2c3d   :  { %v2766_v47 = vpop.f32.mrf.mxu0  ;;  %v2807_v48 = vpop.f32.mrf.mxu1 }
0x2c3e   :  { %v2814_v50 = vadd.f32 %v2766_v47, %v5256_v46  ;;  %v2816_v36 = vadd.f32 %v2807_v48, %v5265_v29 }
0x2c3f   :  { %v2768_v51 = vpop.f32.mrf.mxu0  ;;  %v2809_v3 = vpop.f32.mrf.mxu1 }
0x2c40   :  { %v3857_v55 = vmul.f32 -1.442695, %v2814_v50  ;;  %v2815_v18 = vadd.f32 %v2768_v51, %v5258_v49  ;;  %v2817_v28 = vadd.f32 %v2809_v3, %v5262_v22 }
0x2c41   :  { %v2770_v19 = vpop.f32.mrf.mxu0  ;;  %v2811_v35 = vpop.f32.mrf.mxu1 }
0x2c42   :  { %4371 = vpow2.f32 %v3857_v55  ;;  %v3858_v20 = vmul.f32 -1.442695, %v2815_v18  ;;  %v3859_v32 = vmul.f32 -1.442695, %v2817_v28 }
0x2c43   :  { %v2771_v21 = vpop.f32.mrf.mxu0  ;;  %v2812_v26 = vpop.f32.mrf.mxu1 }
0x2c44   :  { %4373 = vpow2.f32 %v3858_v20 }
0x2c45   :  { %4375 = vpow2.f32 %v3859_v32 }
0x2c4f   :  { %v4372_v34 = vpop.eup %4371 }
0x2c50   :  { %v2821_v37 = vadd.f32 1.0, %v4372_v34 }
0x2c51   :  { %v4374_v41 = vpop.eup %4373 }
0x2c52   :  { %4377 = vrcp.f32 %v2821_v37  ;;  %v2827_v10 = vadd.f32 1.0, %v4374_v41  ;;  %v4376_v47 = vpop.eup %4375 }
0x2c53   :  { %4379 = vtanh.f32 %v2816_v36  ;;  %v2834_v38 = vadd.f32 1.0, %v4376_v47 }
0x2c54   :  { %4381 = vrcp.f32 %v2827_v10 }
0x2c55   :  { %4383 = vrcp.f32 %v2834_v38 }
0x2c5f   :  { %v4378_v50 = vpop.eup %4377 }
0x2c60   :  { %v4380_v51 = vpop.eup %4379 }
0x2c61   :  { %v4382_v31 = vpop.eup %4381  ;;  %v2838_v3 = vmul.f32 %v4380_v51, %v4378_v50 }
0x2c62   :  { %v2837_v55 = vmul.f32 0.0, %v4382_v31  ;;  %v4384_v33 = vpop.eup %4383 }
0x2c64   :  { %v5268_v25 = vadd.f32 %v2838_v3, %v2837_v55 }
0x2c66   :  { %4385 = vtanh.f32 %v5268_v25 }
0x2c73   :  { %v4386_v48 = vpop.eup %4385 }
0x2c74   :  { %v2841_v18 = vmul.f32 %v4386_v48, %v4384_v33 }
0x2c76   :  { %v2842_v19 = vpack.c.bf16 %v2841_v18, %v2841_v18 }
0x2c78   :  { %2876 = vmatmul.mubr.bf16.vlgmr.msra.gmra.mxu0 %v2842_v19  ;;  %2917 = vmatmul.mubr.bf16.vlgmr.msra.gmra.mxu1 %v2842_v19 }
0x2c79   :  { %2973 = vmatpush1.bf16.msra.mxu0 %v5026_v4  ;;  %3014 = vmatpush1.bf16.msra.mxu1 %v5031_v52 }
0x2c7a   :  { %2974 = vmatprep.subr.bf16.mxu0 %v5036_v53  ;;  %3015 = vmatprep.subr.bf16.mxu1 %v5041_v54 }
0x2c7b   :  { %3004 = vmatprep.mubr.bf16.mxu0 %v4537_v2  ;;  %3045 = vmatprep.mubr.bf16.mxu1 %v4537_v2 }
0x2c7d   :  { %2975 = vmatpush1.bf16.msra.mxu0 %v5050_v56  ;;  %3016 = vmatpush1.bf16.msra.mxu1 %v5055_v0 }
0x2c7e   :  { %2976 = vmatprep.subr.bf16.mxu0 %v5062_v57  ;;  %3017 = vmatprep.subr.bf16.mxu1 %v5067_v27 }
0x2c81   :  { %2977 = vmatpush1.bf16.msra.mxu0 %v5076_v58  ;;  %3018 = vmatpush1.bf16.msra.mxu1 %v5081_v6 }
0x2c82   :  { %2978 = vmatprep.subr.bf16.mxu0 %v5088_v59  ;;  %3019 = vmatprep.subr.bf16.mxu1 %v5093_v60 }
0x2c85   :  { %2979 = vmatpush1.bf16.msra.mxu0 %v5100_v61  ;;  %3020 = vmatpush1.bf16.msra.mxu1 %v5105_v62 }
0x2c86   :  { %2980 = vmatprep.subr.bf16.mxu0 %v5112_v63  ;;  %3021 = vmatprep.subr.bf16.mxu1 %v5117_v1 }
0x2c89   :  { %2981 = vmatpush1.bf16.msra.mxu0 %v5124_v5  ;;  %3022 = vmatpush1.bf16.msra.mxu1 %v5129_v7 }
0x2c8a   :  { %2982 = vmatprep.subr.bf16.mxu0 %v5136_v8  ;;  %3023 = vmatprep.subr.bf16.mxu1 %v5141_v9 }
0x2c8d   :  { %2983 = vmatpush1.bf16.msra.mxu0 %v5148_v24  ;;  %3024 = vmatpush1.bf16.msra.mxu1 %v5153_v11 }
0x2c8e   :  { %2984 = vmatprep.subr.bf16.mxu0 %v5160_v23  ;;  %3025 = vmatprep.subr.bf16.mxu1 %v5165_v12 }
0x2c91   :  { %2985 = vmatpush1.bf16.msra.mxu0 %v5172_v13  ;;  %3026 = vmatpush1.bf16.msra.mxu1 %v5177_v14 }
0x2c92   :  { %2986 = vmatprep.subr.bf16.mxu0 %v5184_v15  ;;  %3027 = vmatprep.subr.bf16.mxu1 %v5189_v16 }
0x2c95   :  { %2987 = vmatpush1.bf16.msra.mxu0 %v5196_v17  ;;  %3028 = vmatpush1.bf16.msra.mxu1 %v5201_v30 }
0x2c96   :  { %3101 = vmatprep.subr.bf16.mxu0 %v5011_v42  ;;  %3142 = vmatprep.subr.bf16.mxu1 %v5016_v43 }
0x2d38   :  { %v2877_v35 = vpop.f32.mrf.mxu0  ;;  %v2918_v20 = vpop.f32.mrf.mxu1 }
0x2d39   :  { %v2929_v21 = vrot.slane %v2877_v35, 6  ;;  %v2931_v55 = vrot.slane %v2918_v20, 6 }
0x2d3a   :  { %v2879_v26 = vpop.f32.mrf.mxu0  ;;  %v2920_v28 = vpop.f32.mrf.mxu1 }
0x2d3b   :  { %v2937_v32 = vadd.f32 %v2929_v21, %v5256_v46  ;;  %v2930_v34 = vrot.slane %v2879_v26, 6  ;;  %v2932_v31 = vrot.slane %v2920_v28, 6  ;;  %v2939_v48 = vadd.f32 %v2931_v55, %v5265_v29 }
0x2d3c   :  { %v2881_v36 = vpop.f32.mrf.mxu0  ;;  %v2922_v37 = vpop.f32.mrf.mxu1 }
0x2d3d   :  { %v3860_v41 = vmul.f32 -1.442695, %v2937_v32  ;;  %v2938_v10 = vadd.f32 %v2930_v34, %v5258_v49  ;;  %v2940_v38 = vadd.f32 %v2932_v31, %v5262_v22  ;;  %v2961_v34 = vrot.slane %v5268_v25, 6 }
0x2d3e   :  { %v2882_v47 = vpop.f32.mrf.mxu0  ;;  %v2923_v50 = vpop.f32.mrf.mxu1 }
0x2d3f   :  { %4387 = vpow2.f32 %v3860_v41  ;;  %v3861_v51 = vmul.f32 -1.442695, %v2938_v10  ;;  %v3862_v3 = vmul.f32 -1.442695, %v2940_v38 }
0x2d41   :  { %4389 = vpow2.f32 %v3861_v51 }
0x2d42   :  { %4391 = vpow2.f32 %v3862_v3 }
0x2d4c   :  { %v4388_v33 = vpop.eup %4387 }
0x2d4d   :  { %v2944_v18 = vadd.f32 1.0, %v4388_v33 }
0x2d4e   :  { %v4390_v19 = vpop.eup %4389 }
0x2d4f   :  { %4393 = vrcp.f32 %v2944_v18  ;;  %v2950_v35 = vadd.f32 1.0, %v4390_v19  ;;  %v4392_v21 = vpop.eup %4391 }
0x2d50   :  { %4395 = vtanh.f32 %v2939_v48  ;;  %v2957_v36 = vadd.f32 1.0, %v4392_v21 }
0x2d51   :  { %4397 = vrcp.f32 %v2950_v35 }
0x2d52   :  { %4399 = vrcp.f32 %v2957_v36 }
0x2d5c   :  { %v4394_v26 = vpop.eup %4393 }
0x2d5d   :  { %v4396_v32 = vpop.eup %4395 }
0x2d5e   :  { %v4398_v28 = vpop.eup %4397  ;;  %v2964_v37 = vmul.f32 %v4396_v32, %v4394_v26 }
0x2d5f   :  { %v2963_v20 = vmul.f32 %v4398_v28, %v2961_v34  ;;  %v4400_v10 = vpop.eup %4399 }
0x2d61   :  { %v5310_v41 = vadd.f32 %v2964_v37, %v2963_v20 }
0x2d63   :  { %4401 = vtanh.f32 %v5310_v41 }
0x2d70   :  { %v4402_v47 = vpop.eup %4401 }
0x2d71   :  { %v2967_v50 = vmul.f32 %v4402_v47, %v4400_v10 }
0x2d73   :  { %v2968_v51 = vpack.c.bf16 %v2967_v50, %v2967_v50 }
0x2d75   :  { %v2970_v31 = vrot.slane %v2968_v51, 1 }
0x2d77   :  { %3005 = vmatmul.mubr.bf16.vlgmr.msra.gmra.mxu0 %v2970_v31  ;;  %3046 = vmatmul.mubr.bf16.vlgmr.msra.gmra.mxu1 %v2970_v31 }
0x2d78   :  { %3102 = vmatpush1.bf16.msra.mxu0 %v5026_v4  ;;  %3143 = vmatpush1.bf16.msra.mxu1 %v5031_v52 }
0x2d79   :  { %3103 = vmatprep.subr.bf16.mxu0 %v5036_v53  ;;  %3144 = vmatprep.subr.bf16.mxu1 %v5041_v54 }
0x2d7a   :  { %3133 = vmatprep.mubr.bf16.mxu0 %v4537_v2  ;;  %3174 = vmatprep.mubr.bf16.mxu1 %v4537_v2 }
0x2d7c   :  { %3104 = vmatpush1.bf16.msra.mxu0 %v5050_v56  ;;  %3145 = vmatpush1.bf16.msra.mxu1 %v5055_v0 }
0x2d7d   :  { %3105 = vmatprep.subr.bf16.mxu0 %v5062_v57  ;;  %3146 = vmatprep.subr.bf16.mxu1 %v5067_v27 }
0x2d80   :  { %3106 = vmatpush1.bf16.msra.mxu0 %v5076_v58  ;;  %3147 = vmatpush1.bf16.msra.mxu1 %v5081_v6 }
0x2d81   :  { %3107 = vmatprep.subr.bf16.mxu0 %v5088_v59  ;;  %3148 = vmatprep.subr.bf16.mxu1 %v5093_v60 }
0x2d84   :  { %3108 = vmatpush1.bf16.msra.mxu0 %v5100_v61  ;;  %3149 = vmatpush1.bf16.msra.mxu1 %v5105_v62 }
0x2d85   :  { %3109 = vmatprep.subr.bf16.mxu0 %v5112_v63  ;;  %3150 = vmatprep.subr.bf16.mxu1 %v5117_v1 }
0x2d88   :  { %3110 = vmatpush1.bf16.msra.mxu0 %v5124_v5  ;;  %3151 = vmatpush1.bf16.msra.mxu1 %v5129_v7 }
0x2d89   :  { %3111 = vmatprep.subr.bf16.mxu0 %v5136_v8  ;;  %3152 = vmatprep.subr.bf16.mxu1 %v5141_v9 }
0x2d8c   :  { %3112 = vmatpush1.bf16.msra.mxu0 %v5148_v24  ;;  %3153 = vmatpush1.bf16.msra.mxu1 %v5153_v11 }
0x2d8d   :  { %3113 = vmatprep.subr.bf16.mxu0 %v5160_v23  ;;  %3154 = vmatprep.subr.bf16.mxu1 %v5165_v12 }
0x2d90   :  { %3114 = vmatpush1.bf16.msra.mxu0 %v5172_v13  ;;  %3155 = vmatpush1.bf16.msra.mxu1 %v5177_v14 }
0x2d91   :  { %3115 = vmatprep.subr.bf16.mxu0 %v5184_v15  ;;  %3156 = vmatprep.subr.bf16.mxu1 %v5189_v16 }
0x2d94   :  { %3116 = vmatpush1.bf16.msra.mxu0 %v5196_v17  ;;  %3157 = vmatpush1.bf16.msra.mxu1 %v5201_v30 }
0x2d95   :  { %3230 = vmatprep.subr.bf16.mxu0 %v5011_v42  ;;  %3271 = vmatprep.subr.bf16.mxu1 %v5016_v43 }
0x2e37   :  { %v3006_v25 = vpop.f32.mrf.mxu0  ;;  %v3047_v38 = vpop.f32.mrf.mxu1 }
0x2e38   :  { %v3058_v55 = vrot.slane %v3006_v25, 4  ;;  %v3060_v20 = vrot.slane %v3047_v38, 4 }
0x2e39   :  { %v3008_v3 = vpop.f32.mrf.mxu0  ;;  %v3049_v33 = vpop.f32.mrf.mxu1 }
0x2e3a   :  { %v3066_v48 = vadd.f32 %v3058_v55, %v5256_v46  ;;  %v3059_v18 = vrot.slane %v3008_v3, 4  ;;  %v3061_v36 = vrot.slane %v3049_v33, 4  ;;  %v3068_v50 = vadd.f32 %v3060_v20, %v5265_v29 }
0x2e3b   :  { %v3010_v19 = vpop.f32.mrf.mxu0  ;;  %v3051_v35 = vpop.f32.mrf.mxu1 }
0x2e3c   :  { %v3863_v21 = vmul.f32 -1.442695, %v3066_v48  ;;  %v3067_v26 = vadd.f32 %v3059_v18, %v5258_v49  ;;  %v3069_v37 = vadd.f32 %v3061_v36, %v5262_v22  ;;  %v3090_v18 = vrot.slane %v5310_v41, 6 }
0x2e3d   :  { %v3011_v32 = vpop.f32.mrf.mxu0  ;;  %v3052_v34 = vpop.f32.mrf.mxu1 }
0x2e3e   :  { %4403 = vpow2.f32 %v3863_v21  ;;  %v3864_v28 = vmul.f32 -1.442695, %v3067_v26  ;;  %v3865_v10 = vmul.f32 -1.442695, %v3069_v37 }
0x2e40   :  { %4405 = vpow2.f32 %v3864_v28 }
0x2e41   :  { %4407 = vpow2.f32 %v3865_v10 }
0x2e4b   :  { %v4404_v47 = vpop.eup %4403 }
0x2e4c   :  { %v3073_v51 = vadd.f32 1.0, %v4404_v47 }
0x2e4d   :  { %v4406_v31 = vpop.eup %4405 }
0x2e4e   :  { %4409 = vrcp.f32 %v3073_v51  ;;  %v3079_v25 = vadd.f32 1.0, %v4406_v31  ;;  %v4408_v55 = vpop.eup %4407 }
0x2e4f   :  { %4411 = vtanh.f32 %v3068_v50  ;;  %v3086_v19 = vadd.f32 1.0, %v4408_v55 }
0x2e50   :  { %4413 = vrcp.f32 %v3079_v25 }
0x2e51   :  { %4415 = vrcp.f32 %v3086_v19 }
0x2e5b   :  { %v4410_v3 = vpop.eup %4409 }
0x2e5c   :  { %v4412_v48 = vpop.eup %4411 }
0x2e5d   :  { %v4414_v33 = vpop.eup %4413  ;;  %v3093_v35 = vmul.f32 %v4412_v48, %v4410_v3 }
0x2e5e   :  { %v3092_v38 = vmul.f32 %v4414_v33, %v3090_v18  ;;  %v4416_v26 = vpop.eup %4415 }
0x2e60   :  { %v5352_v21 = vadd.f32 %v3093_v35, %v3092_v38 }
0x2e62   :  { %4417 = vtanh.f32 %v5352_v21 }
0x2e6f   :  { %v4418_v32 = vpop.eup %4417 }
0x2e70   :  { %v3096_v34 = vmul.f32 %v4418_v32, %v4416_v26 }
0x2e72   :  { %v3097_v28 = vpack.c.bf16 %v3096_v34, %v3096_v34 }
0x2e74   :  { %v3099_v36 = vrot.slane %v3097_v28, 2 }
0x2e76   :  { %3134 = vmatmul.mubr.bf16.vlgmr.msra.gmra.mxu0 %v3099_v36  ;;  %3175 = vmatmul.mubr.bf16.vlgmr.msra.gmra.mxu1 %v3099_v36 }
0x2e77   :  { %3231 = vmatpush1.bf16.msra.mxu0 %v5026_v4  ;;  %3272 = vmatpush1.bf16.msra.mxu1 %v5031_v52 }
0x2e78   :  { %3232 = vmatprep.subr.bf16.mxu0 %v5036_v53  ;;  %3273 = vmatprep.subr.bf16.mxu1 %v5041_v54 }
0x2e79   :  { %3262 = vmatprep.mubr.bf16.mxu0 %v4537_v2  ;;  %3303 = vmatprep.mubr.bf16.mxu1 %v4537_v2 }
0x2e7b   :  { %3233 = vmatpush1.bf16.msra.mxu0 %v5050_v56  ;;  %3274 = vmatpush1.bf16.msra.mxu1 %v5055_v0 }
0x2e7c   :  { %3234 = vmatprep.subr.bf16.mxu0 %v5062_v57  ;;  %3275 = vmatprep.subr.bf16.mxu1 %v5067_v27 }
0x2e7f   :  { %3235 = vmatpush1.bf16.msra.mxu0 %v5076_v58  ;;  %3276 = vmatpush1.bf16.msra.mxu1 %v5081_v6 }
0x2e80   :  { %3236 = vmatprep.subr.bf16.mxu0 %v5088_v59  ;;  %3277 = vmatprep.subr.bf16.mxu1 %v5093_v60 }
0x2e83   :  { %3237 = vmatpush1.bf16.msra.mxu0 %v5100_v61  ;;  %3278 = vmatpush1.bf16.msra.mxu1 %v5105_v62 }
0x2e84   :  { %3238 = vmatprep.subr.bf16.mxu0 %v5112_v63  ;;  %3279 = vmatprep.subr.bf16.mxu1 %v5117_v1 }
0x2e87   :  { %3239 = vmatpush1.bf16.msra.mxu0 %v5124_v5  ;;  %3280 = vmatpush1.bf16.msra.mxu1 %v5129_v7 }
0x2e88   :  { %3240 = vmatprep.subr.bf16.mxu0 %v5136_v8  ;;  %3281 = vmatprep.subr.bf16.mxu1 %v5141_v9 }
0x2e8b   :  { %3241 = vmatpush1.bf16.msra.mxu0 %v5148_v24  ;;  %3282 = vmatpush1.bf16.msra.mxu1 %v5153_v11 }
0x2e8c   :  { %3242 = vmatprep.subr.bf16.mxu0 %v5160_v23  ;;  %3283 = vmatprep.subr.bf16.mxu1 %v5165_v12 }
0x2e8f   :  { %3243 = vmatpush1.bf16.msra.mxu0 %v5172_v13  ;;  %3284 = vmatpush1.bf16.msra.mxu1 %v5177_v14 }
0x2e90   :  { %3244 = vmatprep.subr.bf16.mxu0 %v5184_v15  ;;  %3285 = vmatprep.subr.bf16.mxu1 %v5189_v16 }
0x2e93   :  { %3245 = vmatpush1.bf16.msra.mxu0 %v5196_v17  ;;  %3286 = vmatpush1.bf16.msra.mxu1 %v5201_v30 }
0x2e94   :  { %3344 = vmatprep.subr.bf16.mxu0 %v5011_v42  ;;  %3385 = vmatprep.subr.bf16.mxu1 %v5016_v43 }
0x2f36   :  { %v3135_v41 = vpop.f32.mrf.mxu0  ;;  %v3176_v37 = vpop.f32.mrf.mxu1 }
0x2f37   :  { %v3187_v20 = vrot.slane %v3135_v41, 2  ;;  %v3189_v38 = vrot.slane %v3176_v37, 2 }
0x2f38   :  { %v3137_v10 = vpop.f32.mrf.mxu0  ;;  %v3178_v47 = vpop.f32.mrf.mxu1 }
0x2f39   :  { %v3195_v50 = vadd.f32 %v3187_v20, %v5256_v46  ;;  %v3188_v51 = vrot.slane %v3137_v10, 2  ;;  %v3190_v19 = vrot.slane %v3178_v47, 2  ;;  %v3197_v34 = vadd.f32 %v3189_v38, %v5265_v29 }
0x2f3a   :  { %v3139_v31 = vpop.f32.mrf.mxu0  ;;  %v3180_v25 = vpop.f32.mrf.mxu1  ;;  %v3219_v10 = vrot.slane %v5352_v21, 6 }
0x2f3b   :  { %v3866_v55 = vmul.f32 -1.442695, %v3195_v50  ;;  %v3196_v3 = vadd.f32 %v3188_v51, %v5258_v49  ;;  %v3198_v35 = vadd.f32 %v3190_v19, %v5262_v22 }
0x2f3c   :  { %v3140_v48 = vpop.f32.mrf.mxu0  ;;  %v3181_v18 = vpop.f32.mrf.mxu1 }
0x2f3d   :  { %4419 = vpow2.f32 %v3866_v55  ;;  %v3867_v33 = vmul.f32 -1.442695, %v3196_v3  ;;  %v3868_v26 = vmul.f32 -1.442695, %v3198_v35 }
0x2f3f   :  { %4421 = vpow2.f32 %v3867_v33 }
0x2f40   :  { %4423 = vpow2.f32 %v3868_v26 }
0x2f4a   :  { %v4420_v32 = vpop.eup %4419 }
0x2f4b   :  { %v3202_v46 = vadd.f32 1.0, %v4420_v32 }
0x2f4c   :  { %v4422_v28 = vpop.eup %4421 }
0x2f4d   :  { %4425 = vrcp.f32 %v3202_v46  ;;  %v3208_v36 = vadd.f32 1.0, %v4422_v28  ;;  %v4424_v49 = vpop.eup %4423 }
0x2f4e   :  { %4427 = vtanh.f32 %v3197_v34  ;;  %v3215_v50 = vadd.f32 1.0, %v4424_v49 }
0x2f4f   :  { %4429 = vrcp.f32 %v3208_v36 }
0x2f50   :  { %4431 = vrcp.f32 %v3215_v50 }
0x2f5a   :  { %v4426_v41 = vpop.eup %4425 }
0x2f5b   :  { %v4428_v20 = vpop.eup %4427 }
0x2f5c   :  { %v4430_v47 = vpop.eup %4429  ;;  %v3222_v22 = vmul.f32 %v4428_v20, %v4426_v41 }
0x2f5d   :  { %v3221_v37 = vmul.f32 %v4430_v47, %v3219_v10  ;;  %v4432_v29 = vpop.eup %4431 }
0x2f5f   :  { %v5394_v51 = vadd.f32 %v3222_v22, %v3221_v37 }
0x2f61   :  { %4433 = vtanh.f32 %v5394_v51  ;;  %v3336_v37 = vrot.slane %v5394_v51, 6 }
0x2f6e   :  { %v4434_v31 = vpop.eup %4433 }
0x2f6f   :  { %v3225_v25 = vmul.f32 %v4434_v31, %v4432_v29 }
0x2f71   :  { %v3226_v55 = vpack.c.bf16 %v3225_v25, %v3225_v25 }
0x2f73   :  { %v3228_v3 = vrot.slane %v3226_v55, 3 }
0x2f75   :  { %3263 = vmatmul.mubr.bf16.vlgmr.msra.gmra.mxu0 %v3228_v3  ;;  %3304 = vmatmul.mubr.bf16.vlgmr.msra.gmra.mxu1 %v3228_v3 }
0x2f76   :  { %3345 = vmatpush1.bf16.msra.mxu0 %v5026_v4  ;;  %3386 = vmatpush1.bf16.msra.mxu1 %v5031_v52 }
0x2f77   :  { %3346 = vmatprep.subr.bf16.mxu0 %v5036_v53  ;;  %3387 = vmatprep.subr.bf16.mxu1 %v5041_v54 }
0x2f78   :  { %3376 = vmatprep.mubr.bf16.mxu0 %v4537_v2  ;;  %3417 = vmatprep.mubr.bf16.mxu1 %v4537_v2 }
0x2f7a   :  { %3347 = vmatpush1.bf16.msra.mxu0 %v5050_v56  ;;  %3388 = vmatpush1.bf16.msra.mxu1 %v5055_v0 }
0x2f7b   :  { %3348 = vmatprep.subr.bf16.mxu0 %v5062_v57  ;;  %3389 = vmatprep.subr.bf16.mxu1 %v5067_v27 }
0x2f7e   :  { %3349 = vmatpush1.bf16.msra.mxu0 %v5076_v58  ;;  %3390 = vmatpush1.bf16.msra.mxu1 %v5081_v6 }
0x2f7f   :  { %3350 = vmatprep.subr.bf16.mxu0 %v5088_v59  ;;  %3391 = vmatprep.subr.bf16.mxu1 %v5093_v60 }
0x2f82   :  { %3351 = vmatpush1.bf16.msra.mxu0 %v5100_v61  ;;  %3392 = vmatpush1.bf16.msra.mxu1 %v5105_v62 }
0x2f83   :  { %3352 = vmatprep.subr.bf16.mxu0 %v5112_v63  ;;  %3393 = vmatprep.subr.bf16.mxu1 %v5117_v1 }
0x2f86   :  { %3353 = vmatpush1.bf16.msra.mxu0 %v5124_v5  ;;  %3394 = vmatpush1.bf16.msra.mxu1 %v5129_v7 }
0x2f87   :  { %3354 = vmatprep.subr.bf16.mxu0 %v5136_v8  ;;  %3395 = vmatprep.subr.bf16.mxu1 %v5141_v9 }
0x2f8a   :  { %3355 = vmatpush1.bf16.msra.mxu0 %v5148_v24  ;;  %3396 = vmatpush1.bf16.msra.mxu1 %v5153_v11 }
0x2f8b   :  { %3356 = vmatprep.subr.bf16.mxu0 %v5160_v23  ;;  %3397 = vmatprep.subr.bf16.mxu1 %v5165_v12 }
0x2f8e   :  { %3357 = vmatpush1.bf16.msra.mxu0 %v5172_v13  ;;  %3398 = vmatpush1.bf16.msra.mxu1 %v5177_v14 }
0x2f8f   :  { %3358 = vmatprep.subr.bf16.mxu0 %v5184_v15  ;;  %3399 = vmatprep.subr.bf16.mxu1 %v5189_v16 }
0x2f92   :  { %3359 = vmatpush1.bf16.msra.mxu0 %v5196_v17  ;;  %3400 = vmatpush1.bf16.msra.mxu1 %v5201_v30 }
0x2f93   :  { %3473 = vmatprep.subr.bf16.mxu0 %v5011_v42  ;;  %3514 = vmatprep.subr.bf16.mxu1 %v5016_v43 }
0x3035   :  { %v3264_v21 = vpop.f32.mrf.mxu0  ;;  %v3305_v48 = vpop.f32.mrf.mxu1 }
0x3036   :  { %v3312_v18 = vadd.f32 %v3264_v21, %v5248_v39  ;;  %v3314_v49 = vadd.f32 %v3305_v48, %v5250_v40 }
0x3037   :  { %v3266_v33 = vpop.f32.mrf.mxu0  ;;  %v3307_v19 = vpop.f32.mrf.mxu1 }
0x3038   :  { %v3869_v35 = vmul.f32 -1.442695, %v3312_v18  ;;  %v3313_v38 = vadd.f32 %v3266_v33, %v5252_v44  ;;  %v3315_v42 = vadd.f32 %v3307_v19, %v5254_v45 }
0x3039   :  { %v3268_v26 = vpop.f32.mrf.mxu0  ;;  %v3309_v32 = vpop.f32.mrf.mxu1 }
0x303a   :  { %4435 = vpow2.f32 %v3869_v35  ;;  %v3870_v34 = vmul.f32 -1.442695, %v3313_v38  ;;  %v3871_v36 = vmul.f32 -1.442695, %v3315_v42  ;;  %v4506_v42 = vld [vmem:[%s5600_s5 + $0xe0] ss:$16 sps:$4 sm:$0xff]  }
0x303b   :  { %v3269_v46 = vpop.f32.mrf.mxu0  ;;  %v3310_v28 = vpop.f32.mrf.mxu1 }
0x303c   :  { %4437 = vpow2.f32 %v3870_v34 }
0x303d   :  { %4439 = vpow2.f32 %v3871_v36  ;;  %v4507_v36 = vld [vmem:[%s5600_s5 + $0xe8] ss:$16 sps:$4 sm:$0xff]  }
0x3047   :  { %v4436_v43 = vpop.eup %4435 }
0x3048   :  { %v3319_v41 = vadd.f32 1.0, %v4436_v43  ;;  %v4508_v43 = vld [vmem:[%s5600_s5 + $0xc4] ss:$16 sps:$4 sm:$0xff]  }
0x3049   :  { %v4438_v20 = vpop.eup %4437 }
0x304a   :  { %4441 = vrcp.f32 %v3319_v41  ;;  %v3325_v10 = vadd.f32 1.0, %v4438_v20  ;;  %v4440_v47 = vpop.eup %4439  ;;  %v4510_v41 = vld [vmem:[%s5600_s5 + $0xc0] ss:$16 sps:$4 sm:$0xff]   ;;  %v4511_v20 = vld [vmem:[%s5600_s5 + $0xc8] ss:$16 sps:$4 sm:$0xff]  }
0x304b   :  { %4443 = vtanh.f32 %v3314_v49  ;;  %v3332_v31 = vadd.f32 1.0, %v4440_v47  ;;  %v4509_v49 = vld [vmem:[%s5600_s5 + $0xcc] ss:$16 sps:$4 sm:$0xff]  }
0x304c   :  { %4445 = vrcp.f32 %v3325_v10  ;;  %v4512_v10 = vld [vmem:[%s5600_s5 + $0xa4] ss:$16 sps:$4 sm:$0xff]   ;;  %v4513_v47 = vld [vmem:[%s5600_s5 + $0xac] ss:$16 sps:$4 sm:$0xff]  }
0x304d   :  { %4447 = vrcp.f32 %v3332_v31  ;;  %v4519_v31 = vld [vmem:[%s5600_s5 + $0x88] ss:$16 sps:$4 sm:$0xff]  }
0x3057   :  { %v4442_v50 = vpop.eup %4441 }
0x3058   :  { %v4444_v22 = vpop.eup %4443 }
0x3059   :  { %v4446_v29 = vpop.eup %4445  ;;  %v3339_v25 = vmul.f32 %v4444_v22, %v4442_v50  ;;  %v4515_v50 = vld [vmem:[%s5600_s5 + $0xa8] ss:$16 sps:$4 sm:$0xff]   ;;  %v4516_v22 = vld [vmem:[%s5600_s5 + $0x84] ss:$16 sps:$4 sm:$0xff]  }
0x305a   :  { %v3338_v55 = vmul.f32 %v4446_v29, %v3336_v37  ;;  %v4448_v21 = vpop.eup %4447  ;;  %v4517_v37 = vld [vmem:[%s5600_s5 + $0x8c] ss:$16 sps:$4 sm:$0xff]   ;;  %v4518_v29 = vld [vmem:[%s5600_s5 + $0x80] ss:$16 sps:$4 sm:$0xff]  }
0x305c   :  { %v5436_v3 = vadd.f32 %v3339_v25, %v3338_v55  ;;  %v4520_v25 = vld [vmem:[%s5600_s5 + $0x64] ss:$16 sps:$4 sm:$0xff]   ;;  %v4521_v55 = vld [vmem:[%s5600_s5 + $0x6c] ss:$16 sps:$4 sm:$0xff]  }
0x305e   :  { %4449 = vtanh.f32 %v5436_v3 }
0x306b   :  { %v4450_v48 = vpop.eup %4449 }
0x306c   :  { %v3342_v18 = vmul.f32 %v4450_v48, %v4448_v21  ;;  %v4523_v21 = vld [vmem:[%s5600_s5 + $0x68] ss:$16 sps:$4 sm:$0xff]   ;;  %v4524_v48 = vld [vmem:[%s5600_s5 + $0x44] ss:$16 sps:$4 sm:$0xff]  }
0x306e   :  { %v3343_v33 = vpack.c.bf16 %v3342_v18, %v3342_v18  ;;  %v4525_v18 = vld [vmem:[%s5600_s5 + $0x4c] ss:$16 sps:$4 sm:$0xff]  }
0x3070   :  { %3377 = vmatmul.mubr.bf16.vlgmr.msra.gmra.mxu0 %v3343_v33  ;;  %3418 = vmatmul.mubr.bf16.vlgmr.msra.gmra.mxu1 %v3343_v33  ;;  %v4526_v33 = vld [vmem:[%s5600_s5 + $0x40] ss:$16 sps:$4 sm:$0xff]  }
0x3071   :  { %3474 = vmatpush1.bf16.msra.mxu0 %v5026_v4  ;;  %3515 = vmatpush1.bf16.msra.mxu1 %v5031_v52  ;;  %v4504_v4 = vld [vmem:[%s5600_s5 + $0xe4] ss:$16 sps:$4 sm:$0xff]   ;;  %v4505_v52 = vld [vmem:[%s5600_s5 + $0xec] ss:$16 sps:$4 sm:$0xff]  }
0x3072   :  { %3475 = vmatprep.subr.bf16.mxu0 %v5036_v53  ;;  %3516 = vmatprep.subr.bf16.mxu1 %v5041_v54 }
0x3073   :  { %3505 = vmatprep.mubr.bf16.mxu0 %v4537_v2  ;;  %3546 = vmatprep.mubr.bf16.mxu1 %v4537_v2 }
0x3075   :  { %3476 = vmatpush1.bf16.msra.mxu0 %v5050_v56  ;;  %3517 = vmatpush1.bf16.msra.mxu1 %v5055_v0 }
0x3076   :  { %3477 = vmatprep.subr.bf16.mxu0 %v5062_v57  ;;  %3518 = vmatprep.subr.bf16.mxu1 %v5067_v27 }
0x3079   :  { %3478 = vmatpush1.bf16.msra.mxu0 %v5076_v58  ;;  %3519 = vmatpush1.bf16.msra.mxu1 %v5081_v6 }
0x307a   :  { %3479 = vmatprep.subr.bf16.mxu0 %v5088_v59  ;;  %3520 = vmatprep.subr.bf16.mxu1 %v5093_v60 }
0x307d   :  { %3480 = vmatpush1.bf16.msra.mxu0 %v5100_v61  ;;  %3521 = vmatpush1.bf16.msra.mxu1 %v5105_v62 }
0x307e   :  { %3481 = vmatprep.subr.bf16.mxu0 %v5112_v63  ;;  %3522 = vmatprep.subr.bf16.mxu1 %v5117_v1 }
0x3081   :  { %3482 = vmatpush1.bf16.msra.mxu0 %v5124_v5  ;;  %3523 = vmatpush1.bf16.msra.mxu1 %v5129_v7 }
0x3082   :  { %3483 = vmatprep.subr.bf16.mxu0 %v5136_v8  ;;  %3524 = vmatprep.subr.bf16.mxu1 %v5141_v9 }
0x3085   :  { %3484 = vmatpush1.bf16.msra.mxu0 %v5148_v24  ;;  %3525 = vmatpush1.bf16.msra.mxu1 %v5153_v11 }
0x3086   :  { %3485 = vmatprep.subr.bf16.mxu0 %v5160_v23  ;;  %3526 = vmatprep.subr.bf16.mxu1 %v5165_v12 }
0x3089   :  { %3486 = vmatpush1.bf16.msra.mxu0 %v5172_v13  ;;  %3527 = vmatpush1.bf16.msra.mxu1 %v5177_v14 }
0x308a   :  { %3487 = vmatprep.subr.bf16.mxu0 %v5184_v15  ;;  %3528 = vmatprep.subr.bf16.mxu1 %v5189_v16 }
0x308d   :  { %3488 = vmatpush1.bf16.msra.mxu0 %v5196_v17  ;;  %3529 = vmatpush1.bf16.msra.mxu1 %v5201_v30  ;;  %v3462_v17 = vrot.slane %v5436_v3, 6  ;;  %v4522_v3 = vld [vmem:[%s5600_s5 + $0x60] ss:$16 sps:$4 sm:$0xff]  }
0x308e   :  { %3602 = vmatprep.subr.bf16.mxu0 %v4504_v4  ;;  %3643 = vmatprep.subr.bf16.mxu1 %v4505_v52  ;;  %v4527_v4 = vld [vmem:[%s5600_s5 + $0x48] ss:$16 sps:$4 sm:$0xff]   ;;  %v4528_v52 = vld [vmem:[%s5600_s5 + $0x24] ss:$16 sps:$4 sm:$0xff]  }
0x3130   :  { %v3378_v53 = vpop.f32.mrf.mxu0  ;;  %v3419_v54 = vpop.f32.mrf.mxu1 }
0x3131   :  { %v3430_v56 = vrot.slane %v3378_v53, 6  ;;  %v3432_v8 = vrot.slane %v3419_v54, 6  ;;  %v4529_v53 = vld [vmem:[%s5600_s5 + $0x2c] ss:$16 sps:$4 sm:$0xff]   ;;  %v4530_v54 = vld [vmem:[%s5600_s5 + $0x20] ss:$16 sps:$4 sm:$0xff]  }
0x3132   :  { %v3380_v0 = vpop.f32.mrf.mxu0  ;;  %v3421_v57 = vpop.f32.mrf.mxu1 }
0x3133   :  { %v3438_v27 = vadd.f32 %v3430_v56, %v5248_v39  ;;  %v3431_v58 = vrot.slane %v3380_v0, 6  ;;  %v3433_v5 = vrot.slane %v3421_v57, 6  ;;  %v3440_v11 = vadd.f32 %v3432_v8, %v5250_v40  ;;  %v4531_v56 = vld [vmem:[%s5600_s5 + $0x28] ss:$16 sps:$4 sm:$0xff]   ;;  %v4532_v0 = vld [vmem:[%s5600_s5 + $0x4] ss:$16 sps:$4 sm:$0xff]  }
0x3134   :  { %v3382_v6 = vpop.f32.mrf.mxu0  ;;  %v3423_v59 = vpop.f32.mrf.mxu1  ;;  %v4533_v57 = vld [vmem:[%s5600_s5 + $0xc] ss:$16 sps:$4 sm:$0xff]  }
0x3135   :  { %v3872_v60 = vmul.f32 -1.442695, %v3438_v27  ;;  %v3439_v61 = vadd.f32 %v3431_v58, %v5252_v44  ;;  %v3441_v7 = vadd.f32 %v3433_v5, %v5254_v45  ;;  %v4534_v27 = vld [vmem:[%s5600_s5] ss:$16 sps:$4 sm:$0xff]   ;;  %v4535_v58 = vld [vmem:[%s5600_s5 + $0x8] ss:$16 sps:$4 sm:$0xff]  }
0x3136   :  { %v3383_v62 = vpop.f32.mrf.mxu0  ;;  %v3424_v63 = vpop.f32.mrf.mxu1 }
0x3137   :  { %4451 = vpow2.f32 %v3872_v60  ;;  %v3873_v1 = vmul.f32 -1.442695, %v3439_v61  ;;  %v3874_v9 = vmul.f32 -1.442695, %v3441_v7 }
0x3139   :  { %4453 = vpow2.f32 %v3873_v1 }
0x313a   :  { %4455 = vpow2.f32 %v3874_v9 }
0x3144   :  { %v4452_v24 = vpop.eup %4451 }
0x3145   :  { %v3445_v23 = vadd.f32 1.0, %v4452_v24 }
0x3146   :  { %v4454_v12 = vpop.eup %4453 }
0x3147   :  { %4457 = vrcp.f32 %v3445_v23  ;;  %v3451_v13 = vadd.f32 1.0, %v4454_v12  ;;  %v4456_v14 = vpop.eup %4455 }
0x3148   :  { %4459 = vtanh.f32 %v3440_v11  ;;  %v3458_v51 = vadd.f32 1.0, %v4456_v14 }
0x3149   :  { %4461 = vrcp.f32 %v3451_v13 }
0x314a   :  { %4463 = vrcp.f32 %v3458_v51 }
0x3154   :  { %v4458_v15 = vpop.eup %4457 }
0x3155   :  { %v4460_v16 = vpop.eup %4459 }
0x3156   :  { %v4462_v30 = vpop.eup %4461  ;;  %v3465_v19 = vmul.f32 %v4460_v16, %v4458_v15 }
0x3157   :  { %v3464_v35 = vmul.f32 %v4462_v30, %v3462_v17  ;;  %v4464_v26 = vpop.eup %4463 }
0x3159   :  { %v5482_v38 = vadd.f32 %v3465_v19, %v3464_v35 }
0x315b   :  { %4465 = vtanh.f32 %v5482_v38 }
0x3168   :  { %v4466_v32 = vpop.eup %4465 }
0x3169   :  { %v3468_v34 = vmul.f32 %v4466_v32, %v4464_v26 }
0x316b   :  { %v3469_v46 = vpack.c.bf16 %v3468_v34, %v3468_v34  ;;  %v3591_v34 = vrot.slane %v5482_v38, 6 }
0x316d   :  { %v3471_v28 = vrot.slane %v3469_v46, 1 }
0x316f   :  { %3506 = vmatmul.mubr.bf16.vlgmr.msra.gmra.mxu0 %v3471_v28  ;;  %3547 = vmatmul.mubr.bf16.vlgmr.msra.gmra.mxu1 %v3471_v28 }
0x3170   :  { %3603 = vmatpush1.bf16.msra.mxu0 %v4506_v42  ;;  %3644 = vmatpush1.bf16.msra.mxu1 %v4507_v36 }
0x3171   :  { %3604 = vmatprep.subr.bf16.mxu0 %v4508_v43  ;;  %3645 = vmatprep.subr.bf16.mxu1 %v4509_v49 }
0x3172   :  { %3634 = vmatprep.mubr.bf16.mxu0 %v4537_v2  ;;  %3675 = vmatprep.mubr.bf16.mxu1 %v4537_v2  ;;  %v4514_v2 = vld [vmem:[%s5600_s5 + $0xa0] ss:$16 sps:$4 sm:$0xff]  }
0x3174   :  { %3605 = vmatpush1.bf16.msra.mxu0 %v4510_v41  ;;  %3646 = vmatpush1.bf16.msra.mxu1 %v4511_v20 }
0x3175   :  { %3606 = vmatprep.subr.bf16.mxu0 %v4512_v10  ;;  %3647 = vmatprep.subr.bf16.mxu1 %v4513_v47 }
0x3178   :  { %3607 = vmatpush1.bf16.msra.mxu0 %v4514_v2  ;;  %3648 = vmatpush1.bf16.msra.mxu1 %v4515_v50  ;;  %v14_v2 = vstv %s5602_s8 }
0x3179   :  { %3608 = vmatprep.subr.bf16.mxu0 %v4516_v22  ;;  %3649 = vmatprep.subr.bf16.mxu1 %v4517_v37  ;;  %15 = vst [vmem:[#allocation2] sm:$0x1] %v14_v2 }
0x317c   :  { %3609 = vmatpush1.bf16.msra.mxu0 %v4518_v29  ;;  %3650 = vmatpush1.bf16.msra.mxu1 %v4519_v31 }
0x317d   :  { %3610 = vmatprep.subr.bf16.mxu0 %v4520_v25  ;;  %3651 = vmatprep.subr.bf16.mxu1 %v4521_v55 }
0x3180   :  { %3611 = vmatpush1.bf16.msra.mxu0 %v4522_v3  ;;  %3652 = vmatpush1.bf16.msra.mxu1 %v4523_v21 }
0x3181   :  { %3612 = vmatprep.subr.bf16.mxu0 %v4524_v48  ;;  %3653 = vmatprep.subr.bf16.mxu1 %v4525_v18 }
0x3184   :  { %3613 = vmatpush1.bf16.msra.mxu0 %v4526_v33  ;;  %3654 = vmatpush1.bf16.msra.mxu1 %v4527_v4 }
0x3185   :  { %3614 = vmatprep.subr.bf16.mxu0 %v4528_v52  ;;  %3655 = vmatprep.subr.bf16.mxu1 %v4529_v53 }
0x3188   :  { %3615 = vmatpush1.bf16.msra.mxu0 %v4530_v54  ;;  %3656 = vmatpush1.bf16.msra.mxu1 %v4531_v56 }
0x3189   :  { %3616 = vmatprep.subr.bf16.mxu0 %v4532_v0  ;;  %3657 = vmatprep.subr.bf16.mxu1 %v4533_v57 }
0x318c   :  { %3617 = vmatpush1.bf16.msra.mxu0 %v4534_v27  ;;  %3658 = vmatpush1.bf16.msra.mxu1 %v4535_v58 }
0x322f   :  { %v3507_v6 = vpop.f32.mrf.mxu0  ;;  %v3548_v59 = vpop.f32.mrf.mxu1 }
0x3230   :  { %v3559_v60 = vrot.slane %v3507_v6, 4  ;;  %v3561_v14 = vrot.slane %v3548_v59, 4 }
0x3231   :  { %v3509_v61 = vpop.f32.mrf.mxu0  ;;  %v3550_v62 = vpop.f32.mrf.mxu1 }
0x3232   :  { %v3567_v63 = vadd.f32 %v3559_v60, %v5248_v39  ;;  %v3560_v1 = vrot.slane %v3509_v61, 4  ;;  %v3562_v12 = vrot.slane %v3550_v62, 4  ;;  %v3569_v17 = vadd.f32 %v3561_v14, %v5250_v40 }
0x3233   :  { %v3511_v5 = vpop.f32.mrf.mxu0  ;;  %v3552_v7 = vpop.f32.mrf.mxu1 }
0x3234   :  { %v3875_v8 = vmul.f32 -1.442695, %v3567_v63  ;;  %v3568_v9 = vadd.f32 %v3560_v1, %v5252_v44  ;;  %v3570_v13 = vadd.f32 %v3562_v12, %v5254_v45  ;;  %v3881_v7 = vld [vmem:[%s5603_s7] ss:$0 sm:$0xff] }
0x3235   :  { %v3512_v24 = vpop.f32.mrf.mxu0  ;;  %v3553_v11 = vpop.f32.mrf.mxu1 }
0x3236   :  { %4467 = vpow2.f32 %v3875_v8  ;;  %v3876_v23 = vmul.f32 -1.442695, %v3568_v9  ;;  %v3877_v15 = vmul.f32 -1.442695, %v3570_v13  ;;  %v3882_v11 = vld [vmem:[#allocation2] ss:$0 sm:$0xff] }
0x3238   :  { %4469 = vpow2.f32 %v3876_v23 }
0x3239   :  { %4471 = vpow2.f32 %v3877_v15 }
0x3243   :  { %v4468_v16 = vpop.eup %4467 }
0x3244   :  { %v3574_v30 = vadd.f32 1.0, %v4468_v16 }
0x3245   :  { %v4470_v51 = vpop.eup %4469 }
0x3246   :  { %4473 = vrcp.f32 %v3574_v30  ;;  %v3580_v19 = vadd.f32 1.0, %v4470_v51  ;;  %v4472_v35 = vpop.eup %4471 }
0x3247   :  { %4475 = vtanh.f32 %v3569_v17  ;;  %v3587_v28 = vadd.f32 1.0, %v4472_v35 }
0x3248   :  { %4477 = vrcp.f32 %v3580_v19 }
0x3249   :  { %4479 = vrcp.f32 %v3587_v28 }
0x3253   :  { %v4474_v26 = vpop.eup %4473 }
0x3254   :  { %v4476_v32 = vpop.eup %4475 }
0x3255   :  { %v4478_v46 = vpop.eup %4477  ;;  %v3594_v42 = vmul.f32 %v4476_v32, %v4474_v26 }
0x3256   :  { %v3593_v36 = vmul.f32 %v4478_v46, %v3591_v34  ;;  %v4480_v49 = vpop.eup %4479 }
0x3258   :  { %v3595_v43 = vadd.f32 %v3594_v42, %v3593_v36 }
0x325a   :  { %4481 = vtanh.f32 %v3595_v43  ;;  %v3720_v60 = vrot.slane %v3595_v43, 6 }
0x3267   :  { %v4482_v41 = vpop.eup %4481 }
0x3268   :  { %v3597_v20 = vmul.f32 %v4482_v41, %v4480_v49 }
0x326a   :  { %v3598_v10 = vpack.c.bf16 %v3597_v20, %v3597_v20 }
0x326c   :  { %v3600_v47 = vrot.slane %v3598_v10, 2 }
0x326e   :  { %3635 = vmatmul.mubr.bf16.vlgmr.msra.gmra.mxu0 %v3600_v47  ;;  %3676 = vmatmul.mubr.bf16.vlgmr.msra.gmra.mxu1 %v3600_v47 }
0x332e   :  { %v3636_v38 = vpop.f32.mrf.mxu0  ;;  %v3677_v50 = vpop.f32.mrf.mxu1 }
0x332f   :  { %v3688_v22 = vrot.slane %v3636_v38, 2  ;;  %v3690_v54 = vrot.slane %v3677_v50, 2 }
0x3330   :  { %v3638_v37 = vpop.f32.mrf.mxu0  ;;  %v3679_v29 = vpop.f32.mrf.mxu1 }
0x3331   :  { %v3696_v31 = vadd.f32 %v3688_v22, %v5248_v39  ;;  %v3689_v25 = vrot.slane %v3638_v37, 2  ;;  %v3691_v52 = vrot.slane %v3679_v29, 2  ;;  %v3698_v57 = vadd.f32 %v3690_v54, %v5250_v40 }
0x3332   :  { %v3640_v55 = vpop.f32.mrf.mxu0  ;;  %v3681_v3 = vpop.f32.mrf.mxu1 }
0x3333   :  { %v3878_v21 = vmul.f32 -1.442695, %v3696_v31  ;;  %v3697_v48 = vadd.f32 %v3689_v25, %v5252_v44  ;;  %v3699_v53 = vadd.f32 %v3691_v52, %v5254_v45 }
0x3334   :  { %v3641_v18 = vpop.f32.mrf.mxu0  ;;  %v3682_v33 = vpop.f32.mrf.mxu1 }
0x3335   :  { %4483 = vpow2.f32 %v3878_v21  ;;  %v3879_v4 = vmul.f32 -1.442695, %v3697_v48  ;;  %v3880_v56 = vmul.f32 -1.442695, %v3699_v53 }
0x3337   :  { %4485 = vpow2.f32 %v3879_v4 }
0x3338   :  { %4487 = vpow2.f32 %v3880_v56 }
0x3342   :  { %v4484_v0 = vpop.eup %4483 }
0x3343   :  { %v3703_v39 = vadd.f32 1.0, %v4484_v0 }
0x3344   :  { %v4486_v27 = vpop.eup %4485 }
0x3345   :  { %4489 = vrcp.f32 %v3703_v39  ;;  %v3709_v58 = vadd.f32 1.0, %v4486_v27  ;;  %v4488_v44 = vpop.eup %4487 }
0x3346   :  { %4491 = vtanh.f32 %v3698_v57  ;;  %v3716_v62 = vadd.f32 1.0, %v4488_v44 }
0x3347   :  { %4493 = vrcp.f32 %v3709_v58 }
0x3348   :  { %4495 = vrcp.f32 %v3716_v62 }
0x3352   :  { %v4490_v6 = vpop.eup %4489 }
0x3353   :  { %v4492_v59 = vpop.eup %4491 }
0x3354   :  { %v4494_v61 = vpop.eup %4493  ;;  %v3723_v63 = vmul.f32 %v4492_v59, %v4490_v6 }
0x3355   :  { %v3722_v45 = vmul.f32 %v4494_v61, %v3720_v60  ;;  %v4496_v5 = vpop.eup %4495 }
0x3357   :  { %v3724_v1 = vadd.f32 %v3723_v63, %v3722_v45 }
0x3359   :  { %4497 = vtanh.f32 %v3724_v1 }
0x3366   :  { %v4498_v40 = vpop.eup %4497 }
0x3367   :  { %v3726_v8 = vmul.f32 %v4498_v40, %v4496_v5 }
0x3369   :  { %v3734_v9 = vmul.f32 %v3881_v7, %v3726_v8 }
0x336b   :  { %v3736_v24 = vsel %vm3735_vm2, %v3734_v9, 0.0 }
0x336c   :  { %3737 = vadd.xlane.f32.xlu0 %v3736_v24 }
0x33f5   :  { %v3738_v23 = vpop.xlane.xlu0 %3737 }
0x33f6   :  { %v3746_v12 = vadd.f32 %v3882_v11, %v3738_v23 }
0x33f8   :  { %3748 = vst.msk [vmem:[%s5604_s9 - $0x6] sm:$0xc0] %vm3747_vm3, %v3746_v12 }

</bundles_post_ra>
